<compile_context>
chip_gen: v6e
topology: v6e:2x2x1
jax: 0.10.0
libtpu: 0.0.40
codegen_flags: <defaults>
</compile_context>

<pallas_src>
import numpy as np
import jax
import jax.numpy as jnp
from jax.experimental import pallas as pl
from jax.experimental.pallas import tpu as pltpu

NEG_SLOPE = 0.2                       # GATv2Conv default negative_slope
LIN_C = (1.0 + NEG_SLOPE) / 2.0       # 0.6   leaky_relu(h) = LIN_C*h + ABS_C*|h|
ABS_C = (1.0 - NEG_SLOPE) / 2.0       # 0.4
MASK_NEG = -1e30                      # additive mask for missing edges (finite, bf16-representable)
M_INIT = -3.0e38                      # online-softmax running-max init (finite -> no inf/NaN math)


def gatv2_kernel(x_col_ref, x_row_ref, lhs_ref, eaT_ref, maskb_ref,
                 chan_ref, lin_ref, pcol_ref, out_ref,
                 m_ref, d_ref, s_ref):
    """One (target-tile i, source-chunk j) grid step.

    x_col_ref : [TJ, 1]    f32  node features of this source chunk (sublanes)
    x_row_ref : [1, TI]    f32  node features of this target tile (lanes)
    lhs_ref   : [8, TJ]    f32  rows 0/1 = ones / x of this source chunk (MXU reduction LHS)
    eaT_ref   : [TJ, TI]   bf16 eaT[j, i] = scalar attr of edge j -> i (0 if absent)
    maskb_ref : [TJ, TI]   bf16 0 where edge j -> i exists (incl. self loops), -1e30 otherwise
    chan_ref  : SMEM [5,C] f32  rows: we, wl, wr, bl+br, 0.4*att
    lin_ref   : SMEM [1,4] f32  0.6 * [att.we, att.wl, att.wr, att.(bl+br)]
    pcol_ref  : [Cp, 2]    f32  col 0: wl, col 1: bl + bias
    out_ref   : [Cp, TI]   f32  out[c, i]
    m/d/s_ref : [1, TI]    f32  online-softmax carry (running max / denom / weighted sum)
    """
    j = pl.program_id(1)

    @pl.when(j == 0)
    def _():
        m_ref[...] = jnp.full_like(m_ref, M_INIT)
        d_ref[...] = jnp.zeros_like(d_ref)
        s_ref[...] = jnp.zeros_like(s_ref)

    x_src = x_col_ref[...]                                   # [TJ, 1]
    x_tgt = x_row_ref[...]                                   # [1, TI]
    ea = eaT_ref[...].astype(jnp.float32)                    # [TJ, TI]
    C = chan_ref.shape[1]

    # Linear-in-h part of sum_c att_c*leaky_relu(h_c), hoisted out of the channel loop
    # (coefficients pre-scaled by 0.6 on host). The additive mask folds into the same slab.
    col_lin = x_src * lin_ref[0, 1]                          # [TJ, 1]
    row_lin = x_tgt * lin_ref[0, 2] + lin_ref[0, 3]          # [1, TI]
    logit = maskb_ref[...].astype(jnp.float32) + (ea * lin_ref[0, 0] + col_lin) + row_lin

    # Per-channel 0.4*att_c*|h_c| accumulation (C is tiny; loop unrolls at trace time).
    # TODO(synk): switch to a lax.fori_loop over channel blocks if C grows large (>= 32).
    for c in range(C):
        we_c = chan_ref[0, c]
        wl_c = chan_ref[1, c]
        wr_c = chan_ref[2, c]
        b_c = chan_ref[3, c]
        a_c = chan_ref[4, c]
        h = (ea * we_c + x_src * wl_c) + (x_tgt * wr_c + b_c)
        logit = logit + a_c * jnp.abs(h)

    # Online softmax over source chunks (normalization deferred to the finalize step).
    m_blk = jnp.max(logit, axis=0, keepdims=True)            # [1, TI]
    m_new = jnp.maximum(m_ref[...], m_blk)
    scale = jnp.exp(m_ref[...] - m_new)                      # [1, TI]
    p = jnp.exp(logit - m_new)                               # masked entries underflow to 0
    # Denominator + alpha-weighted feature sum on the otherwise idle MXU: [8, TJ] @ [TJ, TI].
    red = jnp.dot(lhs_ref[...], p, preferred_element_type=jnp.float32)   # [8, TI]
    d_ref[...] = d_ref[...] * scale + red[0:1, :]
    s_ref[...] = s_ref[...] * scale + red[1:2, :]
    m_ref[...] = m_new

    @pl.when(j == pl.num_programs(1) - 1)
    def _():
        s_norm = s_ref[...] * pl.reciprocal(d_ref[...], approx=False)    # [1, TI]
        # Rank-1 output: out[c, i] = wl[c] * s[i] + (bl[c] + bias[c]).
        out_ref[...] = pcol_ref[:, 0:1] * s_norm + pcol_ref[:, 1:2]


def _round_up(a, b):
    return -(-a // b) * b


def _choose_tiling(n):
    """Return (n_pad, tile_i, tile_j).  512x512 blocks keep VMEM use size-independent."""
    TILE = 512
    if n <= TILE:
        n_pad = _round_up(max(n, 1), 128)      # 128 lanes -> unmasked output stores
        return n_pad, n_pad, n_pad
    n_pad = _round_up(n, TILE)
    return n_pad, TILE, TILE


def _vmem_cap_bytes():
    """Physical per-TensorCore VMEM, detected from the device kind (conservative fallback)."""
    try:
        kind = jax.devices()[0].device_kind.lower()
    except Exception:
        return 64 << 20
    if "v7" in kind:
        return 64 << 20
    for tag in ("v4", "v5", "v6"):
        if tag in kind:
            return 128 << 20
    return 64 << 20


def gatv2_pallas(x_col, x_row, lhs, eaT, maskb, chan, lin, pcol, tile_i, tile_j):
    n_pad = x_col.shape[0]
    c_pad = pcol.shape[0]
    grid = (n_pad // tile_i, n_pad // tile_j)

    # VMEM budget: streamed bf16 blocks (double-buffered) + residents (incl. the lane-padded
    # x column block) + in-kernel slab temporaries, clamped generation-aware.
    streamed = 2 * 2 * tile_j * tile_i * 2                      # eaT + maskb, bf16, 2 buffers
    resident = 2 * (tile_j * 128 * 4                            # x column block (lane-padded)
                    + 8 * tile_i * 4                            # x row block (sublane-padded)
                    + 8 * tile_j * 4                            # [ones; x] MXU LHS block
                    + c_pad * 128 * 4                           # output constants (lane-padded)
                    + c_pad * tile_i * 4)                       # output block
    temps = 6 * tile_j * tile_i * 4                             # f32 slab intermediates
    need = streamed + resident + temps + (4 << 20)
    hard = (48 << 20) if _vmem_cap_bytes() <= (64 << 20) else (100 << 20)
    vmem_limit = int(min(max(need, 32 << 20), hard))

    return pl.pallas_call(
        gatv2_kernel,
        out_shape=jax.ShapeDtypeStruct((c_pad, n_pad), jnp.float32),
        grid_spec=pltpu.PrefetchScalarGridSpec(
            num_scalar_prefetch=0,
            grid=grid,
            in_specs=[
                pl.BlockSpec((tile_j, 1), lambda i, j: (j, 0)),        # x, source chunk
                pl.BlockSpec((1, tile_i), lambda i, j: (0, i)),        # x, target tile
                pl.BlockSpec((8, tile_j), lambda i, j: (0, j)),        # [ones; x] MXU LHS
                pl.BlockSpec((tile_j, tile_i), lambda i, j: (j, i)),   # edge attrs (bf16)
                pl.BlockSpec((tile_j, tile_i), lambda i, j: (j, i)),   # additive mask (bf16)
                pl.BlockSpec(memory_space=pltpu.MemorySpace.SMEM),     # per-channel scalars
                pl.BlockSpec(memory_space=pltpu.MemorySpace.SMEM),     # hoisted linear coeffs
                pl.BlockSpec((c_pad, 2), lambda i, j: (0, 0)),         # output constants
            ],
            out_specs=pl.BlockSpec((c_pad, tile_i), lambda i, j: (0, i)),
            scratch_shapes=[pltpu.VMEM((1, tile_i), jnp.float32)] * 3,
        ),
        compiler_params=pltpu.CompilerParams(
            dimension_semantics=("parallel", "arbitrary"),
            vmem_limit_bytes=vmem_limit,
        ),
    )(x_col, x_row, lhs, eaT, maskb, chan, lin, pcol)


def _canonical_edges(edge_index, edge_attr, num_nodes):
    """remove_self_loops + add_self_loops(fill_value='mean') -> (src, dst, attr)."""
    edge_index = np.asarray(edge_index)
    attr = np.asarray(edge_attr, np.float64).reshape(-1)
    src = edge_index[0].astype(np.int64)
    dst = edge_index[1].astype(np.int64)
    keep = src != dst
    src, dst, attr = src[keep], dst[keep], attr[keep]
    sums = np.zeros(num_nodes, np.float64)
    cnt = np.zeros(num_nodes, np.float64)
    np.add.at(sums, dst, attr)
    np.add.at(cnt, dst, 1.0)
    loop_attr = np.where(cnt > 0, sums / np.maximum(cnt, 1.0), 0.0)
    idx = np.arange(num_nodes)
    return (np.concatenate([src, idx]),
            np.concatenate([dst, idx]),
            np.concatenate([attr, loop_attr]))


def _dense_graph_T(src, dst, attr, n_pad):
    """Densified, transposed graph (source j on sublanes, target i on lanes), bf16 streams.

    TODO(synk): dense adjacency assumes a simple graph (parallel edges between the same pair
    collapse); for very large graphs a sparse / scalar-prefetch formulation should replace this
    O(N^2) host-side densification.
    """
    eaT = np.zeros((n_pad, n_pad), np.float32)
    maskb = np.full((n_pad, n_pad), MASK_NEG, np.float32)
    eaT[src, dst] = attr
    maskb[src, dst] = 0.0
    idx = np.arange(n_pad)
    maskb[idx, idx] = 0.0       # padded nodes get an isolated self loop -> finite softmax
    return jnp.asarray(eaT, jnp.bfloat16), jnp.asarray(maskb, jnp.bfloat16)


def init_params(key, embedding_size):
    """GATv2Conv(1, embedding_size//3, edge_dim=1, heads=1): glorot weights, zero biases."""
    C = embedding_size // 3
    k1, k2, k3, k4 = jax.random.split(key, 4)

    def glorot(k, shape):
        lim = np.sqrt(6.0 / (shape[0] + shape[1]))
        return jax.random.uniform(k, shape, jnp.float32, -lim, lim)

    return dict(
        wl=glorot(k1, (1, C)),                 # lin_l.weight (in=1 -> C)
        bl=jnp.zeros((1, C), jnp.float32),     # lin_l.bias
        wr=glorot(k2, (1, C)),                 # lin_r.weight
        br=jnp.zeros((1, C), jnp.float32),     # lin_r.bias
        we=glorot(k3, (1, C)),                 # lin_edge.weight (edge_dim=1 -> C, no bias)
        att=glorot(k4, (1, C)),                # att (1, heads=1, C)
        bias=jnp.zeros((1, C), jnp.float32),   # output bias (heads * C)
    )


def graph_embeddings_forward(params, x, edge_index, edge_attr):
    """Mirrors GraphEmbeddings.forward: GATv2Conv -> flatten -> unsqueeze(0)."""
    x = np.asarray(x, np.float32).reshape(-1)            # [N] node features (1 per node)
    N = x.shape[0]
    C = int(np.asarray(params["wl"]).shape[1])
    C_pad = _round_up(C, 8)
    n_pad, tile_i, tile_j = _choose_tiling(N)

    src, dst, attr = _canonical_edges(edge_index, edge_attr, N)
    eaT, maskb = _dense_graph_T(src, dst, attr, n_pad)

    x_pad = np.zeros((n_pad,), np.float32)
    x_pad[:N] = x
    x_col = jnp.asarray(x_pad.reshape(n_pad, 1))          # source axis on sublanes
    x_row = jnp.asarray(x_pad.reshape(1, n_pad))          # target axis on lanes
    lhs = np.zeros((8, n_pad), np.float32)                # MXU reduction LHS: [ones; x; 0...]
    lhs[0, :] = 1.0
    lhs[1, :] = x_pad
    lhs = jnp.asarray(lhs)

    wl = np.asarray(params["wl"], np.float32)[0]
    bl = np.asarray(params["bl"], np.float32)[0]
    wr = np.asarray(params["wr"], np.float32)[0]
    br = np.asarray(params["br"], np.float32)[0]
    we = np.asarray(params["we"], np.float32)[0]
    att = np.asarray(params["att"], np.float32)[0]
    bias = np.asarray(params["bias"], np.float32)[0]

    chan = np.stack([we, wl, wr, bl + br, ABS_C * att], axis=0).astype(np.float32)   # [5, C]
    lin = (LIN_C * np.array([[np.dot(att, we), np.dot(att, wl),
                              np.dot(att, wr), np.dot(att, bl + br)]])).astype(np.float32)
    pcol = np.zeros((C_pad, 2), np.float32)
    pcol[:C, 0] = wl
    pcol[:C, 1] = bl + bias

    out_t = gatv2_pallas(x_col, x_row, lhs, eaT, maskb,
                         jnp.asarray(chan), jnp.asarray(lin), jnp.asarray(pcol),
                         tile_i, tile_j)                  # [C_pad, n_pad], lane-dense
    node_emb = out_t[:C, :N].T                            # [N, C]
    return node_emb.reshape(1, -1)                        # (1, N * C)


def reference_forward(params, x, edge_index, edge_attr):
    """Pure-numpy GATv2Conv (heads=1) reference for validation."""
    x = np.asarray(x, np.float64).reshape(-1)
    N = x.shape[0]
    src, dst, attr = _canonical_edges(edge_index, edge_attr, N)
    wl = np.asarray(params["wl"], np.float64)[0]
    bl = np.asarray(params["bl"], np.float64)[0]
    wr = np.asarray(params["wr"], np.float64)[0]
    br = np.asarray(params["br"], np.float64)[0]
    we = np.asarray(params["we"], np.float64)[0]
    att = np.asarray(params["att"], np.float64)[0]
    bias = np.asarray(params["bias"], np.float64)[0]
    C = wl.shape[0]
    x_l = x[:, None] * wl[None, :] + bl
    x_r = x[:, None] * wr[None, :] + br
    h = x_l[src] + x_r[dst] + attr[:, None] * we[None, :]
    h = np.where(h >= 0, h, NEG_SLOPE * h)
    logit = h @ att
    out = np.zeros((N, C))
    for i in range(N):
        sel = dst == i
        l = logit[sel]
        p = np.exp(l - l.max())
        p = p / p.sum()
        out[i] = p @ x_l[src[sel]]
    return (out + bias).reshape(1, -1)


if __name__ == "__main__":
    key = jax.random.PRNGKey(0)
    kx, ke, kp = jax.random.split(key, 3)

    embedding_size = 24              # out_channels C = embedding_size // 3 = 8
    N = 8                            # number of graph nodes

    x = jax.random.normal(kx, (N, 1), jnp.float32)                 # node features (1 per node)
    src = np.array([0, 1, 2, 3, 4, 5, 6, 7, 0, 2, 4], np.int32)
    dst = np.array([1, 2, 3, 4, 5, 6, 7, 0, 4, 6, 1], np.int32)
    edge_index = np.stack([src, dst])                              # [2, E]
    edge_attr = np.asarray(jax.random.normal(ke, (edge_index.shape[1], 1), jnp.float32))

    params = init_params(kp, embedding_size)

    out = graph_embeddings_forward(params, np.asarray(x), edge_index, edge_attr)
    out = jax.block_until_ready(out)
    assert out.shape == (1, N * (embedding_size // 3)), out.shape
    assert bool(jnp.all(jnp.isfinite(out)))

    ref = reference_forward(params, np.asarray(x), edge_index, edge_attr)
    np.testing.assert_allclose(np.asarray(out, np.float64), ref, rtol=5e-2, atol=5e-2)
    print("KERNEL_OK")
</pallas_src>

<mosaic_0001>
module attributes {stable_mosaic.version = 11 : i64} {
  func.func @gatv2_kernel(%arg0: i32, %arg1: i32, %arg2: memref<128x1xf32, #tpu.memory_space<vmem>>, %arg3: memref<1x128xf32, #tpu.memory_space<vmem>>, %arg4: memref<8x128xf32, #tpu.memory_space<vmem>>, %arg5: memref<128x128xbf16, #tpu.memory_space<vmem>>, %arg6: memref<128x128xbf16, #tpu.memory_space<vmem>>, %arg7: memref<5x8xf32, #tpu.memory_space<smem>>, %arg8: memref<1x4xf32, #tpu.memory_space<smem>>, %arg9: memref<8x2xf32, #tpu.memory_space<vmem>>, %arg10: memref<8x128xf32, #tpu.memory_space<vmem>>, %arg11: memref<1x128xf32, #tpu.memory_space<vmem>>, %arg12: memref<1x128xf32, #tpu.memory_space<vmem>>, %arg13: memref<1x128xf32, #tpu.memory_space<vmem>>) attributes {dimension_semantics = [#tpu.dimension_semantics<parallel>, #tpu.dimension_semantics<arbitrary>], iteration_bounds = array<i64: 1, 1>, scalar_prefetch = 0 : i64, scratch_operands = 3 : i64, tpu.core_type = #tpu.core_type<tc>, window_params = [{transform_indices = @transform_0, window_bounds = array<i64: 128, 1>}, {transform_indices = @transform_1, window_bounds = array<i64: 1, 128>}, {transform_indices = @transform_2, window_bounds = array<i64: 8, 128>}, {transform_indices = @transform_3, window_bounds = array<i64: 128, 128>}, {transform_indices = @transform_4, window_bounds = array<i64: 128, 128>}, {transform_indices = @transform_5, window_bounds = array<i64: 5, 8>}, {transform_indices = @transform_6, window_bounds = array<i64: 1, 4>}, {pipeline_mode = #tpu.pipeline_mode<synchronous>, transform_indices = @transform_7, window_bounds = array<i64: 8, 2>}, {transform_indices = @transform_8, window_bounds = array<i64: 8, 128>}]} {
    %c0_i32 = arith.constant 0 : i32
    %0 = arith.cmpi eq, %arg1, %c0_i32 : i32
    %1 = arith.extui %0 : i1 to i32
    %c0_i32_0 = arith.constant 0 : i32
    %2 = arith.cmpi ne, %1, %c0_i32_0 : i32
    scf.if %2 {
      %cst_108 = arith.constant -3.000000e+38 : f32
      %220 = vector.broadcast %cst_108 : f32 to vector<1x128xf32>
      %c0_109 = arith.constant 0 : index
      %c0_110 = arith.constant 0 : index
      %221 = vector.load %arg11[%c0_109, %c0_110] : memref<1x128xf32, #tpu.memory_space<vmem>>, vector<1x128xf32>
      tpu.vector_store %arg11[%c0_109, %c0_110], %220 {strides = array<i32>} : memref<1x128xf32, #tpu.memory_space<vmem>>, vector<1x128xf32>,
      %cst_111 = arith.constant 0.000000e+00 : f32
      %222 = vector.broadcast %cst_111 : f32 to vector<1x128xf32>
      %c0_112 = arith.constant 0 : index
      %c0_113 = arith.constant 0 : index
      %223 = vector.load %arg12[%c0_112, %c0_113] : memref<1x128xf32, #tpu.memory_space<vmem>>, vector<1x128xf32>
      tpu.vector_store %arg12[%c0_112, %c0_113], %222 {strides = array<i32>} : memref<1x128xf32, #tpu.memory_space<vmem>>, vector<1x128xf32>,
      %cst_114 = arith.constant 0.000000e+00 : f32
      %224 = vector.broadcast %cst_114 : f32 to vector<1x128xf32>
      %c0_115 = arith.constant 0 : index
      %c0_116 = arith.constant 0 : index
      %225 = vector.load %arg13[%c0_115, %c0_116] : memref<1x128xf32, #tpu.memory_space<vmem>>, vector<1x128xf32>
      tpu.vector_store %arg13[%c0_115, %c0_116], %224 {strides = array<i32>} : memref<1x128xf32, #tpu.memory_space<vmem>>, vector<1x128xf32>,
    } else {
    }
    %c0 = arith.constant 0 : index
    %c0_1 = arith.constant 0 : index
    %3 = vector.load %arg2[%c0, %c0_1] : memref<128x1xf32, #tpu.memory_space<vmem>>, vector<128x1xf32>
    %c0_2 = arith.constant 0 : index
    %c0_3 = arith.constant 0 : index
    %4 = vector.load %arg3[%c0_2, %c0_3] : memref<1x128xf32, #tpu.memory_space<vmem>>, vector<1x128xf32>
    %c0_4 = arith.constant 0 : index
    %c0_5 = arith.constant 0 : index
    %5 = vector.load %arg5[%c0_4, %c0_5] : memref<128x128xbf16, #tpu.memory_space<vmem>>, vector<128x128xbf16>
    %6 = arith.extf %5 : vector<128x128xbf16> to vector<128x128xf32>
    %c0_6 = arith.constant 0 : index
    %c1 = arith.constant 1 : index
    %7 = memref.load %arg8[%c0_6, %c1] : memref<1x4xf32, #tpu.memory_space<smem>>
    %8 = vector.broadcast %7 : f32 to vector<128x1xf32>
    %9 = arith.mulf %3, %8 : vector<128x1xf32>
    %c0_7 = arith.constant 0 : index
    %c2 = arith.constant 2 : index
    %10 = memref.load %arg8[%c0_7, %c2] : memref<1x4xf32, #tpu.memory_space<smem>>
    %11 = vector.broadcast %10 : f32 to vector<1x128xf32>
    %12 = arith.mulf %4, %11 : vector<1x128xf32>
    %c0_8 = arith.constant 0 : index
    %c3 = arith.constant 3 : index
    %13 = memref.load %arg8[%c0_8, %c3] : memref<1x4xf32, #tpu.memory_space<smem>>
    %14 = vector.broadcast %13 : f32 to vector<1x128xf32>
    %15 = arith.addf %12, %14 : vector<1x128xf32>
    %c0_9 = arith.constant 0 : index
    %c0_10 = arith.constant 0 : index
    %16 = vector.load %arg6[%c0_9, %c0_10] : memref<128x128xbf16, #tpu.memory_space<vmem>>, vector<128x128xbf16>
    %17 = arith.extf %16 : vector<128x128xbf16> to vector<128x128xf32>
    %c0_11 = arith.constant 0 : index
    %c0_12 = arith.constant 0 : index
    %18 = memref.load %arg8[%c0_11, %c0_12] : memref<1x4xf32, #tpu.memory_space<smem>>
    %19 = vector.broadcast %18 : f32 to vector<128x128xf32>
    %20 = arith.mulf %6, %19 : vector<128x128xf32>
    %21 = vector.broadcast %9 : vector<128x1xf32> to vector<128x128xf32>
    %22 = arith.addf %20, %21 : vector<128x128xf32>
    %23 = arith.addf %17, %22 : vector<128x128xf32>
    %24 = vector.broadcast %15 : vector<1x128xf32> to vector<128x128xf32>
    %25 = arith.addf %23, %24 : vector<128x128xf32>
    %c0_13 = arith.constant 0 : index
    %c0_14 = arith.constant 0 : index
    %26 = memref.load %arg7[%c0_13, %c0_14] : memref<5x8xf32, #tpu.memory_space<smem>>
    %c1_15 = arith.constant 1 : index
    %c0_16 = arith.constant 0 : index
    %27 = memref.load %arg7[%c1_15, %c0_16] : memref<5x8xf32, #tpu.memory_space<smem>>
    %c2_17 = arith.constant 2 : index
    %c0_18 = arith.constant 0 : index
    %28 = memref.load %arg7[%c2_17, %c0_18] : memref<5x8xf32, #tpu.memory_space<smem>>
    %c3_19 = arith.constant 3 : index
    %c0_20 = arith.constant 0 : index
    %29 = memref.load %arg7[%c3_19, %c0_20] : memref<5x8xf32, #tpu.memory_space<smem>>
    %c4 = arith.constant 4 : index
    %c0_21 = arith.constant 0 : index
    %30 = memref.load %arg7[%c4, %c0_21] : memref<5x8xf32, #tpu.memory_space<smem>>
    %31 = vector.broadcast %26 : f32 to vector<128x128xf32>
    %32 = arith.mulf %6, %31 : vector<128x128xf32>
    %33 = vector.broadcast %27 : f32 to vector<128x1xf32>
    %34 = arith.mulf %3, %33 : vector<128x1xf32>
    %35 = vector.broadcast %34 : vector<128x1xf32> to vector<128x128xf32>
    %36 = arith.addf %32, %35 : vector<128x128xf32>
    %37 = vector.broadcast %28 : f32 to vector<1x128xf32>
    %38 = arith.mulf %4, %37 : vector<1x128xf32>
    %39 = vector.broadcast %29 : f32 to vector<1x128xf32>
    %40 = arith.addf %38, %39 : vector<1x128xf32>
    %41 = vector.broadcast %40 : vector<1x128xf32> to vector<128x128xf32>
    %42 = arith.addf %36, %41 : vector<128x128xf32>
    %43 = math.absf %42 : vector<128x128xf32>
    %44 = vector.broadcast %30 : f32 to vector<128x128xf32>
    %45 = arith.mulf %44, %43 : vector<128x128xf32>
    %46 = arith.addf %25, %45 : vector<128x128xf32>
    %c0_22 = arith.constant 0 : index
    %c1_23 = arith.constant 1 : index
    %47 = memref.load %arg7[%c0_22, %c1_23] : memref<5x8xf32, #tpu.memory_space<smem>>
    %c1_24 = arith.constant 1 : index
    %c1_25 = arith.constant 1 : index
    %48 = memref.load %arg7[%c1_24, %c1_25] : memref<5x8xf32, #tpu.memory_space<smem>>
    %c2_26 = arith.constant 2 : index
    %c1_27 = arith.constant 1 : index
    %49 = memref.load %arg7[%c2_26, %c1_27] : memref<5x8xf32, #tpu.memory_space<smem>>
    %c3_28 = arith.constant 3 : index
    %c1_29 = arith.constant 1 : index
    %50 = memref.load %arg7[%c3_28, %c1_29] : memref<5x8xf32, #tpu.memory_space<smem>>
    %c4_30 = arith.constant 4 : index
    %c1_31 = arith.constant 1 : index
    %51 = memref.load %arg7[%c4_30, %c1_31] : memref<5x8xf32, #tpu.memory_space<smem>>
    %52 = vector.broadcast %47 : f32 to vector<128x128xf32>
    %53 = arith.mulf %6, %52 : vector<128x128xf32>
    %54 = vector.broadcast %48 : f32 to vector<128x1xf32>
    %55 = arith.mulf %3, %54 : vector<128x1xf32>
    %56 = vector.broadcast %55 : vector<128x1xf32> to vector<128x128xf32>
    %57 = arith.addf %53, %56 : vector<128x128xf32>
    %58 = vector.broadcast %49 : f32 to vector<1x128xf32>
    %59 = arith.mulf %4, %58 : vector<1x128xf32>
    %60 = vector.broadcast %50 : f32 to vector<1x128xf32>
    %61 = arith.addf %59, %60 : vector<1x128xf32>
    %62 = vector.broadcast %61 : vector<1x128xf32> to vector<128x128xf32>
    %63 = arith.addf %57, %62 : vector<128x128xf32>
    %64 = math.absf %63 : vector<128x128xf32>
    %65 = vector.broadcast %51 : f32 to vector<128x128xf32>
    %66 = arith.mulf %65, %64 : vector<128x128xf32>
    %67 = arith.addf %46, %66 : vector<128x128xf32>
    %c0_32 = arith.constant 0 : index
    %c2_33 = arith.constant 2 : index
    %68 = memref.load %arg7[%c0_32, %c2_33] : memref<5x8xf32, #tpu.memory_space<smem>>
    %c1_34 = arith.constant 1 : index
    %c2_35 = arith.constant 2 : index
    %69 = memref.load %arg7[%c1_34, %c2_35] : memref<5x8xf32, #tpu.memory_space<smem>>
    %c2_36 = arith.constant 2 : index
    %c2_37 = arith.constant 2 : index
    %70 = memref.load %arg7[%c2_36, %c2_37] : memref<5x8xf32, #tpu.memory_space<smem>>
    %c3_38 = arith.constant 3 : index
    %c2_39 = arith.constant 2 : index
    %71 = memref.load %arg7[%c3_38, %c2_39] : memref<5x8xf32, #tpu.memory_space<smem>>
    %c4_40 = arith.constant 4 : index
    %c2_41 = arith.constant 2 : index
    %72 = memref.load %arg7[%c4_40, %c2_41] : memref<5x8xf32, #tpu.memory_space<smem>>
    %73 = vector.broadcast %68 : f32 to vector<128x128xf32>
    %74 = arith.mulf %6, %73 : vector<128x128xf32>
    %75 = vector.broadcast %69 : f32 to vector<128x1xf32>
    %76 = arith.mulf %3, %75 : vector<128x1xf32>
    %77 = vector.broadcast %76 : vector<128x1xf32> to vector<128x128xf32>
    %78 = arith.addf %74, %77 : vector<128x128xf32>
    %79 = vector.broadcast %70 : f32 to vector<1x128xf32>
    %80 = arith.mulf %4, %79 : vector<1x128xf32>
    %81 = vector.broadcast %71 : f32 to vector<1x128xf32>
    %82 = arith.addf %80, %81 : vector<1x128xf32>
    %83 = vector.broadcast %82 : vector<1x128xf32> to vector<128x128xf32>
    %84 = arith.addf %78, %83 : vector<128x128xf32>
    %85 = math.absf %84 : vector<128x128xf32>
    %86 = vector.broadcast %72 : f32 to vector<128x128xf32>
    %87 = arith.mulf %86, %85 : vector<128x128xf32>
    %88 = arith.addf %67, %87 : vector<128x128xf32>
    %c0_42 = arith.constant 0 : index
    %c3_43 = arith.constant 3 : index
    %89 = memref.load %arg7[%c0_42, %c3_43] : memref<5x8xf32, #tpu.memory_space<smem>>
    %c1_44 = arith.constant 1 : index
    %c3_45 = arith.constant 3 : index
    %90 = memref.load %arg7[%c1_44, %c3_45] : memref<5x8xf32, #tpu.memory_space<smem>>
    %c2_46 = arith.constant 2 : index
    %c3_47 = arith.constant 3 : index
    %91 = memref.load %arg7[%c2_46, %c3_47] : memref<5x8xf32, #tpu.memory_space<smem>>
    %c3_48 = arith.constant 3 : index
    %c3_49 = arith.constant 3 : index
    %92 = memref.load %arg7[%c3_48, %c3_49] : memref<5x8xf32, #tpu.memory_space<smem>>
    %c4_50 = arith.constant 4 : index
    %c3_51 = arith.constant 3 : index
    %93 = memref.load %arg7[%c4_50, %c3_51] : memref<5x8xf32, #tpu.memory_space<smem>>
    %94 = vector.broadcast %89 : f32 to vector<128x128xf32>
    %95 = arith.mulf %6, %94 : vector<128x128xf32>
    %96 = vector.broadcast %90 : f32 to vector<128x1xf32>
    %97 = arith.mulf %3, %96 : vector<128x1xf32>
    %98 = vector.broadcast %97 : vector<128x1xf32> to vector<128x128xf32>
    %99 = arith.addf %95, %98 : vector<128x128xf32>
    %100 = vector.broadcast %91 : f32 to vector<1x128xf32>
    %101 = arith.mulf %4, %100 : vector<1x128xf32>
    %102 = vector.broadcast %92 : f32 to vector<1x128xf32>
    %103 = arith.addf %101, %102 : vector<1x128xf32>
    %104 = vector.broadcast %103 : vector<1x128xf32> to vector<128x128xf32>
    %105 = arith.addf %99, %104 : vector<128x128xf32>
    %106 = math.absf %105 : vector<128x128xf32>
    %107 = vector.broadcast %93 : f32 to vector<128x128xf32>
    %108 = arith.mulf %107, %106 : vector<128x128xf32>
    %109 = arith.addf %88, %108 : vector<128x128xf32>
    %c0_52 = arith.constant 0 : index
    %c4_53 = arith.constant 4 : index
    %110 = memref.load %arg7[%c0_52, %c4_53] : memref<5x8xf32, #tpu.memory_space<smem>>
    %c1_54 = arith.constant 1 : index
    %c4_55 = arith.constant 4 : index
    %111 = memref.load %arg7[%c1_54, %c4_55] : memref<5x8xf32, #tpu.memory_space<smem>>
    %c2_56 = arith.constant 2 : index
    %c4_57 = arith.constant 4 : index
    %112 = memref.load %arg7[%c2_56, %c4_57] : memref<5x8xf32, #tpu.memory_space<smem>>
    %c3_58 = arith.constant 3 : index
    %c4_59 = arith.constant 4 : index
    %113 = memref.load %arg7[%c3_58, %c4_59] : memref<5x8xf32, #tpu.memory_space<smem>>
    %c4_60 = arith.constant 4 : index
    %c4_61 = arith.constant 4 : index
    %114 = memref.load %arg7[%c4_60, %c4_61] : memref<5x8xf32, #tpu.memory_space<smem>>
    %115 = vector.broadcast %110 : f32 to vector<128x128xf32>
    %116 = arith.mulf %6, %115 : vector<128x128xf32>
    %117 = vector.broadcast %111 : f32 to vector<128x1xf32>
    %118 = arith.mulf %3, %117 : vector<128x1xf32>
    %119 = vector.broadcast %118 : vector<128x1xf32> to vector<128x128xf32>
    %120 = arith.addf %116, %119 : vector<128x128xf32>
    %121 = vector.broadcast %112 : f32 to vector<1x128xf32>
    %122 = arith.mulf %4, %121 : vector<1x128xf32>
    %123 = vector.broadcast %113 : f32 to vector<1x128xf32>
    %124 = arith.addf %122, %123 : vector<1x128xf32>
    %125 = vector.broadcast %124 : vector<1x128xf32> to vector<128x128xf32>
    %126 = arith.addf %120, %125 : vector<128x128xf32>
    %127 = math.absf %126 : vector<128x128xf32>
    %128 = vector.broadcast %114 : f32 to vector<128x128xf32>
    %129 = arith.mulf %128, %127 : vector<128x128xf32>
    %130 = arith.addf %109, %129 : vector<128x128xf32>
    %c0_62 = arith.constant 0 : index
    %c5 = arith.constant 5 : index
    %131 = memref.load %arg7[%c0_62, %c5] : memref<5x8xf32, #tpu.memory_space<smem>>
    %c1_63 = arith.constant 1 : index
    %c5_64 = arith.constant 5 : index
    %132 = memref.load %arg7[%c1_63, %c5_64] : memref<5x8xf32, #tpu.memory_space<smem>>
    %c2_65 = arith.constant 2 : index
    %c5_66 = arith.constant 5 : index
    %133 = memref.load %arg7[%c2_65, %c5_66] : memref<5x8xf32, #tpu.memory_space<smem>>
    %c3_67 = arith.constant 3 : index
    %c5_68 = arith.constant 5 : index
    %134 = memref.load %arg7[%c3_67, %c5_68] : memref<5x8xf32, #tpu.memory_space<smem>>
    %c4_69 = arith.constant 4 : index
    %c5_70 = arith.constant 5 : index
    %135 = memref.load %arg7[%c4_69, %c5_70] : memref<5x8xf32, #tpu.memory_space<smem>>
    %136 = vector.broadcast %131 : f32 to vector<128x128xf32>
    %137 = arith.mulf %6, %136 : vector<128x128xf32>
    %138 = vector.broadcast %132 : f32 to vector<128x1xf32>
    %139 = arith.mulf %3, %138 : vector<128x1xf32>
    %140 = vector.broadcast %139 : vector<128x1xf32> to vector<128x128xf32>
    %141 = arith.addf %137, %140 : vector<128x128xf32>
    %142 = vector.broadcast %133 : f32 to vector<1x128xf32>
    %143 = arith.mulf %4, %142 : vector<1x128xf32>
    %144 = vector.broadcast %134 : f32 to vector<1x128xf32>
    %145 = arith.addf %143, %144 : vector<1x128xf32>
    %146 = vector.broadcast %145 : vector<1x128xf32> to vector<128x128xf32>
    %147 = arith.addf %141, %146 : vector<128x128xf32>
    %148 = math.absf %147 : vector<128x128xf32>
    %149 = vector.broadcast %135 : f32 to vector<128x128xf32>
    %150 = arith.mulf %149, %148 : vector<128x128xf32>
    %151 = arith.addf %130, %150 : vector<128x128xf32>
    %c0_71 = arith.constant 0 : index
    %c6 = arith.constant 6 : index
    %152 = memref.load %arg7[%c0_71, %c6] : memref<5x8xf32, #tpu.memory_space<smem>>
    %c1_72 = arith.constant 1 : index
    %c6_73 = arith.constant 6 : index
    %153 = memref.load %arg7[%c1_72, %c6_73] : memref<5x8xf32, #tpu.memory_space<smem>>
    %c2_74 = arith.constant 2 : index
    %c6_75 = arith.constant 6 : index
    %154 = memref.load %arg7[%c2_74, %c6_75] : memref<5x8xf32, #tpu.memory_space<smem>>
    %c3_76 = arith.constant 3 : index
    %c6_77 = arith.constant 6 : index
    %155 = memref.load %arg7[%c3_76, %c6_77] : memref<5x8xf32, #tpu.memory_space<smem>>
    %c4_78 = arith.constant 4 : index
    %c6_79 = arith.constant 6 : index
    %156 = memref.load %arg7[%c4_78, %c6_79] : memref<5x8xf32, #tpu.memory_space<smem>>
    %157 = vector.broadcast %152 : f32 to vector<128x128xf32>
    %158 = arith.mulf %6, %157 : vector<128x128xf32>
    %159 = vector.broadcast %153 : f32 to vector<128x1xf32>
    %160 = arith.mulf %3, %159 : vector<128x1xf32>
    %161 = vector.broadcast %160 : vector<128x1xf32> to vector<128x128xf32>
    %162 = arith.addf %158, %161 : vector<128x128xf32>
    %163 = vector.broadcast %154 : f32 to vector<1x128xf32>
    %164 = arith.mulf %4, %163 : vector<1x128xf32>
    %165 = vector.broadcast %155 : f32 to vector<1x128xf32>
    %166 = arith.addf %164, %165 : vector<1x128xf32>
    %167 = vector.broadcast %166 : vector<1x128xf32> to vector<128x128xf32>
    %168 = arith.addf %162, %167 : vector<128x128xf32>
    %169 = math.absf %168 : vector<128x128xf32>
    %170 = vector.broadcast %156 : f32 to vector<128x128xf32>
    %171 = arith.mulf %170, %169 : vector<128x128xf32>
    %172 = arith.addf %151, %171 : vector<128x128xf32>
    %c0_80 = arith.constant 0 : index
    %c7 = arith.constant 7 : index
    %173 = memref.load %arg7[%c0_80, %c7] : memref<5x8xf32, #tpu.memory_space<smem>>
    %c1_81 = arith.constant 1 : index
    %c7_82 = arith.constant 7 : index
    %174 = memref.load %arg7[%c1_81, %c7_82] : memref<5x8xf32, #tpu.memory_space<smem>>
    %c2_83 = arith.constant 2 : index
    %c7_84 = arith.constant 7 : index
    %175 = memref.load %arg7[%c2_83, %c7_84] : memref<5x8xf32, #tpu.memory_space<smem>>
    %c3_85 = arith.constant 3 : index
    %c7_86 = arith.constant 7 : index
    %176 = memref.load %arg7[%c3_85, %c7_86] : memref<5x8xf32, #tpu.memory_space<smem>>
    %c4_87 = arith.constant 4 : index
    %c7_88 = arith.constant 7 : index
    %177 = memref.load %arg7[%c4_87, %c7_88] : memref<5x8xf32, #tpu.memory_space<smem>>
    %178 = vector.broadcast %173 : f32 to vector<128x128xf32>
    %179 = arith.mulf %6, %178 : vector<128x128xf32>
    %180 = vector.broadcast %174 : f32 to vector<128x1xf32>
    %181 = arith.mulf %3, %180 : vector<128x1xf32>
    %182 = vector.broadcast %181 : vector<128x1xf32> to vector<128x128xf32>
    %183 = arith.addf %179, %182 : vector<128x128xf32>
    %184 = vector.broadcast %175 : f32 to vector<1x128xf32>
    %185 = arith.mulf %4, %184 : vector<1x128xf32>
    %186 = vector.broadcast %176 : f32 to vector<1x128xf32>
    %187 = arith.addf %185, %186 : vector<1x128xf32>
    %188 = vector.broadcast %187 : vector<1x128xf32> to vector<128x128xf32>
    %189 = arith.addf %183, %188 : vector<128x128xf32>
    %190 = math.absf %189 : vector<128x128xf32>
    %191 = vector.broadcast %177 : f32 to vector<128x128xf32>
    %192 = arith.mulf %191, %190 : vector<128x128xf32>
    %193 = arith.addf %172, %192 : vector<128x128xf32>
    %cst = arith.constant dense<0xFF800000> : vector<128xf32>
    %194 = vector.multi_reduction <maximumf>, %193, %cst [0] : vector<128x128xf32> to vector<128xf32>
    %195 = vector.shape_cast %194 : vector<128xf32> to vector<1x128xf32>
    %c0_89 = arith.constant 0 : index
    %c0_90 = arith.constant 0 : index
    %196 = vector.load %arg11[%c0_89, %c0_90] : memref<1x128xf32, #tpu.memory_space<vmem>>, vector<1x128xf32>
    %197 = arith.maximumf %196, %195 : vector<1x128xf32>
    %c0_91 = arith.constant 0 : index
    %c0_92 = arith.constant 0 : index
    %198 = vector.load %arg11[%c0_91, %c0_92] : memref<1x128xf32, #tpu.memory_space<vmem>>, vector<1x128xf32>
    %199 = arith.subf %198, %197 : vector<1x128xf32>
    %200 = math.exp %199 : vector<1x128xf32>
    %201 = vector.broadcast %197 : vector<1x128xf32> to vector<128x128xf32>
    %202 = arith.subf %193, %201 : vector<128x128xf32>
    %203 = math.exp %202 : vector<128x128xf32>
    %c0_93 = arith.constant 0 : index
    %c0_94 = arith.constant 0 : index
    %204 = vector.load %arg4[%c0_93, %c0_94] : memref<8x128xf32, #tpu.memory_space<vmem>>, vector<8x128xf32>
    %cst_95 = arith.constant dense<0.000000e+00> : vector<8x128xf32>
    %205 = tpu.matmul %204, %203, %cst_95 {dimension_numbers = #tpu.dot_dimension_numbers<[1], [0], [0], [1], [0, 0, 1, 1], [], []>} : vector<8x128xf32>, vector<128x128xf32>, vector<8x128xf32> -> vector<8x128xf32>
    %c0_96 = arith.constant 0 : index
    %c0_97 = arith.constant 0 : index
    %206 = vector.load %arg12[%c0_96, %c0_97] : memref<1x128xf32, #tpu.memory_space<vmem>>, vector<1x128xf32>
    %207 = arith.mulf %206, %200 : vector<1x128xf32>
    %208 = vector.extract_strided_slice %205 {offsets = [0, 0], sizes = [1, 128], strides = [1, 1]} : vector<8x128xf32> to vector<1x128xf32>
    %209 = arith.addf %207, %208 : vector<1x128xf32>
    %c0_98 = arith.constant 0 : index
    %c0_99 = arith.constant 0 : index
    %210 = vector.load %arg12[%c0_98, %c0_99] : memref<1x128xf32, #tpu.memory_space<vmem>>, vector<1x128xf32>
    tpu.vector_store %arg12[%c0_98, %c0_99], %209 {strides = array<i32>} : memref<1x128xf32, #tpu.memory_space<vmem>>, vector<1x128xf32>,
    %c0_100 = arith.constant 0 : index
    %c0_101 = arith.constant 0 : index
    %211 = vector.load %arg13[%c0_100, %c0_101] : memref<1x128xf32, #tpu.memory_space<vmem>>, vector<1x128xf32>
    %212 = arith.mulf %211, %200 : vector<1x128xf32>
    %213 = vector.extract_strided_slice %205 {offsets = [1, 0], sizes = [1, 128], strides = [1, 1]} : vector<8x128xf32> to vector<1x128xf32>
    %214 = arith.addf %212, %213 : vector<1x128xf32>
    %c0_102 = arith.constant 0 : index
    %c0_103 = arith.constant 0 : index
    %215 = vector.load %arg13[%c0_102, %c0_103] : memref<1x128xf32, #tpu.memory_space<vmem>>, vector<1x128xf32>
    tpu.vector_store %arg13[%c0_102, %c0_103], %214 {strides = array<i32>} : memref<1x128xf32, #tpu.memory_space<vmem>>, vector<1x128xf32>,
    %c0_104 = arith.constant 0 : index
    %c0_105 = arith.constant 0 : index
    %216 = vector.load %arg11[%c0_104, %c0_105] : memref<1x128xf32, #tpu.memory_space<vmem>>, vector<1x128xf32>
    tpu.vector_store %arg11[%c0_104, %c0_105], %197 {strides = array<i32>} : memref<1x128xf32, #tpu.memory_space<vmem>>, vector<1x128xf32>,
    %c0_i32_106 = arith.constant 0 : i32
    %217 = arith.cmpi eq, %arg1, %c0_i32_106 : i32
    %218 = arith.extui %217 : i1 to i32
    %c0_i32_107 = arith.constant 0 : i32
    %219 = arith.cmpi ne, %218, %c0_i32_107 : i32
    scf.if %219 {
      %c0_108 = arith.constant 0 : index
      %c0_109 = arith.constant 0 : index
      %220 = vector.load %arg13[%c0_108, %c0_109] : memref<1x128xf32, #tpu.memory_space<vmem>>, vector<1x128xf32>
      %c0_110 = arith.constant 0 : index
      %c0_111 = arith.constant 0 : index
      %221 = vector.load %arg12[%c0_110, %c0_111] : memref<1x128xf32, #tpu.memory_space<vmem>>, vector<1x128xf32>
      %222 = tpu.reciprocal %221 : vector<1x128xf32> -> vector<1x128xf32>
      %223 = arith.mulf %220, %222 : vector<1x128xf32>
      %c0_112 = arith.constant 0 : index
      %c0_113 = arith.constant 0 : index
      %224 = vector.load %arg9[%c0_112, %c0_113] : memref<8x2xf32, #tpu.memory_space<vmem>>, vector<8x1xf32>
      %225 = vector.broadcast %224 : vector<8x1xf32> to vector<8x128xf32>
      %226 = vector.broadcast %223 : vector<1x128xf32> to vector<8x128xf32>
      %227 = arith.mulf %225, %226 : vector<8x128xf32>
      %c0_114 = arith.constant 0 : index
      %c1_115 = arith.constant 1 : index
      %228 = vector.load %arg9[%c0_114, %c1_115] : memref<8x2xf32, #tpu.memory_space<vmem>>, vector<8x1xf32>
      %229 = vector.broadcast %228 : vector<8x1xf32> to vector<8x128xf32>
      %230 = arith.addf %227, %229 : vector<8x128xf32>
      %c0_116 = arith.constant 0 : index
      %c0_117 = arith.constant 0 : index
      %231 = vector.load %arg10[%c0_116, %c0_117] : memref<8x128xf32, #tpu.memory_space<vmem>>, vector<8x128xf32>
      tpu.vector_store %arg10[%c0_116, %c0_117], %230 {strides = array<i32>} : memref<8x128xf32, #tpu.memory_space<vmem>>, vector<8x128xf32>,
    } else {
    }
    return
  }
  func.func @transform_0(%arg0: i32, %arg1: i32) -> (i32, i32) {
    %c0_i32 = arith.constant 0 : i32
    %c0_i32_0 = arith.constant 0 : i32
    return %arg1, %c0_i32 : i32, i32
  }
  func.func @transform_1(%arg0: i32, %arg1: i32) -> (i32, i32) {
    %c0_i32 = arith.constant 0 : i32
    %c0_i32_0 = arith.constant 0 : i32
    return %c0_i32, %arg0 : i32, i32
  }
  func.func @transform_2(%arg0: i32, %arg1: i32) -> (i32, i32) {
    %c0_i32 = arith.constant 0 : i32
    %c0_i32_0 = arith.constant 0 : i32
    return %c0_i32, %arg1 : i32, i32
  }
  func.func @transform_3(%arg0: i32, %arg1: i32) -> (i32, i32) {
    %c0_i32 = arith.constant 0 : i32
    return %arg1, %arg0 : i32, i32
  }
  func.func @transform_4(%arg0: i32, %arg1: i32) -> (i32, i32) {
    %c0_i32 = arith.constant 0 : i32
    return %arg1, %arg0 : i32, i32
  }
  func.func @transform_5(%arg0: i32, %arg1: i32) -> (i32, i32) {
    %c0_i32 = arith.constant 0 : i32
    %c0_i32_0 = arith.constant 0 : i32
    %c0_i32_1 = arith.constant 0 : i32
    return %c0_i32, %c0_i32_0 : i32, i32
  }
  func.func @transform_6(%arg0: i32, %arg1: i32) -> (i32, i32) {
    %c0_i32 = arith.constant 0 : i32
    %c0_i32_0 = arith.constant 0 : i32
    %c0_i32_1 = arith.constant 0 : i32
    return %c0_i32, %c0_i32_0 : i32, i32
  }
  func.func @transform_7(%arg0: i32, %arg1: i32) -> (i32, i32) {
    %c0_i32 = arith.constant 0 : i32
    %c0_i32_0 = arith.constant 0 : i32
    %c0_i32_1 = arith.constant 0 : i32
    return %c0_i32, %c0_i32_0 : i32, i32
  }
  func.func @transform_8(%arg0: i32, %arg1: i32) -> (i32, i32) {
    %c0_i32 = arith.constant 0 : i32
    %c0_i32_0 = arith.constant 0 : i32
    return %c0_i32, %arg0 : i32, i32
  }
}

</mosaic_0001>

<bundles_post_ra>
// kernel: tpu_custom_call.1
= control target key start
LH: loop header
LB: loop body
LE: loop exit
PB: predicated region body
PF: predicated region fallthrough
CT: control target
= control target key end

     0   :  { %13 = vsyncpa [#allocation6], 0  ;;  %s4949_s0 = inlined_call_operand.vmem [shape: f32[128,1], index: 0, kind: input, shape index: {}]   ;;  %s4950_s1 = inlined_call_operand.hbm [shape: f32[1,128], index: 1, kind: input, shape index: {}]   ;;  %s4951_s2 = inlined_call_operand.vmem [shape: f32[8,128], index: 2, kind: input, shape index: {}]   ;;  %s4952_s3 = inlined_call_operand.vmem [shape: bf16[128,128], index: 3, kind: input, shape index: {}]   ;;  %s4953_s4 = inlined_call_operand.vmem [shape: bf16[128,128], index: 4, kind: input, shape index: {}]   ;;  %s4954_s5 = inlined_call_operand.vmem [shape: f32[5,8], index: 5, kind: input, shape index: {}]   ;;  %s4955_s6 = inlined_call_operand.vmem [shape: f32[1,4], index: 6, kind: input, shape index: {}]   ;;  %s4956_s7 = inlined_call_operand.vmem [shape: f32[8,2], index: 7, kind: input, shape index: {}]   ;;  %s4957_s8 = inlined_call_operand.hbm [shape: f32[8,128], index: 8, kind: output, shape index: {}]  }
   0x1   :  { %14 = vsyncpa [#allocation8], 0 }
   0x2   :  { %15 = vsyncpa [#allocation11], 0 }
   0x3   :  { %16 = vsyncpa [#allocation7], 0  ;;  %s41_s29 = sshll.u32 %s4954_s5, 4  ;;  %s2533_s30 = smov [#allocation5]   ;;  %s42_s29 = int_to_ptr.vmem [resolvable:$true] %s41_s29 }
   0x4   :  { %s25_s9 = sshll.u32 %s2533_s30, 4  ;;  %s26_s9 = int_to_ptr.vmem [resolvable:$true] %s25_s9 }
   0x5   :  { %s2469_s10 = scalar_lea.vmem %s26_s9, 16  ;;  %s2473_s11 = scalar_lea.vmem %s26_s9, 32 }
   0x6   :  { %p2470_p0 = scmp.ne.s32.totalorder %s26_s9, %s2469_s10  ;;  %p2474_p1 = scmp.lt.s32.totalorder %s26_s9, %s26_s9 }
   0x7   :  { %p2475_p2 = scmp.lt.s32.totalorder %s2473_s11, %s2469_s10 }
   0x9   :  { %p2476_p3 = por %p2475_p2, %p2474_p1 }
   0xb   :  { %p2477_p4 = pnand %p2476_p3, %p2470_p0 }
   0xd   :  { %2480 = shalt.err (!%p2477_p4)
}
   0xe   :  { %28 = dma.hbm_to_vmem [thread:$0]  %s4950_s1, 16, %s26_s9, [#allocation6]  }
   0xf   :  { %s2481_s14 = scalar_lea.vmem %s42_s29, 128  ;;  %p2486_p6 = scmp.lt.s32.totalorder %s42_s29, %s42_s29 }
  0x10   :  { %p2482_p5 = scmp.ne.s32.totalorder %s42_s29, %s2481_s14  ;;  %p2487_p7 = scmp.lt.s32.totalorder %s2481_s14, %s2481_s14 }
  0x12   :  { %p2488_p8 = por %p2487_p7, %p2486_p6 }
  0x14   :  { %p2489_p9 = pnand %p2488_p8, %p2482_p5 }
  0x16   :  { %2492 = shalt.err (!%p2489_p9)
}
  0x17   :  { %s2534_s5 = smov [#allocation9]   ;;  %s51_s17 = sshll.u32 %s4955_s6, 4  ;;  %s52_s17 = int_to_ptr.vmem [resolvable:$true] %s51_s17 }
  0x18   :  { %44 = dma.vmem_to_smem %s42_s29, 128, %s2534_s5, [#allocation8]  }
  0x19   :  { %s2493_s18 = scalar_lea.vmem %s52_s17, 16  ;;  %p2498_p11 = scmp.lt.s32.totalorder %s52_s17, %s52_s17 }
  0x1a   :  { %p2494_p10 = scmp.ne.s32.totalorder %s52_s17, %s2493_s18  ;;  %p2499_p12 = scmp.lt.s32.totalorder %s2493_s18, %s2493_s18 }
  0x1c   :  { %p2500_p13 = por %p2499_p12, %p2498_p11 }
  0x1e   :  { %p2501_p0 = pnand %p2500_p13, %p2494_p10 }
  0x20   :  { %2504 = shalt.err (!%p2501_p0)
}
  0x21   :  { %s2535_s1 = smov [#allocation10]  }
  0x22   :  { %54 = dma.vmem_to_smem %s52_s17, 16, %s2535_s1, [#allocation11]  }
  0x23   :  { %2525 = dma.done.wait [#allocation6], 16  }
  0x24   :  { %2526 = vsyncadd [#allocation6], 4294967280 }
  0x25   :  { %2527 = dma.done.wait [#allocation8], 128  }
  0x26   :  { %2528 = vsyncadd [#allocation8], 4294967168 }
  0x27   :  { %2529 = dma.done.wait [#allocation11], 16  }
  0x28   :  { %2530 = vsyncadd [#allocation11], 4294967280 }
  0x29   :  { %66 = sfence }
  0x2a   :  { %s2231_s19 = sld [smem:[#allocation10 + $0x1]]  ;;  %v2536_v0 = vmov 0   ;;  %v2600_v1 = vld [vmem:[%s4949_s0 + $0x10] sm:$0xff]  ;;  %v2605_v2 = vld [vmem:[%s4949_s0] sm:$0xff]  ;;  %v2610_v4 = vld [vmem:[%s4949_s0 + $0x18] sm:$0xff]  ;;  %vm2539_vm0 = vmmov 0  }
  0x2b   :  { %2414 = vset.pattern.permute.xlu1 %v2536_v0  ;;  %2413 = vset.pattern.permute.xlu0 %v2536_v0  ;;  %v2615_v5 = vld [vmem:[%s4949_s0 + $0x8] sm:$0xff]  ;;  %v2629_v11 = vld [vmem:[%s4949_s0 + $0x20] sm:$0xff]  ;;  %v2636_v14 = vld [vmem:[%s4949_s0 + $0x38] sm:$0xff]  ;;  %s2234_s22 = sld [smem:[#allocation9 + $0x80]] }
  0x2c   :  { %v2624_v10 = vld [vmem:[%s4949_s0 + $0x28] sm:$0xff]  ;;  %v2641_v15 = vld [vmem:[%s4949_s0 + $0x30] sm:$0xff]  ;;  %v2653_v19 = vld [vmem:[%s4949_s0 + $0x40] sm:$0xff]  ;;  %s2239_s27 = sld [smem:[#allocation9 + $0x81]] }
  0x2d   :  { %v2648_v18 = vld [vmem:[%s4949_s0 + $0x48] sm:$0xff]  ;;  %v2660_v22 = vld [vmem:[%s4949_s0 + $0x58] sm:$0xff]  ;;  %v2665_v23 = vld [vmem:[%s4949_s0 + $0x50] sm:$0xff]  ;;  %s2244_s28 = sld [smem:[#allocation9 + $0x82]] }
  0x2e   :  { %v2672_v26 = vld [vmem:[%s4949_s0 + $0x68] sm:$0xff]  ;;  %v2677_v27 = vld [vmem:[%s4949_s0 + $0x60] sm:$0xff]  ;;  %v2684_v30 = vld [vmem:[%s4949_s0 + $0x78] sm:$0xff]  ;;  %s2249_s29 = sld [smem:[#allocation9 + $0x83]] }
  0x2f   :  { %v2689_v31 = vld [vmem:[%s4949_s0 + $0x70] sm:$0xff]  ;;  %s2232_s30 = sld [smem:[#allocation10 + $0x2]] }
  0x30   :  { %v124_v3 = vstv %s2231_s19  ;;  %s2777_s9 = sld [smem:[#allocation10 + $0x3]] }
  0x31   :  { %v127_v6 = vmul.f32 %v124_v3, %v2600_v1  ;;  %v125_v7 = vmul.f32 %v124_v3, %v2605_v2  ;;  %v128_v8 = vmul.f32 %v124_v3, %v2610_v4  ;;  %v126_v9 = vmul.f32 %v124_v3, %v2615_v5  ;;  %s179_s10 = sld [smem:[#allocation10]] }
  0x32   :  { %v130_v12 = vmul.f32 %v124_v3, %v2624_v10  ;;  %v129_v13 = vmul.f32 %v124_v3, %v2629_v11  ;;  %v132_v16 = vmul.f32 %v124_v3, %v2636_v14  ;;  %v131_v17 = vmul.f32 %v124_v3, %v2641_v15  ;;  %s2806_s5 = sld [smem:[#allocation9 + $0x84]] }
  0x33   :  { %209 = vperm.xlu1 %2414, %v127_v6   ;;  %199 = vperm.xlu0 %2413, %v125_v7   ;;  %v134_v20 = vmul.f32 %v124_v3, %v2648_v18  ;;  %v133_v21 = vmul.f32 %v124_v3, %v2653_v19  ;;  %v136_v24 = vmul.f32 %v124_v3, %v2660_v22  ;;  %v353_v34 = vstv %s2234_s22  ;;  %s2836_s6 = sld [smem:[#allocation9 + $0x100]] }
  0x34   :  { %v135_v25 = vmul.f32 %v124_v3, %v2665_v23  ;;  %v138_v28 = vmul.f32 %v124_v3, %v2672_v26  ;;  %v137_v29 = vmul.f32 %v124_v3, %v2677_v27  ;;  %v140_v32 = vmul.f32 %v124_v3, %v2684_v30  ;;  %s2950_s15 = sld [smem:[#allocation9 + $0x101]] }
  0x35   :  { %v139_v33 = vmul.f32 %v124_v3, %v2689_v31  ;;  %v355_v35 = vmul.f32 %v353_v34, %v2615_v5  ;;  %v354_v36 = vmul.f32 %v353_v34, %v2605_v2  ;;  %v357_v37 = vmul.f32 %v353_v34, %v2610_v4  ;;  %s2973_s18 = sld [smem:[#allocation9 + $0x200]] }
  0x36   :  { %v356_v38 = vmul.f32 %v353_v34, %v2600_v1  ;;  %v359_v39 = vmul.f32 %v353_v34, %v2624_v10  ;;  %v358_v40 = vmul.f32 %v353_v34, %v2629_v11  ;;  %v361_v41 = vmul.f32 %v353_v34, %v2636_v14  ;;  %s3003_s20 = sld [smem:[#allocation9 + $0x181]] }
  0x37   :  { %214 = vperm.xlu1 %2414, %v128_v8   ;;  %204 = vperm.xlu0 %2413, %v126_v9   ;;  %v360_v42 = vmul.f32 %v353_v34, %v2641_v15  ;;  %v363_v43 = vmul.f32 %v353_v34, %v2648_v18  ;;  %v362_v44 = vmul.f32 %v353_v34, %v2653_v19  ;;  %v563_v51 = vstv %s2239_s27  ;;  %s3038_s21 = sld [smem:[#allocation9 + $0x1]] }
  0x38   :  { %v365_v45 = vmul.f32 %v353_v34, %v2660_v22  ;;  %v364_v46 = vmul.f32 %v353_v34, %v2665_v23  ;;  %v367_v47 = vmul.f32 %v353_v34, %v2672_v26  ;;  %v366_v48 = vmul.f32 %v353_v34, %v2677_v27  ;;  %s3080_s22 = sld [smem:[#allocation9 + $0x102]] }
  0x39   :  { %v369_v49 = vmul.f32 %v353_v34, %v2684_v30  ;;  %v368_v50 = vmul.f32 %v353_v34, %v2689_v31  ;;  %v565_v52 = vmul.f32 %v563_v51, %v2615_v5  ;;  %v564_v53 = vmul.f32 %v563_v51, %v2605_v2  ;;  %s3104_s23 = sld [smem:[#allocation9 + $0x201]] }
  0x3a   :  { %v567_v54 = vmul.f32 %v563_v51, %v2610_v4  ;;  %v566_v55 = vmul.f32 %v563_v51, %v2600_v1  ;;  %v569_v56 = vmul.f32 %v563_v51, %v2624_v10  ;;  %v568_v57 = vmul.f32 %v563_v51, %v2629_v11  ;;  %s3132_s24 = sld [smem:[#allocation9 + $0x182]] }
  0x3b   :  { %224 = vperm.xlu1 %2414, %v130_v12   ;;  %219 = vperm.xlu0 %2413, %v129_v13   ;;  %v571_v58 = vmul.f32 %v563_v51, %v2636_v14  ;;  %v570_v59 = vmul.f32 %v563_v51, %v2641_v15  ;;  %v573_v60 = vmul.f32 %v563_v51, %v2648_v18  ;;  %v2725_v8 = vstv %s2244_s28  ;;  %s2889_s28 = sld [smem:[#allocation9 + $0x180]] }
  0x3c   :  { %v572_v61 = vmul.f32 %v563_v51, %v2653_v19  ;;  %v575_v62 = vmul.f32 %v563_v51, %v2660_v22  ;;  %v574_v63 = vmul.f32 %v563_v51, %v2665_v23  ;;  %v577_v0 = vmul.f32 %v563_v51, %v2672_v26  ;;  %s3165_s25 = sld [smem:[#allocation9 + $0x86]] }
  0x3d   :  { %v576_v3 = vmul.f32 %v563_v51, %v2677_v27  ;;  %v579_v6 = vmul.f32 %v563_v51, %v2684_v30  ;;  %v578_v7 = vmul.f32 %v563_v51, %v2689_v31  ;;  %v775_v9 = vmul.f32 %v2725_v8, %v2615_v5  ;;  %v2787_v51 = vld [vmem:[#allocation5] sm:$0x1]  ;;  %s3183_s26 = sld [smem:[#allocation9 + $0x2]] }
  0x3e   :  { %v774_v12 = vmul.f32 %v2725_v8, %v2605_v2  ;;  %v777_v13 = vmul.f32 %v2725_v8, %v2610_v4  ;;  %s3217_s27 = sld [smem:[#allocation9 + $0x103]] }
  0x3f   :  { %234 = vperm.xlu1 %2414, %v132_v16   ;;  %229 = vperm.xlu0 %2413, %v131_v17   ;;  %v776_v16 = vmul.f32 %v2725_v8, %v2600_v1  ;;  %v779_v17 = vmul.f32 %v2725_v8, %v2624_v10  ;;  %s3516_s11 = sld [smem:[#allocation9 + $0x104]] }
  0x40   :  { %s3575_s12 = sld [smem:[#allocation9 + $0x184]] }
  0x41   :  { %s3606_s13 = sld [smem:[#allocation9 + $0x4]] }
  0x43   :  { %244 = vperm.xlu1 %2414, %v134_v20   ;;  %239 = vperm.xlu0 %2413, %v133_v21   ;;  %v778_v20 = vmul.f32 %v2725_v8, %v2629_v11  ;;  %v781_v21 = vmul.f32 %v2725_v8, %v2636_v14 }
  0x47   :  { %254 = vperm.xlu1 %2414, %v136_v24   ;;  %249 = vperm.xlu0 %2413, %v135_v25   ;;  %v780_v24 = vmul.f32 %v2725_v8, %v2641_v15  ;;  %v783_v25 = vmul.f32 %v2725_v8, %v2648_v18 }
  0x4b   :  { %264 = vperm.xlu1 %2414, %v138_v28   ;;  %259 = vperm.xlu0 %2413, %v137_v29   ;;  %v782_v28 = vmul.f32 %v2725_v8, %v2653_v19  ;;  %v785_v29 = vmul.f32 %v2725_v8, %v2660_v22 }
  0x4f   :  { %274 = vperm.xlu1 %2414, %v140_v32   ;;  %269 = vperm.xlu0 %2413, %v139_v33   ;;  %v784_v32 = vmul.f32 %v2725_v8, %v2665_v23  ;;  %v2751_v33 = vstv %s2249_s29  ;;  %s2901_s29 = sld [smem:[#allocation9]] }
  0x50   :  { %v985_v34 = vmul.f32 %v2751_v33, %v2615_v5 }
  0x53   :  { %377 = vperm.xlu1 %2414, %v355_v35   ;;  %372 = vperm.xlu0 %2413, %v354_v36   ;;  %v984_v35 = vmul.f32 %v2751_v33, %v2605_v2  ;;  %v987_v36 = vmul.f32 %v2751_v33, %v2610_v4 }
  0x57   :  { %387 = vperm.xlu1 %2414, %v357_v37   ;;  %382 = vperm.xlu0 %2413, %v356_v38   ;;  %v986_v37 = vmul.f32 %v2751_v33, %v2600_v1 }
  0x5b   :  { %397 = vperm.xlu1 %2414, %v359_v39   ;;  %392 = vperm.xlu0 %2413, %v358_v40   ;;  %v989_v40 = vmul.f32 %v2751_v33, %v2624_v10 }
  0x5f   :  { %407 = vperm.xlu1 %2414, %v361_v41   ;;  %402 = vperm.xlu0 %2413, %v360_v42   ;;  %v988_v41 = vmul.f32 %v2751_v33, %v2629_v11 }
  0x63   :  { %417 = vperm.xlu1 %2414, %v363_v43   ;;  %412 = vperm.xlu0 %2413, %v362_v44   ;;  %v991_v44 = vmul.f32 %v2751_v33, %v2636_v14 }
  0x67   :  { %427 = vperm.xlu1 %2414, %v365_v45   ;;  %422 = vperm.xlu0 %2413, %v364_v46   ;;  %v990_v45 = vmul.f32 %v2751_v33, %v2641_v15 }
  0x6b   :  { %437 = vperm.xlu1 %2414, %v367_v47   ;;  %432 = vperm.xlu0 %2413, %v366_v48   ;;  %v787_v48 = vmul.f32 %v2725_v8, %v2672_v26 }
  0x6f   :  { %447 = vperm.xlu1 %2414, %v369_v49   ;;  %442 = vperm.xlu0 %2413, %v368_v50   ;;  %v310_v49 = vlaneseq  ;;  %v786_v50 = vmul.f32 %v2725_v8, %v2677_v27 }
  0x73   :  { %587 = vperm.xlu1 %2414, %v565_v52   ;;  %582 = vperm.xlu0 %2413, %v564_v53   ;;  %v142_v52 = vstv %s2232_s30  ;;  %v2337_v53 = vld [vmem:[%s4952_s3 + $0x8] sm:$0xff]   ;;  %s3310_s30 = sld [smem:[#allocation9 + $0x3]] }
  0x77   :  { %597 = vperm.xlu1 %2414, %v567_v54   ;;  %592 = vperm.xlu0 %2413, %v566_v55  }
  0x7b   :  { %607 = vperm.xlu1 %2414, %v569_v56   ;;  %602 = vperm.xlu0 %2413, %v568_v57   ;;  %v2274_v56 = vld [vmem:[%s4952_s3] sm:$0xff]   ;;  %v789_v57 = vmul.f32 %v2725_v8, %v2684_v30 }
  0x7f   :  { %617 = vperm.xlu1 %2414, %v571_v58   ;;  %612 = vperm.xlu0 %2413, %v570_v59   ;;  %v143_v58 = vmul.f32 %v142_v52, %v2787_v51  ;;  %v2802_v59 = vshrl.u32 %v310_v49, 7  ;;  %v995_v52 = vmul.f32 %v2751_v33, %v2660_v22 }
  0x81   :  { %5033 = vst [vmem:[#allocation21_spill] sm:$0xff] %v2802_v59 }
  0x83   :  { %627 = vperm.xlu1 %2414, %v573_v60   ;;  %622 = vperm.xlu0 %2413, %v572_v61   ;;  %v788_v60 = vmul.f32 %v2725_v8, %v2689_v31  ;;  %v2808_v61 = vunpack.c.l.bf16 %v2337_v53 }
  0x85   :  { %5034 = vst [vmem:[#allocation22_spill] sm:$0xff] %v2808_v61 }
  0x87   :  { %637 = vperm.xlu1 %2414, %v575_v62   ;;  %632 = vperm.xlu0 %2413, %v574_v63   ;;  %v145_v62 = vstv %s2777_s9  ;;  %v2814_v63 = vld [vmem:[%s4953_s4 + $0x8] sm:$0xff]   ;;  %s3345_s9 = sld [smem:[#allocation9 + $0x87]] }
  0x88   :  { %5035 = vst [vmem:[#allocation23_spill] sm:$0xff] %v2814_v63 }
  0x8b   :  { %647 = vperm.xlu1 %2414, %v577_v0   ;;  %642 = vperm.xlu0 %2413, %v576_v3   ;;  %v2816_v0 = vstv %s179_s10  ;;  %v2818_v3 = vunpack.c.l.bf16 %v2274_v56  ;;  %s3408_s10 = sld [smem:[#allocation9 + $0x203]] }
  0x8d   :  { %5036 = vst [vmem:[#allocation24_spill] sm:$0xff] %v2818_v3 }
  0x8f   :  { %657 = vperm.xlu1 %2414, %v579_v6   ;;  %652 = vperm.xlu0 %2413, %v578_v7   ;;  %v2823_v6 = vld [vmem:[%s4953_s4] sm:$0xff]  }
  0x90   :  { %5037 = vst [vmem:[#allocation25_spill] sm:$0xff] %v2823_v6 }
  0x93   :  { %797 = vperm.xlu1 %2414, %v775_v9   ;;  %792 = vperm.xlu0 %2413, %v774_v12   ;;  %v2829_v9 = vunpack.c.h.bf16 %v2337_v53  ;;  %v2338_v12 = vld [vmem:[%s4952_s3 + $0x10] sm:$0xff]  }
  0x95   :  { %5040 = vst [vmem:[#allocation28_spill] sm:$0xff] %v2829_v9 }
  0x97   :  { %807 = vperm.xlu1 %2414, %v777_v13   ;;  %802 = vperm.xlu0 %2413, %v776_v16   ;;  %v993_v13 = vmul.f32 %v2751_v33, %v2648_v18  ;;  %v146_v16 = vadd.f32 %v145_v62, %v143_v58  ;;  %v2899_v58 = vstv %s2806_s5 }
  0x9b   :  { %817 = vperm.xlu1 %2414, %v779_v17   ;;  %812 = vperm.xlu0 %2413, %v778_v20   ;;  %v2839_v17 = vsub.s32 0, %v2802_v59  ;;  %v2339_v20 = vld [vmem:[%s4952_s3 + $0x18] sm:$0xff]  }
  0x9c   :  { %v2880_v49 = vunpack.c.h.bf16 %v2339_v20 }
  0x9d   :  { %5041 = vst [vmem:[#allocation29_spill] sm:$0xff] %v2839_v17  ;;  %v2892_v53 = vrot.slane %v146_v16, %v2839_v17  ;;  %v2914_v16 = vld [vmem:[%s4953_s4 + $0x20] sm:$0xff]  }
  0x9e   :  { %5048 = vst [vmem:[#allocation36_spill] sm:$0xff] %v2880_v49  ;;  %5053 = vst [vmem:[#allocation41_spill] sm:$0xff] %v2914_v16  ;;  %v2939_v59 = vmul.f32 %v2880_v49, %v2816_v0 }
  0x9f   :  { %827 = vperm.xlu1 %2414, %v781_v21   ;;  %822 = vperm.xlu0 %2413, %v780_v24   ;;  %v992_v21 = vmul.f32 %v2751_v33, %v2653_v19  ;;  %5050 = vst [vmem:[#allocation38_spill] sm:$0xff] %v2892_v53 }
  0xa0   :  { %5059 = vst [vmem:[#allocation47_spill] sm:$0xff] %v2939_v59 }
  0xa3   :  { %837 = vperm.xlu1 %2414, %v783_v25   ;;  %832 = vperm.xlu0 %2413, %v782_v28   ;;  %v2849_v25 = vmul.f32 %v2808_v61, %v2816_v0 }
  0xa7   :  { %847 = vperm.xlu1 %2414, %v785_v29   ;;  %842 = vperm.xlu0 %2413, %v784_v32   ;;  %v2852_v29 = vunpack.c.h.bf16 %v2274_v56  ;;  %v2856_v32 = vmul.f32 %v2818_v3, %v2816_v0  ;;  %v2894_v56 = vunpack.c.l.bf16 %v2339_v20  ;;  %v2341_v20 = vld [vmem:[%s4952_s3 + $0x28] sm:$0xff]  }
  0xa9   :  { %5042 = vst [vmem:[#allocation30_spill] sm:$0xff] %v2852_v29  ;;  %5051 = vst [vmem:[#allocation39_spill] sm:$0xff] %v2894_v56 }
  0xab   :  { %1007 = vperm.xlu1 %2414, %v985_v34   ;;  %1002 = vperm.xlu0 %2413, %v984_v35   ;;  %v2859_v35 = vunpack.c.h.bf16 %v2338_v12  ;;  %v2342_v34 = vld [vmem:[%s4952_s3 + $0x30] sm:$0xff]  }
  0xad   :  { %5043 = vst [vmem:[#allocation31_spill] sm:$0xff] %v2859_v35 }
  0xae   :  { %v2761_v38 = vpop.permute.xlu1 %209  ;;  %v2763_v39 = vpop.permute.xlu0 %199 }
  0xaf   :  { %1017 = vperm.xlu1 %2414, %v987_v36   ;;  %1012 = vperm.xlu0 %2413, %v986_v37   ;;  %v2864_v36 = vld [vmem:[%s4953_s4 + $0x10] sm:$0xff]   ;;  %v2866_v37 = vunpack.c.l.bf16 %v2338_v12  ;;  %v2945_v12 = vld [vmem:[%s4953_s4 + $0x28] sm:$0xff]  }
  0xb0   :  { %5044 = vst [vmem:[#allocation32_spill] sm:$0xff] %v2864_v36  ;;  %5060 = vst [vmem:[#allocation48_spill] sm:$0xff] %v2945_v12  ;;  %v2969_v36 = vunpack.c.l.bf16 %v2341_v20 }
  0xb1   :  { %5045 = vst [vmem:[#allocation33_spill] sm:$0xff] %v2866_v37  ;;  %v2925_v62 = vmul.f32 %v2866_v37, %v2816_v0 }
  0xb2   :  { %v2769_v42 = vpop.permute.xlu1 %214  ;;  %v2771_v43 = vpop.permute.xlu0 %204  ;;  %5064 = vst [vmem:[#allocation52_spill] sm:$0xff] %v2969_v36 }
  0xb3   :  { %1027 = vperm.xlu1 %2414, %v989_v40   ;;  %1022 = vperm.xlu0 %2413, %v988_v41   ;;  %v2340_v40 = vld [vmem:[%s4952_s3 + $0x20] sm:$0xff]   ;;  %5055 = vst [vmem:[#allocation43_spill] sm:$0xff] %v2925_v62 }
  0xb6   :  { %v2779_v46 = vpop.permute.xlu1 %224  ;;  %v2781_v47 = vpop.permute.xlu0 %219 }
  0xb7   :  { %5029 = vst [vmem:[#allocation17_spill] sm:$0xff] %v2779_v46  ;;  %5030 = vst [vmem:[#allocation18_spill] sm:$0xff] %v2781_v47  ;;  %1037 = vperm.xlu1 %2414, %v991_v44   ;;  %1032 = vperm.xlu0 %2413, %v990_v45   ;;  %v2877_v45 = vmul.f32 %v2829_v9, %v2816_v0  ;;  %v3163_v46 = vmul.f32 %v2899_v58, %v2665_v23 }
  0xba   :  { %v2792_v54 = vpop.permute.xlu1 %234  ;;  %v2794_v55 = vpop.permute.xlu0 %229 }
  0xbb   :  { %5031 = vst [vmem:[#allocation19_spill] sm:$0xff] %v2792_v54  ;;  %5032 = vst [vmem:[#allocation20_spill] sm:$0xff] %v2794_v55  ;;  %857 = vperm.xlu1 %2414, %v787_v48   ;;  %852 = vperm.xlu0 %2413, %v786_v50   ;;  %v2885_v50 = vld [vmem:[%s4953_s4 + $0x18] sm:$0xff]   ;;  %v2928_v48 = vunpack.c.l.bf16 %v2340_v40  ;;  %v3012_v54 = vstv %s2901_s29  ;;  %s3282_s29 = sld [smem:[#allocation9 + $0x183]] }
  0xbc   :  { %5049 = vst [vmem:[#allocation37_spill] sm:$0xff] %v2885_v50  ;;  %v2998_v55 = vld [vmem:[%s4953_s4 + $0x38] sm:$0xff]  }
  0xbd   :  { %5056 = vst [vmem:[#allocation44_spill] sm:$0xff] %v2928_v48  ;;  %5072 = vst [vmem:[#allocation60_spill] sm:$0xff] %v2998_v55  ;;  %v3061_v55 = vmul.f32 %v2829_v9, %v3012_v54 }
  0xbe   :  { %v2825_v7 = vpop.permute.xlu1 %244  ;;  %v2827_v8 = vpop.permute.xlu0 %239 }
  0xbf   :  { %5038 = vst [vmem:[#allocation26_spill] sm:$0xff] %v2825_v7  ;;  %5039 = vst [vmem:[#allocation27_spill] sm:$0xff] %v2827_v8  ;;  %867 = vperm.xlu1 %2414, %v789_v57   ;;  %862 = vperm.xlu0 %2413, %v788_v60   ;;  %v994_v57 = vmul.f32 %v2751_v33, %v2665_v23  ;;  %v2905_v60 = vmul.f32 %v2852_v29, %v2816_v0  ;;  %v2957_v8 = vunpack.c.h.bf16 %v2341_v20 }
  0xc0   :  { %5084 = vst [vmem:[#allocation72_spill] sm:$0xff] %v3061_v55 }
  0xc1   :  { %5062 = vst [vmem:[#allocation50_spill] sm:$0xff] %v2957_v8 }
  0xc2   :  { %v2871_v41 = vpop.permute.xlu1 %254  ;;  %v2873_v44 = vpop.permute.xlu0 %249 }
  0xc3   :  { %5046 = vst [vmem:[#allocation34_spill] sm:$0xff] %v2871_v41  ;;  %5047 = vst [vmem:[#allocation35_spill] sm:$0xff] %v2873_v44  ;;  %1047 = vperm.xlu1 %2414, %v993_v13   ;;  %1042 = vperm.xlu0 %2413, %v992_v21   ;;  %v2909_v13 = vunpack.c.h.bf16 %v2340_v40  ;;  %v2921_v21 = vmul.f32 %v2859_v35, %v2816_v0  ;;  %v1195_v40 = vmul.f32 %v2899_v58, %v2615_v5  ;;  %v2343_v44 = vld [vmem:[%s4952_s3 + $0x38] sm:$0xff]  }
  0xc4   :  { %v466_v41 = vstv %s2836_s6  ;;  %v2993_v59 = vunpack.c.h.bf16 %v2343_v44 }
  0xc5   :  { %5052 = vst [vmem:[#allocation40_spill] sm:$0xff] %v2909_v13  ;;  %5054 = vst [vmem:[#allocation42_spill] sm:$0xff] %v2921_v21  ;;  %v2966_v50 = vmul.f32 %v2909_v13, %v2816_v0  ;;  %v467_v16 = vmul.f32 %v466_v41, %v2787_v51  ;;  %v3009_v41 = vunpack.c.l.bf16 %v2343_v44 }
  0xc6   :  { %v2933_v28 = vpop.permute.xlu1 %264  ;;  %v2935_v24 = vpop.permute.xlu0 %259  ;;  %5071 = vst [vmem:[#allocation59_spill] sm:$0xff] %v2993_v59  ;;  %v3042_v44 = vmul.f32 %v2993_v59, %v2816_v0 }
  0xc7   :  { %5057 = vst [vmem:[#allocation45_spill] sm:$0xff] %v2933_v28  ;;  %5058 = vst [vmem:[#allocation46_spill] sm:$0xff] %v2935_v24  ;;  %1057 = vperm.xlu1 %2414, %v995_v52   ;;  %v2954_v24 = vmul.f32 %v2894_v56, %v2816_v0  ;;  %1052 = vperm.xlu0 %2413, %v994_v57   ;;  %v1194_v52 = vmul.f32 %v2899_v58, %v2605_v2  ;;  %v2971_v28 = vunpack.c.h.bf16 %v2342_v34 }
  0xc8   :  { %5063 = vst [vmem:[#allocation51_spill] sm:$0xff] %v2966_v50  ;;  %v2977_v57 = vmul.f32 %v2928_v48, %v2816_v0  ;;  %v2983_v50 = vld [vmem:[%s4953_s4 + $0x30] sm:$0xff]   ;;  %5074 = vst [vmem:[#allocation62_spill] sm:$0xff] %v3009_v41  ;;  %s3026_s4 = sld [smem:[#allocation9 + $0x85]] }
  0xc9   :  { %5061 = vst [vmem:[#allocation49_spill] sm:$0xff] %v2954_v24  ;;  %5065 = vst [vmem:[#allocation53_spill] sm:$0xff] %v2971_v28  ;;  %v2985_v24 = vunpack.c.l.bf16 %v2342_v34  ;;  %v1197_v34 = vmul.f32 %v2899_v58, %v2610_v4  ;;  %v3023_v53 = vmul.f32 %v2971_v28, %v2816_v0 }
  0xca   :  { %5066 = vst [vmem:[#allocation54_spill] sm:$0xff] %v2977_v57  ;;  %5067 = vst [vmem:[#allocation55_spill] sm:$0xff] %v2983_v50  ;;  %v2987_v20 = vpop.permute.xlu1 %274  ;;  %v2989_v7 = vpop.permute.xlu0 %269  ;;  %v468_v57 = vstv %s2889_s28  ;;  %v3046_v50 = vmul.f32 %v2852_v29, %v3012_v54  ;;  %s3259_s28 = sld [smem:[#allocation9 + $0x202]] }
  0xcb   :  { %5068 = vst [vmem:[#allocation56_spill] sm:$0xff] %v2985_v24  ;;  %5069 = vst [vmem:[#allocation57_spill] sm:$0xff] %v2987_v20  ;;  %1217 = vperm.xlu1 %2414, %v1195_v40   ;;  %1212 = vperm.xlu0 %2413, %v1194_v52   ;;  %v1196_v20 = vmul.f32 %v2899_v58, %v2600_v1  ;;  %v3018_v40 = vmul.f32 %v2969_v36, %v2816_v0 }
  0xcc   :  { %5070 = vst [vmem:[#allocation58_spill] sm:$0xff] %v2989_v7  ;;  %v3007_v7 = vmul.f32 %v2957_v8, %v2816_v0  ;;  %5076 = vst [vmem:[#allocation64_spill] sm:$0xff] %v3023_v53  ;;  %v3030_v52 = vmul.f32 %v2985_v24, %v2816_v0  ;;  %v469_v47 = vadd.f32 %v468_v57, %v467_v16 }
  0xcd   :  { %5075 = vst [vmem:[#allocation63_spill] sm:$0xff] %v3018_v40  ;;  %5080 = vst [vmem:[#allocation68_spill] sm:$0xff] %v3042_v44  ;;  %v676_v40 = vstv %s2950_s15  ;;  %v3053_v16 = vmul.f32 %v3009_v41, %v2816_v0  ;;  %v3057_v57 = vmul.f32 %v2818_v3, %v3012_v54  ;;  %v3066_v44 = vstv %s2973_s18  ;;  %s3739_s15 = sld [smem:[#allocation9 + $0x204]] }
  0xce   :  { %5073 = vst [vmem:[#allocation61_spill] sm:$0xff] %v3007_v7  ;;  %5077 = vst [vmem:[#allocation65_spill] sm:$0xff] %v3030_v52  ;;  %v3034_v62 = vpop.permute.xlu1 %377  ;;  %v3036_v12 = vpop.permute.xlu0 %372  ;;  %v1199_v7 = vmul.f32 %v2899_v58, %v2624_v10  ;;  %v3074_v0 = vmul.f32 %v2859_v35, %v3012_v54  ;;  %v3140_v52 = vmul.f32 %v2899_v58, %v2648_v18 }
  0xcf   :  { %5078 = vst [vmem:[#allocation66_spill] sm:$0xff] %v3034_v62  ;;  %5079 = vst [vmem:[#allocation67_spill] sm:$0xff] %v3036_v12  ;;  %1227 = vperm.xlu1 %2414, %v1197_v34   ;;  %1222 = vperm.xlu0 %2413, %v1196_v20   ;;  %v1198_v34 = vmul.f32 %v2899_v58, %v2629_v11  ;;  %v3070_v12 = vmul.f32 %v2808_v61, %v3012_v54 }
  0xd0   :  { %5081 = vst [vmem:[#allocation69_spill] sm:$0xff] %v3046_v50  ;;  %5082 = vst [vmem:[#allocation70_spill] sm:$0xff] %v3053_v16  ;;  %v3078_v20 = vmul.f32 %v2866_v37, %v3012_v54  ;;  %v3083_v16 = vrot.slane %v469_v47, %v2839_v17  ;;  %v3100_v47 = vmul.f32 %v2894_v56, %v3012_v54  ;;  %v3130_v50 = vstv %s3026_s4 }
  0xd1   :  { %5083 = vst [vmem:[#allocation71_spill] sm:$0xff] %v3057_v57  ;;  %5085 = vst [vmem:[#allocation73_spill] sm:$0xff] %v3066_v44  ;;  %v1200_v57 = vmul.f32 %v2899_v58, %v2641_v15  ;;  %v3127_v62 = vmul.f32 %v2969_v36, %v3012_v54  ;;  %v3207_v63 = vmul.f32 %v3130_v50, %v2600_v1 }
  0xd2   :  { %5086 = vst [vmem:[#allocation74_spill] sm:$0xff] %v3070_v12  ;;  %5087 = vst [vmem:[#allocation75_spill] sm:$0xff] %v3074_v0  ;;  %v3085_v55 = vpop.permute.xlu1 %387  ;;  %v3087_v44 = vpop.permute.xlu0 %382  ;;  %v1201_v12 = vmul.f32 %v2899_v58, %v2636_v14  ;;  %v677_v0 = vmul.f32 %v676_v40, %v2787_v51  ;;  %v996_v40 = vmul.f32 %v2751_v33, %v2677_v27 }
  0xd3   :  { %5088 = vst [vmem:[#allocation76_spill] sm:$0xff] %v3078_v20  ;;  %5089 = vst [vmem:[#allocation77_spill] sm:$0xff] %v3083_v16  ;;  %1237 = vperm.xlu1 %2414, %v1199_v7   ;;  %v3096_v20 = vmul.f32 %v2880_v49, %v3012_v54  ;;  %v997_v16 = vmul.f32 %v2751_v33, %v2672_v26  ;;  %1232 = vperm.xlu0 %2413, %v1198_v34  }
  0xd4   :  { %5090 = vst [vmem:[#allocation78_spill] sm:$0xff] %v3085_v55  ;;  %5091 = vst [vmem:[#allocation79_spill] sm:$0xff] %v3087_v44  ;;  %v678_v44 = vstv %s3003_s20  ;;  %v3111_v7 = vmul.f32 %v2909_v13, %v3012_v54  ;;  %v998_v55 = vmul.f32 %v2751_v33, %v2689_v31  ;;  %v3123_v34 = vmul.f32 %v2957_v8, %v3012_v54 }
  0xd5   :  { %5092 = vst [vmem:[#allocation80_spill] sm:$0xff] %v3096_v20  ;;  %5093 = vst [vmem:[#allocation81_spill] sm:$0xff] %v3100_v47  ;;  %v3115_v20 = vmul.f32 %v2928_v48, %v3012_v54  ;;  %v999_v47 = vmul.f32 %v2751_v33, %v2684_v30  ;;  %v3144_v33 = vmul.f32 %v2899_v58, %v2653_v19 }
  0xd6   :  { %5094 = vst [vmem:[#allocation82_spill] sm:$0xff] %v3111_v7  ;;  %5096 = vst [vmem:[#allocation84_spill] sm:$0xff] %v3123_v34  ;;  %v3134_v7 = vpop.permute.xlu1 %397  ;;  %v3147_v34 = vstv %s3038_s21  ;;  %v679_v53 = vadd.f32 %v678_v44, %v677_v0  ;;  %v3173_v44 = vmul.f32 %v3009_v41, %v3012_v54  ;;  %v3177_v0 = vmul.f32 %v3130_v50, %v2615_v5 }
  0xd7   :  { %5095 = vst [vmem:[#allocation83_spill] sm:$0xff] %v3115_v20  ;;  %5097 = vst [vmem:[#allocation85_spill] sm:$0xff] %v3127_v62  ;;  %v3136_v20 = vpop.permute.xlu0 %392  ;;  %1247 = vperm.xlu1 %2414, %v1201_v12   ;;  %v3151_v62 = vmul.f32 %v2971_v28, %v3012_v54  ;;  %1242 = vperm.xlu0 %2413, %v1200_v57   ;;  %v3169_v12 = vmul.f32 %v2993_v59, %v3012_v54 }
  0xd8   :  { %5098 = vst [vmem:[#allocation86_spill] sm:$0xff] %v3134_v7  ;;  %5099 = vst [vmem:[#allocation87_spill] sm:$0xff] %v3136_v20  ;;  %v3155_v20 = vmul.f32 %v2985_v24, %v3012_v54  ;;  %v3159_v7 = vmul.f32 %v2899_v58, %v2660_v22  ;;  %v3187_v57 = vmul.f32 %v2852_v29, %v3147_v34 }
  0xd9   :  { %5100 = vst [vmem:[#allocation88_spill] sm:$0xff] %v3151_v62  ;;  %5102 = vst [vmem:[#allocation90_spill] sm:$0xff] %v3169_v12  ;;  %v3191_v12 = vmul.f32 %v2818_v3, %v3147_v34  ;;  %v3195_v54 = vmul.f32 %v3130_v50, %v2610_v4  ;;  %v3203_v6 = vrot.slane %v679_v53, %v2839_v17 }
  0xda   :  { %5101 = vst [vmem:[#allocation89_spill] sm:$0xff] %v3155_v20  ;;  %5103 = vst [vmem:[#allocation91_spill] sm:$0xff] %v3173_v44  ;;  %v3181_v20 = vmul.f32 %v3130_v50, %v2605_v2  ;;  %v886_v44 = vstv %s3080_s22  ;;  %v3198_v62 = vpop.permute.xlu1 %407  ;;  %v3224_v53 = vmul.f32 %v3130_v50, %v2624_v10 }
  0xdb   :  { %5104 = vst [vmem:[#allocation92_spill] sm:$0xff] %v3187_v57  ;;  %5105 = vst [vmem:[#allocation93_spill] sm:$0xff] %v3191_v12  ;;  %v3200_v21 = vpop.permute.xlu0 %402  ;;  %v3211_v57 = vmul.f32 %v2829_v9, %v3147_v34  ;;  %v3215_v12 = vmul.f32 %v2808_v61, %v3147_v34  ;;  %1067 = vperm.xlu1 %2414, %v997_v16   ;;  %1062 = vperm.xlu0 %2413, %v996_v40  }
  0xdc   :  { %5106 = vst [vmem:[#allocation94_spill] sm:$0xff] %v3198_v62  ;;  %5107 = vst [vmem:[#allocation95_spill] sm:$0xff] %v3200_v21  ;;  %v3220_v21 = vstv %s3104_s23  ;;  %v3240_v16 = vmul.f32 %v3130_v50, %v2636_v14  ;;  %v887_v62 = vmul.f32 %v886_v44, %v2787_v51  ;;  %v3253_v40 = vmul.f32 %v2894_v56, %v3147_v34 }
  0xdd   :  { %5108 = vst [vmem:[#allocation96_spill] sm:$0xff] %v3203_v6  ;;  %5109 = vst [vmem:[#allocation97_spill] sm:$0xff] %v3211_v57  ;;  %v3228_v6 = vmul.f32 %v3130_v50, %v2629_v11  ;;  %v3232_v57 = vmul.f32 %v2859_v35, %v3147_v34 }
  0xde   :  { %5110 = vst [vmem:[#allocation98_spill] sm:$0xff] %v3215_v12  ;;  %5111 = vst [vmem:[#allocation99_spill] sm:$0xff] %v3220_v21  ;;  %v3236_v12 = vmul.f32 %v2866_v37, %v3147_v34  ;;  %v3244_v21 = vmul.f32 %v3130_v50, %v2641_v15 }
  0xdf   :  { %5112 = vst [vmem:[#allocation100_spill] sm:$0xff] %v3228_v6  ;;  %5113 = vst [vmem:[#allocation101_spill] sm:$0xff] %v3232_v57  ;;  %v3249_v6 = vmul.f32 %v2880_v49, %v3147_v34  ;;  %v888_v57 = vstv %s3132_s24  ;;  %v3264_v44 = vpop.permute.xlu0 %412  ;;  %1077 = vperm.xlu1 %2414, %v999_v47   ;;  %1072 = vperm.xlu0 %2413, %v998_v55   ;;  %v3308_v47 = vstv %s3183_s26  ;;  %s3901_s24 = sld [smem:[#allocation9 + $0x5]] }
  0xe0   :  { %5114 = vst [vmem:[#allocation102_spill] sm:$0xff] %v3236_v12  ;;  %5115 = vst [vmem:[#allocation103_spill] sm:$0xff] %v3240_v16  ;;  %v3257_v12 = vmul.f32 %v2899_v58, %v2672_v26  ;;  %v3272_v16 = vmul.f32 %v2909_v13, %v3147_v34  ;;  %v3318_v55 = vmul.f32 %v2985_v24, %v3147_v34 }
  0xe1   :  { %5116 = vst [vmem:[#allocation104_spill] sm:$0xff] %v3244_v21  ;;  %5117 = vst [vmem:[#allocation105_spill] sm:$0xff] %v3249_v6  ;;  %v3262_v21 = vpop.permute.xlu1 %417  ;;  %v3268_v6 = vmul.f32 %v2899_v58, %v2677_v27 }
  0xe2   :  { %5118 = vst [vmem:[#allocation106_spill] sm:$0xff] %v3253_v40  ;;  %5119 = vst [vmem:[#allocation107_spill] sm:$0xff] %v3257_v12  ;;  %v3276_v40 = vmul.f32 %v2928_v48, %v3147_v34  ;;  %v3280_v12 = vmul.f32 %v2899_v58, %v2684_v30 }
  0xe3   :  { %5120 = vst [vmem:[#allocation108_spill] sm:$0xff] %v3262_v21  ;;  %5121 = vst [vmem:[#allocation109_spill] sm:$0xff] %v3264_v44  ;;  %v3286_v44 = vmul.f32 %v2899_v58, %v2689_v31  ;;  %v3290_v21 = vmul.f32 %v2957_v8, %v3147_v34  ;;  %v3305_v58 = vmul.f32 %v3130_v50, %v2653_v19  ;;  %1257 = vperm.xlu1 %2414, %v3140_v52  }
  0xe4   :  { %5122 = vst [vmem:[#allocation110_spill] sm:$0xff] %v3272_v16  ;;  %5123 = vst [vmem:[#allocation111_spill] sm:$0xff] %v3276_v40  ;;  %v3294_v16 = vmul.f32 %v2969_v36, %v3147_v34  ;;  %v3297_v40 = vstv %s3165_s25  ;;  %1252 = vperm.xlu0 %2413, %v3144_v33   ;;  %s3947_s25 = sld [smem:[#allocation9 + $0x185]] }
  0xe5   :  { %5124 = vst [vmem:[#allocation112_spill] sm:$0xff] %v3280_v12  ;;  %5125 = vst [vmem:[#allocation113_spill] sm:$0xff] %v3286_v44  ;;  %v3301_v12 = vmul.f32 %v3130_v50, %v2648_v18  ;;  %v889_v44 = vadd.f32 %v888_v57, %v887_v62  ;;  %v3330_v62 = vpop.permute.xlu0 %422  ;;  %v3334_v57 = vmul.f32 %v2993_v59, %v3147_v34 }
  0xe6   :  { %5126 = vst [vmem:[#allocation114_spill] sm:$0xff] %v3290_v21  ;;  %5127 = vst [vmem:[#allocation115_spill] sm:$0xff] %v3294_v16  ;;  %v3314_v16 = vmul.f32 %v2971_v28, %v3147_v34  ;;  %v3322_v21 = vmul.f32 %v3130_v50, %v2660_v22  ;;  %v3385_v33 = vmul.f32 %v3297_v40, %v2624_v10 }
  0xe7   :  { %5128 = vst [vmem:[#allocation116_spill] sm:$0xff] %v3301_v12  ;;  %5129 = vst [vmem:[#allocation117_spill] sm:$0xff] %v3305_v58  ;;  %v3326_v58 = vmul.f32 %v3130_v50, %v2665_v23  ;;  %v3328_v12 = vpop.permute.xlu1 %427  ;;  %v3366_v52 = vrot.slane %v889_v44, %v2839_v17  ;;  %v3389_v44 = vmul.f32 %v3297_v40, %v2629_v11  ;;  %1267 = vperm.xlu1 %2414, %v3159_v7  }
  0xe8   :  { %5130 = vst [vmem:[#allocation118_spill] sm:$0xff] %v3314_v16  ;;  %5131 = vst [vmem:[#allocation119_spill] sm:$0xff] %v3318_v55  ;;  %v3338_v55 = vmul.f32 %v3009_v41, %v3147_v34  ;;  %v3342_v16 = vmul.f32 %v3297_v40, %v2615_v5  ;;  %v3358_v34 = vmul.f32 %v2818_v3, %v3308_v47  ;;  %1262 = vperm.xlu0 %2413, %v3163_v46  }
  0xe9   :  { %5132 = vst [vmem:[#allocation120_spill] sm:$0xff] %v3322_v21  ;;  %5133 = vst [vmem:[#allocation121_spill] sm:$0xff] %v3328_v12  ;;  %v1096_v21 = vstv %s3217_s27  ;;  %v3370_v12 = vmul.f32 %v3297_v40, %v2600_v1  ;;  %v3431_v7 = vmul.f32 %v3130_v50, %v2677_v27  ;;  %v3450_v46 = vmul.f32 %v3130_v50, %v2689_v31 }
  0xea   :  { %5134 = vst [vmem:[#allocation122_spill] sm:$0xff] %v3330_v62  ;;  %5135 = vst [vmem:[#allocation123_spill] sm:$0xff] %v3334_v57  ;;  %v3350_v62 = vmul.f32 %v3297_v40, %v2605_v2  ;;  %v3354_v57 = vmul.f32 %v2852_v29, %v3308_v47 }
  0xeb   :  { %5136 = vst [vmem:[#allocation124_spill] sm:$0xff] %v3338_v55  ;;  %5139 = vst [vmem:[#allocation127_spill] sm:$0xff] %v3358_v34  ;;  %v3362_v55 = vmul.f32 %v3297_v40, %v2610_v4  ;;  %v3378_v34 = vmul.f32 %v2808_v61, %v3308_v47  ;;  %1427 = vperm.xlu1 %2414, %v3177_v0   ;;  %v278_v0 = vadd.f32 %v2771_v43, %v2905_v60  ;;  %v5176_v60 = vld [vmem:[#allocation25_spill] sm:$0xff] }
  0xec   :  { %5137 = vst [vmem:[#allocation125_spill] sm:$0xff] %v3350_v62  ;;  %5138 = vst [vmem:[#allocation126_spill] sm:$0xff] %v3354_v57  ;;  %v3374_v57 = vmul.f32 %v2829_v9, %v3308_v47  ;;  %v3381_v62 = vstv %s3259_s28  ;;  %1422 = vperm.xlu0 %2413, %v3181_v20   ;;  %v5177_v20 = vunpack.c.l.bf16 %v5176_v60  ;;  %s2265_s28 = sld [smem:[#allocation9 + $0x106]] }
  0xed   :  { %5140 = vst [vmem:[#allocation128_spill] sm:$0xff] %v3362_v55  ;;  %5141 = vst [vmem:[#allocation129_spill] sm:$0xff] %v3366_v52  ;;  %v1097_v52 = vmul.f32 %v1096_v21, %v2787_v51  ;;  %v1098_v21 = vstv %s3282_s29  ;;  %s2266_s29 = sld [smem:[#allocation9 + $0x186]] }
  0xee   :  { %5142 = vst [vmem:[#allocation130_spill] sm:$0xff] %v3370_v12  ;;  %5143 = vst [vmem:[#allocation131_spill] sm:$0xff] %v3374_v57  ;;  %v3392_v12 = vpop.permute.xlu1 %437  ;;  %v3394_v57 = vpop.permute.xlu0 %432 }
  0xef   :  { %5144 = vst [vmem:[#allocation132_spill] sm:$0xff] %v3378_v34  ;;  %5145 = vst [vmem:[#allocation133_spill] sm:$0xff] %v3381_v62  ;;  %v3398_v34 = vmul.f32 %v2859_v35, %v3308_v47  ;;  %v3402_v62 = vmul.f32 %v2866_v37, %v3308_v47  ;;  %1437 = vperm.xlu1 %2414, %v3195_v54   ;;  %v5188_v54 = vld [vmem:[#allocation18_spill] sm:$0xff] }
  0xf0   :  { %5146 = vst [vmem:[#allocation134_spill] sm:$0xff] %v3385_v33  ;;  %5147 = vst [vmem:[#allocation135_spill] sm:$0xff] %v3389_v44  ;;  %v3406_v33 = vmul.f32 %v3297_v40, %v2636_v14  ;;  %v3414_v44 = vmul.f32 %v3297_v40, %v2641_v15  ;;  %1432 = vperm.xlu0 %2413, %v3207_v63  }
  0xf1   :  { %5148 = vst [vmem:[#allocation136_spill] sm:$0xff] %v3392_v12  ;;  %5149 = vst [vmem:[#allocation137_spill] sm:$0xff] %v3394_v57  ;;  %v3446_v57 = vmul.f32 %v3130_v50, %v2684_v30 }
  0xf2   :  { %5150 = vst [vmem:[#allocation138_spill] sm:$0xff] %v3398_v34  ;;  %5151 = vst [vmem:[#allocation139_spill] sm:$0xff] %v3402_v62  ;;  %v3418_v34 = vmul.f32 %v2880_v49, %v3308_v47  ;;  %v3422_v62 = vmul.f32 %v2894_v56, %v3308_v47  ;;  %v3460_v12 = vpop.permute.xlu1 %447  ;;  %v3462_v55 = vpop.permute.xlu0 %442 }
  0xf3   :  { %5152 = vst [vmem:[#allocation140_spill] sm:$0xff] %v3406_v33  ;;  %5153 = vst [vmem:[#allocation141_spill] sm:$0xff] %v3414_v44  ;;  %v3426_v33 = vmul.f32 %v3130_v50, %v2672_v26  ;;  %v3435_v44 = vmul.f32 %v2909_v13, %v3308_v47  ;;  %v3469_v50 = vstv %s3345_s9  ;;  %1447 = vperm.xlu1 %2414, %v3224_v53   ;;  %s2270_s9 = sld [smem:[#allocation9 + $0x107]] }
  0xf4   :  { %5154 = vst [vmem:[#allocation142_spill] sm:$0xff] %v3418_v34  ;;  %5155 = vst [vmem:[#allocation143_spill] sm:$0xff] %v3422_v62  ;;  %v3439_v34 = vmul.f32 %v2928_v48, %v3308_v47  ;;  %v3442_v62 = vstv %s3310_s30  ;;  %v3514_v43 = vmul.f32 %v3469_v50, %v2615_v5  ;;  %v5180_v5 = vld [vmem:[#allocation42_spill] sm:$0xff]  ;;  %s2263_s30 = sld [smem:[#allocation9 + $0x6]] }
  0xf5   :  { %5156 = vst [vmem:[#allocation144_spill] sm:$0xff] %v3426_v33  ;;  %5157 = vst [vmem:[#allocation145_spill] sm:$0xff] %v3431_v7  ;;  %v3454_v7 = vmul.f32 %v2957_v8, %v3308_v47  ;;  %v1099_v33 = vadd.f32 %v1098_v21, %v1097_v52  ;;  %v3474_v52 = vmul.f32 %v3297_v40, %v2648_v18 }
  0xf6   :  { %5158 = vst [vmem:[#allocation146_spill] sm:$0xff] %v3435_v44  ;;  %5159 = vst [vmem:[#allocation147_spill] sm:$0xff] %v3439_v34  ;;  %v279_v44 = vadd.f32 %v2761_v38, %v2849_v25  ;;  %v277_v34 = vadd.f32 %v2763_v39, %v2856_v32  ;;  %v3478_v38 = vmul.f32 %v3297_v40, %v2653_v19 }
  0xf7   :  { %5160 = vst [vmem:[#allocation148_spill] sm:$0xff] %v3446_v57  ;;  %5161 = vst [vmem:[#allocation149_spill] sm:$0xff] %v3450_v46  ;;  %v3466_v57 = vmul.f32 %v2969_v36, %v3308_v47  ;;  %v3482_v39 = vmul.f32 %v2852_v29, %v3442_v62  ;;  %v3486_v25 = vmul.f32 %v2818_v3, %v3442_v62  ;;  %v5266_v46 = vld [vmem:[#allocation113_spill] sm:$0xff] }
  0xf8   :  { %5162 = vst [vmem:[#allocation150_spill] sm:$0xff] %v3454_v7  ;;  %5164 = vst [vmem:[#allocation152_spill] sm:$0xff] %v3474_v52  ;;  %v280_v32 = vadd.f32 %v2769_v42, %v2877_v45  ;;  %v3495_v19 = vmul.f32 %v3297_v40, %v2660_v22  ;;  %v3499_v21 = vmul.f32 %v3297_v40, %v2665_v23  ;;  %v5174_v22 = vld [vmem:[#allocation23_spill] sm:$0xff]  ;;  %v5243_v52 = vld [vmem:[#allocation46_spill] sm:$0xff] }
  0xf9   :  { %5163 = vst [vmem:[#allocation151_spill] sm:$0xff] %v3466_v57  ;;  %5165 = vst [vmem:[#allocation153_spill] sm:$0xff] %v3478_v38  ;;  %v3502_v57 = vrot.slane %v1099_v33, %v2839_v17  ;;  %v3506_v7 = vmul.f32 %v2829_v9, %v3442_v62  ;;  %v3510_v42 = vmul.f32 %v2808_v61, %v3442_v62  ;;  %v5175_v23 = vunpack.c.l.bf16 %v5174_v22  ;;  %v5242_v38 = vld [vmem:[#allocation65_spill] sm:$0xff] }
  0xfa   :  { %5166 = vst [vmem:[#allocation154_spill] sm:$0xff] %v3482_v39  ;;  %5167 = vst [vmem:[#allocation155_spill] sm:$0xff] %v3486_v25  ;;  %v293_v33 = vadd.f32 %v5177_v20, %v277_v34  ;;  %v3542_v34 = vmul.f32 %v2866_v37, %v3442_v62  ;;  %v5212_v25 = vld [vmem:[#allocation37_spill] sm:$0xff] }
  0xfb   :  { %5168 = vst [vmem:[#allocation156_spill] sm:$0xff] %v3495_v19  ;;  %5169 = vst [vmem:[#allocation157_spill] sm:$0xff] %v3499_v21  ;;  %v295_v45 = vadd.f32 %v5175_v23, %v279_v44  ;;  %v3524_v21 = vpop.permute.xlu0 %582  ;;  %v3538_v44 = vmul.f32 %v2859_v35, %v3442_v62  ;;  %v3546_v23 = vmul.f32 %v3469_v50, %v2610_v4 }
  0xfc   :  { %5170 = vst [vmem:[#allocation158_spill] sm:$0xff] %v3502_v57  ;;  %5171 = vst [vmem:[#allocation159_spill] sm:$0xff] %v3506_v7  ;;  %v3522_v57 = vpop.permute.xlu1 %587  ;;  %v3527_v7 = vstv %s3408_s10  ;;  %v3565_v4 = vmul.f32 %v2894_v56, %v3442_v62  ;;  %s4551_s10 = sld [smem:[#allocation9 + $0x187]] }
  0xfd   :  { %5172 = vst [vmem:[#allocation160_spill] sm:$0xff] %v3510_v42  ;;  %5173 = vst [vmem:[#allocation161_spill] sm:$0xff] %v3514_v43  ;;  %v3531_v42 = vmul.f32 %v3469_v50, %v2605_v2  ;;  %v5181_v43 = vld [vmem:[#allocation17_spill] sm:$0xff]  ;;  %v5185_v2 = vunpack.c.h.bf16 %v5174_v22  ;;  %v5195_v22 = vld [vmem:[#allocation47_spill] sm:$0xff] }
  0xfe   :  { %5178 = vst [vmem:[#allocation23_spill] sm:$0xff] %v3527_v7  ;;  %v282_v19 = vadd.f32 %v5181_v43, %v5180_v5  ;;  %5182 = vst [vmem:[#allocation42_spill] sm:$0xff] %v3538_v44  ;;  %v5186_v7 = vunpack.c.h.bf16 %v5176_v60  ;;  %v5187_v5 = vld [vmem:[#allocation43_spill] sm:$0xff]  ;;  %v3557_v44 = vmul.f32 %v3469_v50, %v2600_v1  ;;  %v5194_v1 = vld [vmem:[#allocation38_spill] sm:$0xff] }
  0xff   :  { %5179 = vst [vmem:[#allocation25_spill] sm:$0xff] %v3531_v42  ;;  %5183 = vst [vmem:[#allocation17_spill] sm:$0xff] %v3542_v34  ;;  %v296_v20 = vadd.f32 %v5185_v2, %v280_v32  ;;  %v281_v42 = vadd.f32 %v5188_v54, %v5187_v5  ;;  %v3561_v34 = vmul.f32 %v2880_v49, %v3442_v62  ;;  %v5196_v60 = vld [vmem:[#allocation19_spill] sm:$0xff]  ;;  %v5197_v5 = vld [vmem:[#allocation49_spill] sm:$0xff] }
 0x100   :  { %5184 = vst [vmem:[#allocation162_spill] sm:$0xff] %v3546_v23  ;;  %v294_v43 = vadd.f32 %v5186_v7, %v278_v0  ;;  %5189 = vst [vmem:[#allocation43_spill] sm:$0xff] %v3557_v44  ;;  %v3569_v7 = vmul.f32 %v3469_v50, %v2624_v10  ;;  %v3573_v32 = vmul.f32 %v3469_v50, %v2629_v11  ;;  %v5198_v54 = vld [vmem:[#allocation20_spill] sm:$0xff]  ;;  %v3587_v10 = vpop.permute.xlu1 %597  ;;  %v5210_v44 = vld [vmem:[#allocation27_spill] sm:$0xff] }
 0x101   :  { %5190 = vst [vmem:[#allocation18_spill] sm:$0xff] %v3561_v34  ;;  %5191 = vst [vmem:[#allocation163_spill] sm:$0xff] %v3565_v4  ;;  %v3578_v63 = vadd.f32 %v5194_v1, %v295_v45  ;;  %v3581_v0 = vadd.f32 %v5194_v1, %v293_v33  ;;  %v284_v2 = vadd.f32 %v5196_v60, %v5195_v22  ;;  %v5199_v11 = vld [vmem:[#allocation32_spill] sm:$0xff] }
 0x102   :  { %5192 = vst [vmem:[#allocation164_spill] sm:$0xff] %v3569_v7  ;;  %5193 = vst [vmem:[#allocation165_spill] sm:$0xff] %v3573_v32  ;;  %v283_v4 = vadd.f32 %v5198_v54, %v5197_v5  ;;  %v3589_v7 = vpop.permute.xlu0 %592  ;;  %v5200_v32 = vunpack.c.h.bf16 %v5199_v11  ;;  %v3596_v45 = vmul.f32 %v2971_v28, %v3308_v47  ;;  %v3600_v33 = vmul.f32 %v2985_v24, %v3308_v47  ;;  %v5205_v5 = vld [vmem:[#allocation100_spill] sm:$0xff] }
 0x103   :  { %v3604_v22 = vmul.f32 %v3469_v50, %v2636_v14  ;;  %v3609_v60 = vadd.f32 %v5194_v1, %v296_v20  ;;  %v5204_v53 = vunpack.c.l.bf16 %v5199_v11  ;;  %1442 = vperm.xlu0 %2413, %v5205_v5   ;;  %v3619_v54 = vmul.f32 %v3469_v50, %v2641_v15  ;;  %v5208_v14 = vld [vmem:[#allocation26_spill] sm:$0xff] }
 0x104   :  { %v298_v34 = vadd.f32 %v5200_v32, %v282_v19  ;;  %5201 = vst [vmem:[#allocation38_spill] sm:$0xff] %v3596_v45  ;;  %5202 = vst [vmem:[#allocation47_spill] sm:$0xff] %v3600_v33  ;;  %v3612_v19 = vadd.f32 %v5194_v1, %v294_v43  ;;  %v5207_v33 = vld [vmem:[#allocation51_spill] sm:$0xff]  ;;  %v3627_v20 = vmul.f32 %v2993_v59, %v3308_v47  ;;  %v1306_v43 = vstv %s3516_s11  ;;  %v3634_v39 = vpop.permute.xlu1 %607  ;;  %s2268_s11 = sld [smem:[#allocation9 + $0x7]] }
 0x105   :  { %5203 = vst [vmem:[#allocation19_spill] sm:$0xff] %v3604_v22  ;;  %v297_v32 = vadd.f32 %v5204_v53, %v281_v42  ;;  %5206 = vst [vmem:[#allocation49_spill] sm:$0xff] %v3619_v54  ;;  %v286_v45 = vadd.f32 %v5208_v14, %v5207_v33  ;;  %v5209_v22 = vld [vmem:[#allocation54_spill] sm:$0xff]  ;;  %v5213_v11 = vunpack.c.h.bf16 %v5212_v25  ;;  %v5214_v53 = vunpack.c.l.bf16 %v5212_v25 }
 0x106   :  { %v285_v23 = vadd.f32 %v5210_v44, %v5209_v22  ;;  %5211 = vst [vmem:[#allocation20_spill] sm:$0xff] %v3627_v20  ;;  %v3636_v15 = vpop.permute.xlu0 %602  ;;  %v3640_v33 = vmul.f32 %v3009_v41, %v3308_v47  ;;  %v3644_v44 = vmul.f32 %v3297_v40, %v2672_v26  ;;  %v3647_v22 = vadd.f32 %v5194_v1, %v298_v34  ;;  %v5218_v14 = vld [vmem:[#allocation34_spill] sm:$0xff]  ;;  %v5221_v20 = vld [vmem:[#allocation103_spill] sm:$0xff]  ;;  %v5223_v26 = vld [vmem:[#allocation104_spill] sm:$0xff] }
 0x107   :  { %v300_v42 = vadd.f32 %v5213_v11, %v284_v2  ;;  %v299_v5 = vadd.f32 %v5214_v53, %v283_v4  ;;  %v5217_v2 = vld [vmem:[#allocation61_spill] sm:$0xff]  ;;  %v5219_v4 = vld [vmem:[#allocation63_spill] sm:$0xff]  ;;  %1457 = vperm.xlu1 %2414, %v5221_v20   ;;  %v3656_v54 = vmul.f32 %v3297_v40, %v2677_v27  ;;  %v3659_v47 = vadd.f32 %v5194_v1, %v297_v32 }
 0x108   :  { %5215 = vst [vmem:[#allocation32_spill] sm:$0xff] %v3640_v33  ;;  %5216 = vst [vmem:[#allocation100_spill] sm:$0xff] %v3644_v44  ;;  %v288_v25 = vadd.f32 %v5218_v14, %v5217_v2  ;;  %v5220_v11 = vld [vmem:[#allocation35_spill] sm:$0xff]  ;;  %1452 = vperm.xlu0 %2413, %v5223_v26   ;;  %v3664_v34 = vmul.f32 %v2909_v13, %v3442_v62  ;;  %v3668_v2 = vmul.f32 %v2928_v48, %v3442_v62  ;;  %v5226_v14 = vld [vmem:[#allocation41_spill] sm:$0xff] }
 0x109   :  { %v287_v53 = vadd.f32 %v5220_v11, %v5219_v4  ;;  %5222 = vst [vmem:[#allocation51_spill] sm:$0xff] %v3656_v54  ;;  %v1307_v20 = vmul.f32 %v1306_v43, %v2787_v51  ;;  %v5227_v4 = vunpack.c.h.bf16 %v5226_v14  ;;  %v5228_v11 = vunpack.c.l.bf16 %v5226_v14 }
 0x10a   :  { %5224 = vst [vmem:[#allocation26_spill] sm:$0xff] %v3664_v34  ;;  %5225 = vst [vmem:[#allocation54_spill] sm:$0xff] %v3668_v2  ;;  %v3677_v26 = vmul.f32 %v3297_v40, %v2684_v30  ;;  %v1308_v33 = vstv %s3575_s12  ;;  %v3681_v34 = vadd.f32 %v5194_v1, %v300_v42  ;;  %v3684_v54 = vadd.f32 %v5194_v1, %v299_v5  ;;  %v3686_v2 = vpop.permute.xlu1 %617  ;;  %v3688_v43 = vpop.permute.xlu0 %612  ;;  %v5234_v30 = vld [vmem:[#allocation48_spill] sm:$0xff]  ;;  %v5237_v5 = vld [vmem:[#allocation107_spill] sm:$0xff]  ;;  %s4557_s12 = sld [smem:[#allocation9 + $0x206]] }
 0x10b   :  { %v302_v27 = vadd.f32 %v5227_v4, %v286_v45  ;;  %v301_v32 = vadd.f32 %v5228_v11, %v285_v23  ;;  %5230 = vst [vmem:[#allocation37_spill] sm:$0xff] %v3686_v2  ;;  %5231 = vst [vmem:[#allocation61_spill] sm:$0xff] %v3688_v43  ;;  %v3692_v45 = vmul.f32 %v3297_v40, %v2689_v31  ;;  %v5235_v14 = vunpack.c.h.bf16 %v5234_v30  ;;  %v5240_v31 = vld [vmem:[#allocation64_spill] sm:$0xff]  ;;  %v5241_v40 = vld [vmem:[#allocation45_spill] sm:$0xff] }
 0x10c   :  { %5229 = vst [vmem:[#allocation27_spill] sm:$0xff] %v3677_v26  ;;  %v3696_v23 = vmul.f32 %v2957_v8, %v3442_v62  ;;  %v5236_v42 = vunpack.c.l.bf16 %v5234_v30  ;;  %1277 = vperm.xlu1 %2414, %v5237_v5   ;;  %v3705_v26 = vmul.f32 %v2969_v36, %v3442_v62  ;;  %v3708_v44 = vstv %s3606_s13  ;;  %1272 = vperm.xlu0 %2413, %v3268_v6   ;;  %v5247_v5 = vld [vmem:[#allocation66_spill] sm:$0xff]  ;;  %v5278_v43 = vld [vmem:[#allocation80_spill] sm:$0xff]  ;;  %s4579_s13 = sld [smem:[#allocation9 + $0x207]] }
 0x10d   :  { %5232 = vst [vmem:[#allocation34_spill] sm:$0xff] %v3692_v45  ;;  %v304_v4 = vadd.f32 %v5235_v14, %v288_v25  ;;  %5239 = vst [vmem:[#allocation103_spill] sm:$0xff] %v3708_v44  ;;  %v290_v45 = vadd.f32 %v5241_v40, %v5240_v31  ;;  %v3717_v25 = vmul.f32 %v3469_v50, %v2648_v18  ;;  %v5250_v18 = vld [vmem:[#allocation67_spill] sm:$0xff]  ;;  %v5279_v2 = vld [vmem:[#allocation94_spill] sm:$0xff] }
 0x10e   :  { %5233 = vst [vmem:[#allocation63_spill] sm:$0xff] %v3696_v23  ;;  %v303_v11 = vadd.f32 %v5236_v42, %v287_v53  ;;  %5238 = vst [vmem:[#allocation35_spill] sm:$0xff] %v3705_v26  ;;  %v289_v23 = vadd.f32 %v5243_v52, %v5242_v38  ;;  %v1309_v53 = vadd.f32 %v1308_v33, %v1307_v20  ;;  %v5246_v42 = vld [vmem:[#allocation69_spill] sm:$0xff]  ;;  %v2453_v52 = vld [vmem:[%s4949_s0 + $0x40] sm:$0xff]  ;;  %v3735_v33 = vpop.permute.xlu1 %627  ;;  %v3737_v20 = vpop.permute.xlu0 %622 }
 0x10f   :  { %5244 = vst [vmem:[#allocation104_spill] sm:$0xff] %v3717_v25  ;;  %v3720_v30 = vadd.f32 %v5194_v1, %v302_v27  ;;  %v3723_v14 = vadd.f32 %v5194_v1, %v301_v32  ;;  %v451_v26 = vadd.f32 %v5247_v5, %v5246_v42  ;;  %v3731_v6 = vmul.f32 %v2453_v52, %v3469_v50  ;;  %v5249_v38 = vld [vmem:[#allocation71_spill] sm:$0xff] }
 0x110   :  { %v450_v31 = vadd.f32 %v5250_v18, %v5249_v38  ;;  %5251 = vst [vmem:[#allocation107_spill] sm:$0xff] %v3735_v33  ;;  %5252 = vst [vmem:[#allocation64_spill] sm:$0xff] %v3737_v20  ;;  %v3743_v27 = vmul.f32 %v2852_v29, %v3708_v44  ;;  %v3747_v32 = vmul.f32 %v2818_v3, %v3708_v44  ;;  %v2454_v40 = vld [vmem:[%s4949_s0 + $0x58] sm:$0xff]  ;;  %v5258_v38 = vld [vmem:[#allocation72_spill] sm:$0xff]  ;;  %1282 = vperm.xlu0 %2413, %v5266_v46  }
 0x111   :  { %5245 = vst [vmem:[#allocation41_spill] sm:$0xff] %v3723_v14  ;;  %5248 = vst [vmem:[#allocation48_spill] sm:$0xff] %v3731_v6  ;;  %v3753_v42 = vmul.f32 %v2454_v40, %v3469_v50  ;;  %v3756_v5 = vadd.f32 %v5194_v1, %v304_v4  ;;  %v3759_v52 = vadd.f32 %v5194_v1, %v303_v11  ;;  %v5259_v18 = vld [vmem:[#allocation78_spill] sm:$0xff]  ;;  %v5261_v6 = vld [vmem:[#allocation79_spill] sm:$0xff] }
 0x112   :  { %5253 = vst [vmem:[#allocation45_spill] sm:$0xff] %v3743_v27  ;;  %5254 = vst [vmem:[#allocation65_spill] sm:$0xff] %v3747_v32  ;;  %v453_v29 = vadd.f32 %v5259_v18, %v5258_v38  ;;  %v5260_v27 = vld [vmem:[#allocation74_spill] sm:$0xff]  ;;  %v5262_v32 = vld [vmem:[#allocation112_spill] sm:$0xff]  ;;  %v3772_v4 = vrot.slane %v1309_v53, %v2839_v17  ;;  %v3794_v14 = vpop.permute.xlu0 %632 }
 0x113   :  { %5255 = vst [vmem:[#allocation46_spill] sm:$0xff] %v3753_v42  ;;  %5256 = vst [vmem:[#allocation69_spill] sm:$0xff] %v3756_v5  ;;  %v452_v3 = vadd.f32 %v5261_v6, %v5260_v27  ;;  %1287 = vperm.xlu1 %2414, %v5262_v32   ;;  %v5263_v25 = vld [vmem:[#allocation55_spill] sm:$0xff]  ;;  %v2455_v11 = vld [vmem:[%s4949_s0 + $0x50] sm:$0xff] }
 0x114   :  { %5257 = vst [vmem:[#allocation66_spill] sm:$0xff] %v3759_v52  ;;  %v5264_v20 = vunpack.c.h.bf16 %v5263_v25  ;;  %v5265_v40 = vunpack.c.l.bf16 %v5263_v25  ;;  %5267 = vst [vmem:[#allocation71_spill] sm:$0xff] %v3772_v4  ;;  %v3778_v38 = vmul.f32 %v2455_v11, %v3469_v50  ;;  %v5269_v6 = vld [vmem:[#allocation68_spill] sm:$0xff]  ;;  %v5270_v27 = vld [vmem:[#allocation57_spill] sm:$0xff]  ;;  %v457_v11 = vadd.f32 %v5279_v2, %v5278_v43 }
 0x115   :  { %v292_v32 = vadd.f32 %v5270_v27, %v5269_v6  ;;  %v5271_v18 = vld [vmem:[#allocation77_spill] sm:$0xff]  ;;  %v5273_v25 = vld [vmem:[#allocation86_spill] sm:$0xff]  ;;  %v5275_v46 = vld [vmem:[#allocation87_spill] sm:$0xff]  ;;  %v3807_v2 = vmul.f32 %v2808_v61, %v3708_v44 }
 0x116   :  { %v306_v33 = vadd.f32 %v5264_v20, %v290_v45  ;;  %v305_v42 = vadd.f32 %v5265_v40, %v289_v23  ;;  %5268 = vst [vmem:[#allocation67_spill] sm:$0xff] %v3778_v38  ;;  %v477_v45 = vadd.f32 %v5271_v18, %v451_v26  ;;  %v5272_v20 = vld [vmem:[#allocation75_spill] sm:$0xff]  ;;  %v5274_v40 = vld [vmem:[#allocation76_spill] sm:$0xff]  ;;  %v5276_v53 = vld [vmem:[#allocation70_spill] sm:$0xff]  ;;  %v476_v5 = vadd.f32 %v5271_v18, %v450_v31  ;;  %v3792_v38 = vpop.permute.xlu1 %637 }
 0x117   :  { %v455_v23 = vadd.f32 %v5273_v25, %v5272_v20  ;;  %v454_v52 = vadd.f32 %v5275_v46, %v5274_v40  ;;  %v5277_v17 = vld [vmem:[#allocation58_spill] sm:$0xff]  ;;  %v3798_v26 = vmul.f32 %v2829_v9, %v3708_v44  ;;  %v479_v6 = vadd.f32 %v5271_v18, %v453_v29  ;;  %v5281_v20 = vld [vmem:[#allocation81_spill] sm:$0xff]  ;;  %v5282_v25 = vld [vmem:[#allocation95_spill] sm:$0xff]  ;;  %5284 = vst [vmem:[#allocation78_spill] sm:$0xff] %v3807_v2 }
 0x118   :  { %v291_v4 = vadd.f32 %v5277_v17, %v5276_v53  ;;  %v478_v27 = vadd.f32 %v5271_v18, %v452_v3  ;;  %v456_v17 = vadd.f32 %v5282_v25, %v5281_v20  ;;  %v5283_v40 = vld [vmem:[#allocation116_spill] sm:$0xff]  ;;  %v3810_v43 = vadd.f32 %v5194_v1, %v306_v33  ;;  %v5287_v46 = vld [vmem:[#allocation117_spill] sm:$0xff] }
 0x119   :  { %5280 = vst [vmem:[#allocation72_spill] sm:$0xff] %v3798_v26  ;;  %1467 = vperm.xlu1 %2414, %v5283_v40   ;;  %v3813_v31 = vadd.f32 %v5194_v1, %v305_v42  ;;  %1462 = vperm.xlu0 %2413, %v5287_v46   ;;  %v2456_v3 = vld [vmem:[%s4949_s0 + $0x68] sm:$0xff]  ;;  %v2457_v53 = vld [vmem:[%s4949_s0 + $0x60] sm:$0xff]  ;;  %v493_v40 = vand.u32 2147483647, %v477_v45  ;;  %v481_v46 = vadd.f32 %v5271_v18, %v455_v23 }
 0x11a   :  { %5285 = vst [vmem:[#allocation74_spill] sm:$0xff] %v3810_v43  ;;  %v3820_v29 = vmul.f32 %v2456_v3, %v3469_v50  ;;  %v3826_v33 = vmul.f32 %v2457_v53, %v3469_v50  ;;  %v5290_v20 = vld [vmem:[#allocation60_spill] sm:$0xff]  ;;  %v480_v61 = vadd.f32 %v5271_v18, %v454_v52  ;;  %v492_v3 = vand.u32 2147483647, %v476_v5  ;;  %v3835_v26 = vpop.permute.xlu1 %647  ;;  %v5298_v23 = vld [vmem:[#allocation83_spill] sm:$0xff] }
 0x11b   :  { %5286 = vst [vmem:[#allocation79_spill] sm:$0xff] %v3813_v31  ;;  %v5291_v25 = vunpack.c.h.bf16 %v5290_v20  ;;  %v5292_v9 = vunpack.c.l.bf16 %v5290_v20  ;;  %v3837_v31 = vpop.permute.xlu0 %642  ;;  %v3840_v53 = vstv %s3739_s15  ;;  %v494_v43 = vand.u32 2147483647, %v478_v27  ;;  %v5294_v45 = vld [vmem:[#allocation120_spill] sm:$0xff]  ;;  %v2458_v27 = vld [vmem:[%s4949_s0 + $0x78] sm:$0xff] }
 0x11c   :  { %5288 = vst [vmem:[#allocation112_spill] sm:$0xff] %v3820_v29  ;;  %5289 = vst [vmem:[#allocation55_spill] sm:$0xff] %v3826_v33  ;;  %v483_v29 = vadd.f32 %v5271_v18, %v457_v11  ;;  %v495_v33 = vand.u32 2147483647, %v479_v6  ;;  %v3846_v52 = vmul.f32 %v2859_v35, %v3708_v44  ;;  %v5297_v5 = vld [vmem:[#allocation108_spill] sm:$0xff]  ;;  %v5299_v11 = vld [vmem:[#allocation109_spill] sm:$0xff]  ;;  %v3855_v6 = vmul.f32 %v2866_v37, %v3708_v44 }
 0x11d   :  { %v308_v42 = vadd.f32 %v5291_v25, %v292_v32  ;;  %v307_v2 = vadd.f32 %v5292_v9, %v291_v4  ;;  %5293 = vst [vmem:[#allocation113_spill] sm:$0xff] %v3840_v53  ;;  %v482_v32 = vadd.f32 %v5271_v18, %v456_v17  ;;  %1477 = vperm.xlu1 %2414, %v5294_v45   ;;  %v5296_v9 = vld [vmem:[#allocation82_spill] sm:$0xff]  ;;  %v5302_v25 = vld [vmem:[#allocation73_spill] sm:$0xff]  ;;  %v497_v35 = vand.u32 2147483647, %v481_v46 }
 0x11e   :  { %5295 = vst [vmem:[#allocation68_spill] sm:$0xff] %v3846_v52  ;;  %v459_v4 = vadd.f32 %v5297_v5, %v5296_v9  ;;  %v458_v20 = vadd.f32 %v5299_v11, %v5298_v23  ;;  %1472 = vperm.xlu0 %2413, %v3326_v58   ;;  %5300 = vst [vmem:[#allocation57_spill] sm:$0xff] %v3855_v6  ;;  %v3861_v17 = vmul.f32 %v2458_v27, %v3469_v50  ;;  %v2459_v5 = vld [vmem:[%s4949_s0 + $0x70] sm:$0xff]  ;;  %v3877_v6 = vpop.permute.xlu1 %657  ;;  %s3888_s0 = sld [smem:[#allocation9 + $0x105]] }
 0x11f   :  { %v510_v45 = vmul.f32 %v5302_v25, %v493_v40  ;;  %v496_v9 = vand.u32 2147483647, %v480_v61  ;;  %v3868_v58 = vmul.f32 %v2459_v5, %v3469_v50  ;;  %v3871_v23 = vadd.f32 %v5194_v1, %v308_v42  ;;  %v3879_v40 = vpop.permute.xlu0 %652  ;;  %v5372_v53 = vld [vmem:[#allocation161_spill] sm:$0xff] }
 0x120   :  { %5301 = vst [vmem:[#allocation77_spill] sm:$0xff] %v3861_v17  ;;  %v3874_v11 = vadd.f32 %v5194_v1, %v307_v2  ;;  %v509_v27 = vmul.f32 %v5302_v25, %v492_v3  ;;  %v499_v37 = vand.u32 2147483647, %v483_v29  ;;  %5304 = vst [vmem:[#allocation86_spill] sm:$0xff] %v3879_v40  ;;  %v512_v61 = vmul.f32 %v5302_v25, %v495_v33  ;;  %v5306_v29 = vld [vmem:[#allocation125_spill] sm:$0xff] }
 0x121   :  { %5303 = vst [vmem:[#allocation75_spill] sm:$0xff] %v3868_v58  ;;  %v511_v46 = vmul.f32 %v5302_v25, %v494_v43  ;;  %v498_v17 = vand.u32 2147483647, %v482_v32  ;;  %1637 = vperm.xlu1 %2414, %v3342_v16   ;;  %v3886_v50 = vmul.f32 %v2880_v49, %v3708_v44  ;;  %v485_v1 = vadd.f32 %v5271_v18, %v459_v4 }
 0x122   :  { %v484_v2 = vadd.f32 %v5271_v18, %v458_v20  ;;  %1632 = vperm.xlu0 %2413, %v5306_v29   ;;  %v3895_v33 = vmul.f32 %v2894_v56, %v3708_v44  ;;  %v3899_v43 = vmul.f32 %v2971_v28, %v3442_v62  ;;  %v3904_v16 = vadd.f32 %v510_v45, %v3612_v19  ;;  %v3916_v5 = vpop.permute.xlu1 %797  ;;  %v5314_v28 = vld [vmem:[#allocation84_spill] sm:$0xff]  ;;  %v5315_v56 = vld [vmem:[#allocation121_spill] sm:$0xff] }
 0x123   :  { %5305 = vst [vmem:[#allocation76_spill] sm:$0xff] %v3886_v50  ;;  %v514_v42 = vmul.f32 %v5302_v25, %v497_v35  ;;  %v513_v3 = vmul.f32 %v5302_v25, %v496_v9  ;;  %v3910_v32 = vmul.f32 %v2985_v24, %v3442_v62  ;;  %v3913_v4 = vadd.f32 %v509_v27, %v3581_v0  ;;  %v3918_v29 = vpop.permute.xlu0 %792  ;;  %v5312_v9 = vld [vmem:[#allocation128_spill] sm:$0xff] }
 0x124   :  { %5307 = vst [vmem:[#allocation87_spill] sm:$0xff] %v3895_v33  ;;  %5308 = vst [vmem:[#allocation70_spill] sm:$0xff] %v3899_v43  ;;  %v516_v20 = vmul.f32 %v5302_v25, %v499_v37  ;;  %v3922_v19 = vmul.f32 %v2993_v59, %v3442_v62  ;;  %v3926_v35 = vmul.f32 %v3009_v41, %v3442_v62  ;;  %v501_v59 = vand.u32 2147483647, %v485_v1  ;;  %v5316_v41 = vld [vmem:[#allocation130_spill] sm:$0xff]  ;;  %v5359_v33 = vld [vmem:[#allocation64_spill] sm:$0xff] }
 0x125   :  { %5309 = vst [vmem:[#allocation58_spill] sm:$0xff] %v3910_v32  ;;  %v3929_v45 = vadd.f32 %v512_v61, %v3609_v60  ;;  %v3932_v0 = vadd.f32 %v511_v46, %v3578_v63  ;;  %v515_v37 = vmul.f32 %v5302_v25, %v498_v17  ;;  %1647 = vperm.xlu1 %2414, %v5312_v9   ;;  %v500_v24 = vand.u32 2147483647, %v484_v2  ;;  %v5318_v61 = vld [vmem:[#allocation85_spill] sm:$0xff]  ;;  %v5319_v46 = vld [vmem:[#allocation122_spill] sm:$0xff]  ;;  %v5322_v2 = vld [vmem:[#allocation136_spill] sm:$0xff] }
 0x126   :  { %5310 = vst [vmem:[#allocation80_spill] sm:$0xff] %v3922_v19  ;;  %5311 = vst [vmem:[#allocation94_spill] sm:$0xff] %v3926_v35  ;;  %v3938_v27 = vmul.f32 %v2909_v13, %v3708_v44  ;;  %v461_v62 = vadd.f32 %v5315_v56, %v5314_v28  ;;  %1642 = vperm.xlu0 %2413, %v5316_v41   ;;  %v3945_v60 = vmul.f32 %v2928_v48, %v3708_v44  ;;  %v5321_v41 = vld [vmem:[#allocation88_spill] sm:$0xff]  ;;  %v5323_v48 = vld [vmem:[#allocation89_spill] sm:$0xff]  ;;  %v3968_v13 = vpop.permute.xlu1 %807 }
 0x127   :  { %v3950_v63 = vadd.f32 %v514_v42, %v3647_v22  ;;  %v3953_v17 = vadd.f32 %v513_v3, %v3659_v47  ;;  %v460_v1 = vadd.f32 %v5319_v46, %v5318_v61  ;;  %v3959_v28 = vmul.f32 %v2957_v8, %v3708_v44  ;;  %v5324_v22 = vld [vmem:[#allocation137_spill] sm:$0xff]  ;;  %v3970_v47 = vpop.permute.xlu0 %802  ;;  %v5326_v46 = vld [vmem:[#allocation92_spill] sm:$0xff]  ;;  %v5356_v32 = vld [vmem:[#allocation110_spill] sm:$0xff] }
 0x128   :  { %5313 = vst [vmem:[#allocation81_spill] sm:$0xff] %v3938_v27  ;;  %5317 = vst [vmem:[#allocation95_spill] sm:$0xff] %v3945_v60  ;;  %v3962_v56 = vadd.f32 %v516_v20, %v3681_v34  ;;  %v463_v9 = vadd.f32 %v5322_v2, %v5321_v41  ;;  %v462_v42 = vadd.f32 %v5324_v22, %v5323_v48  ;;  %v5327_v20 = vld [vmem:[#allocation93_spill] sm:$0xff]  ;;  %v5328_v2 = vld [vmem:[#allocation134_spill] sm:$0xff]  ;;  %v1516_v48 = vstv %s3888_s0 }
 0x129   :  { %5320 = vst [vmem:[#allocation116_spill] sm:$0xff] %v3959_v28  ;;  %v3974_v3 = vmul.f32 %v2969_v36, %v3708_v44  ;;  %v3977_v61 = vadd.f32 %v515_v37, %v3684_v54  ;;  %v661_v34 = vadd.f32 %v3522_v57, %v5326_v46  ;;  %v660_v41 = vadd.f32 %v3524_v21, %v5327_v20  ;;  %v5329_v36 = vld [vmem:[#allocation135_spill] sm:$0xff]  ;;  %v5331_v37 = vld [vmem:[#allocation97_spill] sm:$0xff]  ;;  %v5332_v46 = vld [vmem:[#allocation98_spill] sm:$0xff] }
 0x12a   :  { %1657 = vperm.xlu1 %2414, %v5328_v2   ;;  %v518_v22 = vmul.f32 %v5302_v25, %v501_v59  ;;  %v517_v8 = vmul.f32 %v5302_v25, %v500_v24  ;;  %v487_v49 = vadd.f32 %v5271_v18, %v461_v62  ;;  %1652 = vperm.xlu0 %2413, %v5329_v36   ;;  %v3990_v44 = vstv %s3901_s24  ;;  %v5333_v20 = vld [vmem:[#allocation101_spill] sm:$0xff]  ;;  %v5334_v62 = vld [vmem:[#allocation90_spill] sm:$0xff]  ;;  %v5348_v27 = vld [vmem:[#allocation127_spill] sm:$0xff] }
 0x12b   :  { %5325 = vst [vmem:[#allocation117_spill] sm:$0xff] %v3974_v3  ;;  %5330 = vst [vmem:[#allocation60_spill] sm:$0xff] %v3990_v44  ;;  %v486_v54 = vadd.f32 %v5271_v18, %v460_v1  ;;  %v663_v57 = vadd.f32 %v3587_v10, %v5331_v37  ;;  %v662_v21 = vadd.f32 %v3589_v7, %v5332_v46  ;;  %v5335_v3 = vld [vmem:[#allocation102_spill] sm:$0xff]  ;;  %v818_v44 = vpop.permute.xlu1 %817  ;;  %v4005_v28 = vpop.permute.xlu0 %812  ;;  %v5336_v10 = vld [vmem:[#allocation91_spill] sm:$0xff] }
 0x12c   :  { %v665_v2 = vadd.f32 %v3634_v39, %v5333_v20  ;;  %v489_v59 = vadd.f32 %v5271_v18, %v463_v9  ;;  %v488_v24 = vadd.f32 %v5271_v18, %v462_v42  ;;  %v465_v36 = vadd.f32 %v3460_v12, %v5334_v62  ;;  %v5337_v37 = vld [vmem:[#allocation96_spill] sm:$0xff]  ;;  %v5340_v42 = vld [vmem:[#allocation41_spill] sm:$0xff] }
 0x12d   :  { %v664_v1 = vadd.f32 %v3636_v15, %v5335_v3  ;;  %v464_v7 = vadd.f32 %v3462_v55, %v5336_v10  ;;  %v687_v46 = vadd.f32 %v5337_v37, %v661_v34  ;;  %v686_v39 = vadd.f32 %v5337_v37, %v660_v41  ;;  %v5338_v20 = vld [vmem:[#allocation140_spill] sm:$0xff]  ;;  %v5341_v62 = vld [vmem:[#allocation141_spill] sm:$0xff] }
 0x12e   :  { %1667 = vperm.xlu1 %2414, %v5338_v20   ;;  %v4013_v9 = vmul.f32 %v1516_v48, %v2787_v51  ;;  %v4016_v12 = vadd.f32 %v518_v22, %v3720_v30  ;;  %v4019_v15 = vadd.f32 %v517_v8, %v5340_v42  ;;  %v503_v3 = vand.u32 2147483647, %v487_v49  ;;  %1662 = vperm.xlu0 %2413, %v5341_v62   ;;  %v5342_v42 = vld [vmem:[#allocation126_spill] sm:$0xff]  ;;  %v5347_v60 = vld [vmem:[#allocation61_spill] sm:$0xff] }
 0x12f   :  { %v502_v55 = vand.u32 2147483647, %v486_v54  ;;  %v689_v34 = vadd.f32 %v5337_v37, %v663_v57  ;;  %v688_v41 = vadd.f32 %v5337_v37, %v662_v21  ;;  %v691_v10 = vadd.f32 %v5337_v37, %v665_v2  ;;  %v4030_v8 = vpop.permute.xlu1 %827  ;;  %v4032_v49 = vpop.permute.xlu0 %822  ;;  %v5343_v2 = vld [vmem:[#allocation144_spill] sm:$0xff]  ;;  %v5346_v62 = vld [vmem:[#allocation106_spill] sm:$0xff]  ;;  %v5354_v19 = vld [vmem:[#allocation149_spill] sm:$0xff] }
 0x130   :  { %5339 = vst [vmem:[#allocation120_spill] sm:$0xff] %v4013_v9  ;;  %v505_v20 = vand.u32 2147483647, %v489_v59  ;;  %v504_v51 = vand.u32 2147483647, %v488_v24  ;;  %v4027_v48 = vadd.f32 %v5271_v18, %v465_v36  ;;  %v690_v30 = vadd.f32 %v5337_v37, %v664_v1  ;;  %v5344_v24 = vld [vmem:[#allocation105_spill] sm:$0xff] }
 0x131   :  { %v4035_v22 = vadd.f32 %v5271_v18, %v464_v7  ;;  %v703_v54 = vand.u32 2147483647, %v687_v46  ;;  %v702_v57 = vand.u32 2147483647, %v686_v39  ;;  %v871_v21 = vadd.f32 %v3916_v5, %v5342_v42  ;;  %v5345_v36 = vld [vmem:[#allocation37_spill] sm:$0xff] }
 0x132   :  { %1487 = vperm.xlu1 %2414, %v5343_v2   ;;  %v4041_v59 = vmul.f32 %v5302_v25, %v503_v3  ;;  %v667_v1 = vadd.f32 %v5345_v36, %v5344_v24  ;;  %v666_v9 = vadd.f32 %v5347_v60, %v5346_v62  ;;  %v870_v18 = vadd.f32 %v3918_v29, %v5348_v27  ;;  %v5349_v7 = vld [vmem:[#allocation145_spill] sm:$0xff]  ;;  %v5353_v24 = vld [vmem:[#allocation131_spill] sm:$0xff] }
 0x133   :  { %1482 = vperm.xlu0 %2413, %v5349_v7   ;;  %v4051_v46 = vmul.f32 %v5302_v25, %v502_v55  ;;  %v705_v5 = vand.u32 2147483647, %v689_v34  ;;  %v704_v39 = vand.u32 2147483647, %v688_v41  ;;  %v707_v42 = vand.u32 2147483647, %v691_v10  ;;  %v4060_v36 = vpop.permute.xlu1 %837  ;;  %v4062_v29 = vpop.permute.xlu0 %832 }
 0x134   :  { %v4054_v3 = vmul.f32 %v5302_v25, %v505_v20  ;;  %v4057_v2 = vmul.f32 %v5302_v25, %v504_v51  ;;  %v706_v60 = vand.u32 2147483647, %v690_v30  ;;  %v5350_v55 = vld [vmem:[#allocation99_spill] sm:$0xff]  ;;  %v5351_v41 = vld [vmem:[#allocation129_spill] sm:$0xff]  ;;  %v5352_v20 = vld [vmem:[#allocation148_spill] sm:$0xff]  ;;  %v693_v51 = vadd.f32 %v5337_v37, %v667_v1 }
 0x135   :  { %v720_v62 = vmul.f32 %v5350_v55, %v703_v54  ;;  %v719_v34 = vmul.f32 %v5350_v55, %v702_v57  ;;  %v897_v10 = vadd.f32 %v5351_v41, %v871_v21  ;;  %v692_v7 = vadd.f32 %v5337_v37, %v666_v9  ;;  %v5355_v21 = vld [vmem:[#allocation132_spill] sm:$0xff]  ;;  %v5357_v9 = vld [vmem:[#allocation107_spill] sm:$0xff] }
 0x136   :  { %1497 = vperm.xlu1 %2414, %v5352_v20   ;;  %v896_v30 = vadd.f32 %v5351_v41, %v870_v18  ;;  %v873_v35 = vadd.f32 %v3968_v13, %v5353_v24  ;;  %v722_v27 = vmul.f32 %v5350_v55, %v705_v5  ;;  %v721_v54 = vmul.f32 %v5350_v55, %v704_v39  ;;  %v5358_v18 = vld [vmem:[#allocation111_spill] sm:$0xff]  ;;  %v5360_v13 = vld [vmem:[#allocation138_spill] sm:$0xff] }
 0x137   :  { %1492 = vperm.xlu0 %2413, %v5354_v19   ;;  %v724_v57 = vmul.f32 %v5350_v55, %v707_v42  ;;  %v872_v20 = vadd.f32 %v3970_v47, %v5355_v21  ;;  %v723_v1 = vmul.f32 %v5350_v55, %v706_v60  ;;  %v669_v43 = vadd.f32 %v5357_v9, %v5356_v32  ;;  %v4086_v19 = vpop.permute.xlu1 %847  ;;  %v4088_v5 = vpop.permute.xlu0 %842  ;;  %v5361_v47 = vld [vmem:[#allocation139_spill] sm:$0xff]  ;;  %v5362_v21 = vld [vmem:[#allocation152_spill] sm:$0xff] }
 0x138   :  { %v668_v50 = vadd.f32 %v5359_v33, %v5358_v18  ;;  %v875_v24 = vadd.f32 %v818_v44, %v5360_v13  ;;  %v736_v39 = vadd.f32 %v720_v62, %v3904_v16  ;;  %v735_v42 = vadd.f32 %v719_v34, %v3913_v4  ;;  %v5363_v44 = vld [vmem:[#allocation153_spill] sm:$0xff] }
 0x139   :  { %v913_v58 = vand.u32 2147483647, %v897_v10  ;;  %v874_v60 = vadd.f32 %v4005_v28, %v5361_v47  ;;  %v709_v32 = vand.u32 2147483647, %v693_v51  ;;  %v708_v9 = vand.u32 2147483647, %v692_v7 }
 0x13a   :  { %1677 = vperm.xlu1 %2414, %v5362_v21   ;;  %v912_v52 = vand.u32 2147483647, %v896_v30  ;;  %v899_v33 = vadd.f32 %v5351_v41, %v873_v35  ;;  %v738_v18 = vadd.f32 %v722_v27, %v3929_v45  ;;  %v737_v13 = vadd.f32 %v721_v54, %v3932_v0  ;;  %v5364_v27 = vld [vmem:[#allocation133_spill] sm:$0xff]  ;;  %v5365_v51 = vld [vmem:[#allocation154_spill] sm:$0xff]  ;;  %v5366_v30 = vld [vmem:[#allocation155_spill] sm:$0xff] }
 0x13b   :  { %1672 = vperm.xlu0 %2413, %v5363_v44   ;;  %v4100_v16 = vadd.f32 %v724_v57, %v3950_v63  ;;  %v898_v4 = vadd.f32 %v5351_v41, %v872_v20  ;;  %v4104_v28 = vadd.f32 %v723_v1, %v3953_v17  ;;  %v4107_v62 = vadd.f32 %v5337_v37, %v669_v43  ;;  %v1008_v10 = vpop.permute.xlu1 %1007  ;;  %v1003_v45 = vpop.permute.xlu0 %1002  ;;  %v5367_v17 = vld [vmem:[#allocation156_spill] sm:$0xff]  ;;  %v5368_v1 = vld [vmem:[#allocation157_spill] sm:$0xff] }
 0x13c   :  { %v4110_v34 = vadd.f32 %v5337_v37, %v668_v50  ;;  %v901_v35 = vadd.f32 %v5351_v41, %v875_v24  ;;  %v930_v0 = vmul.f32 %v5364_v27, %v913_v58  ;;  %v900_v63 = vadd.f32 %v5351_v41, %v874_v60  ;;  %v5369_v24 = vld [vmem:[#allocation142_spill] sm:$0xff] }
 0x13d   :  { %v1081_v7 = vadd.f32 %v1008_v10, %v5365_v51  ;;  %v1080_v54 = vadd.f32 %v1003_v45, %v5366_v30  ;;  %v4119_v43 = vmul.f32 %v5350_v55, %v709_v32  ;;  %v4122_v50 = vmul.f32 %v5350_v55, %v708_v9  ;;  %v5370_v60 = vld [vmem:[#allocation158_spill] sm:$0xff]  ;;  %v5371_v9 = vld [vmem:[#allocation143_spill] sm:$0xff]  ;;  %v5374_v10 = vld [vmem:[#allocation160_spill] sm:$0xff] }
 0x13e   :  { %1687 = vperm.xlu1 %2414, %v5367_v17   ;;  %v929_v57 = vmul.f32 %v5364_v27, %v912_v52  ;;  %v915_v20 = vand.u32 2147483647, %v899_v33  ;;  %v914_v58 = vand.u32 2147483647, %v898_v4  ;;  %v877_v47 = vadd.f32 %v4030_v8, %v5369_v24  ;;  %v5375_v32 = vld [vmem:[#allocation25_spill] sm:$0xff] }
 0x13f   :  { %1682 = vperm.xlu0 %2413, %v5368_v1   ;;  %v1107_v21 = vadd.f32 %v5370_v60, %v1081_v7  ;;  %v1106_v44 = vadd.f32 %v5370_v60, %v1080_v54  ;;  %v917_v45 = vand.u32 2147483647, %v901_v35  ;;  %v876_v51 = vadd.f32 %v4032_v49, %v5371_v9  ;;  %v1018_v52 = vpop.permute.xlu1 %1017  ;;  %v1013_v33 = vpop.permute.xlu0 %1012  ;;  %v5373_v54 = vld [vmem:[#allocation159_spill] sm:$0xff] }
 0x140   :  { %v946_v30 = vadd.f32 %v930_v0, %v736_v39  ;;  %v916_v17 = vand.u32 2147483647, %v900_v63  ;;  %v945_v8 = vadd.f32 %v929_v57, %v735_v42  ;;  %v932_v7 = vmul.f32 %v5364_v27, %v915_v20  ;;  %v5376_v9 = vld [vmem:[#allocation23_spill] sm:$0xff] }
 0x141   :  { %v1123_v4 = vand.u32 2147483647, %v1107_v21  ;;  %v1122_v1 = vand.u32 2147483647, %v1106_v44  ;;  %v1083_v24 = vadd.f32 %v1018_v52, %v5373_v54  ;;  %v1082_v40 = vadd.f32 %v1013_v33, %v5374_v10  ;;  %v5378_v52 = vld [vmem:[#allocation162_spill] sm:$0xff] }
 0x142   :  { %1847 = vperm.xlu1 %2414, %v5372_v53   ;;  %v931_v35 = vmul.f32 %v5364_v27, %v914_v58  ;;  %v903_v49 = vadd.f32 %v5351_v41, %v877_v47  ;;  %v934_v63 = vmul.f32 %v5364_v27, %v917_v45  ;;  %v902_v53 = vadd.f32 %v5351_v41, %v876_v51  ;;  %v5377_v47 = vld [vmem:[#allocation42_spill] sm:$0xff] }
 0x143   :  { %1842 = vperm.xlu0 %2413, %v5375_v32   ;;  %v1140_v39 = vmul.f32 %v5376_v9, %v1123_v4  ;;  %v1139_v0 = vmul.f32 %v5376_v9, %v1122_v1  ;;  %v1109_v42 = vadd.f32 %v5370_v60, %v1083_v24  ;;  %v1108_v57 = vadd.f32 %v5370_v60, %v1082_v40  ;;  %v1028_v20 = vpop.permute.xlu1 %1027  ;;  %v1023_v32 = vpop.permute.xlu0 %1022  ;;  %v5379_v33 = vld [vmem:[#allocation114_spill] sm:$0xff]  ;;  %v5380_v1 = vld [vmem:[#allocation17_spill] sm:$0xff]  ;;  %v5381_v40 = vld [vmem:[#allocation43_spill] sm:$0xff] }
 0x144   :  { %v933_v21 = vmul.f32 %v5364_v27, %v916_v17  ;;  %v1085_v10 = vadd.f32 %v1028_v20, %v5377_v47  ;;  %v671_v45 = vadd.f32 %v3792_v38, %v5379_v33  ;;  %v1084_v54 = vadd.f32 %v1023_v32, %v5380_v1  ;;  %v5382_v32 = vld [vmem:[#allocation18_spill] sm:$0xff] }
 0x145   :  { %v4148_v44 = vadd.f32 %v1140_v39, %v946_v30  ;;  %v4150_v58 = vadd.f32 %v1139_v0, %v945_v8  ;;  %v1125_v51 = vand.u32 2147483647, %v1109_v42  ;;  %v1124_v4 = vand.u32 2147483647, %v1108_v57 }
 0x146   :  { %1857 = vperm.xlu1 %2414, %v5378_v52   ;;  %v948_v24 = vadd.f32 %v932_v7, %v738_v18  ;;  %v947_v17 = vadd.f32 %v931_v35, %v737_v13  ;;  %v919_v30 = vand.u32 2147483647, %v903_v49  ;;  %v1111_v8 = vadd.f32 %v5370_v60, %v1085_v10  ;;  %v5383_v13 = vld [vmem:[#allocation164_spill] sm:$0xff] }
 0x147   :  { %1852 = vperm.xlu0 %2413, %v5381_v40   ;;  %v918_v39 = vand.u32 2147483647, %v902_v53  ;;  %v1142_v0 = vmul.f32 %v5376_v9, %v1125_v51  ;;  %v1141_v20 = vmul.f32 %v5376_v9, %v1124_v4  ;;  %v1110_v47 = vadd.f32 %v5370_v60, %v1084_v54  ;;  %v1038_v52 = vpop.permute.xlu1 %1037  ;;  %v1033_v18 = vpop.permute.xlu0 %1032  ;;  %v5384_v53 = vld [vmem:[#allocation163_spill] sm:$0xff]  ;;  %v5385_v51 = vld [vmem:[#allocation165_spill] sm:$0xff] }
 0x148   :  { %v950_v38 = vadd.f32 %v934_v63, %v4100_v16  ;;  %v949_v42 = vadd.f32 %v933_v21, %v4104_v28  ;;  %v1127_v57 = vand.u32 2147483647, %v1111_v8  ;;  %v1087_v33 = vadd.f32 %v1038_v52, %v5382_v32  ;;  %v5386_v16 = vld [vmem:[#allocation146_spill] sm:$0xff]  ;;  %v5387_v54 = vld [vmem:[#allocation147_spill] sm:$0xff] }
 0x149   :  { %v4166_v7 = vadd.f32 %v1142_v0, %v948_v24  ;;  %v4168_v35 = vadd.f32 %v1141_v20, %v947_v17  ;;  %v1126_v49 = vand.u32 2147483647, %v1110_v47  ;;  %v1086_v10 = vadd.f32 %v1033_v18, %v5384_v53  ;;  %v5388_v0 = vld [vmem:[#allocation115_spill] sm:$0xff]  ;;  %v5390_v18 = vld [vmem:[#allocation49_spill] sm:$0xff] }
 0x14a   :  { %1867 = vperm.xlu1 %2414, %v5383_v13   ;;  %v936_v4 = vmul.f32 %v5364_v27, %v919_v30  ;;  %v879_v28 = vadd.f32 %v4060_v36, %v5386_v16  ;;  %v1144_v63 = vmul.f32 %v5376_v9, %v1127_v57  ;;  %v1113_v21 = vadd.f32 %v5370_v60, %v1087_v33 }
 0x14b   :  { %1862 = vperm.xlu0 %2413, %v5385_v51   ;;  %v935_v1 = vmul.f32 %v5364_v27, %v918_v39  ;;  %v878_v40 = vadd.f32 %v4062_v29, %v5387_v54  ;;  %v1143_v24 = vmul.f32 %v5376_v9, %v1126_v49  ;;  %v1112_v17 = vadd.f32 %v5370_v60, %v1086_v10  ;;  %v4182_v8 = vpop.permute.xlu1 %857  ;;  %v4190_v52 = vpop.permute.xlu0 %852  ;;  %v5389_v39 = vld [vmem:[#allocation19_spill] sm:$0xff] }
 0x14c   :  { %v742_v30 = vadd.f32 %v4119_v43, %v3962_v56  ;;  %v670_v36 = vadd.f32 %v3794_v14, %v5388_v0  ;;  %v4188_v20 = vadd.f32 %v1144_v63, %v950_v38  ;;  %v1129_v47 = vand.u32 2147483647, %v1113_v21  ;;  %v5391_v43 = vld [vmem:[#allocation150_spill] sm:$0xff]  ;;  %v5392_v10 = vld [vmem:[#allocation151_spill] sm:$0xff]  ;;  %v5395_v21 = vld [vmem:[#allocation100_spill] sm:$0xff] }
 0x14d   :  { %v741_v29 = vadd.f32 %v4122_v50, %v3977_v61  ;;  %v697_v57 = vadd.f32 %v5337_v37, %v671_v45  ;;  %v4196_v32 = vadd.f32 %v1143_v24, %v949_v42  ;;  %v1128_v33 = vand.u32 2147483647, %v1112_v17  ;;  %v5393_v42 = vld [vmem:[#allocation69_spill] sm:$0xff]  ;;  %v5399_v17 = vld [vmem:[#allocation74_spill] sm:$0xff] }
 0x14e   :  { %1877 = vperm.xlu1 %2414, %v5389_v39   ;;  %v952_v56 = vadd.f32 %v936_v4, %v742_v30  ;;  %v905_v14 = vadd.f32 %v5351_v41, %v879_v28  ;;  %v881_v38 = vadd.f32 %v4086_v19, %v5391_v43  ;;  %v1146_v13 = vmul.f32 %v5376_v9, %v1129_v47  ;;  %v5401_v39 = vld [vmem:[#allocation79_spill] sm:$0xff]  ;;  %v5404_v43 = vld [vmem:[#allocation26_spill] sm:$0xff] }
 0x14f   :  { %1872 = vperm.xlu0 %2413, %v5390_v18   ;;  %v951_v49 = vadd.f32 %v935_v1, %v741_v29  ;;  %v904_v53 = vadd.f32 %v5351_v41, %v878_v40  ;;  %v880_v61 = vadd.f32 %v4088_v5, %v5392_v10  ;;  %v1145_v50 = vmul.f32 %v5376_v9, %v1128_v33  ;;  %v4207_v45 = vpop.permute.xlu1 %867  ;;  %v4217_v63 = vpop.permute.xlu0 %862  ;;  %v5396_v5 = vld [vmem:[#allocation66_spill] sm:$0xff] }
 0x150   :  { %v536_v51 = vadd.f32 %v4041_v59, %v5393_v42  ;;  %v5394_v4 = vand.u32 2147483647, %v4027_v48  ;;  %v696_v19 = vadd.f32 %v5337_v37, %v670_v36  ;;  %v4215_v28 = vadd.f32 %v1146_v13, %v952_v56  ;;  %v5398_v48 = vld [vmem:[#allocation51_spill] sm:$0xff]  ;;  %v5403_v56 = vld [vmem:[#allocation118_spill] sm:$0xff] }
 0x151   :  { %v535_v1 = vadd.f32 %v4051_v46, %v5396_v5  ;;  %v5397_v54 = vand.u32 2147483647, %v4035_v22  ;;  %v713_v59 = vand.u32 2147483647, %v697_v57  ;;  %v4225_v24 = vadd.f32 %v1145_v50, %v951_v49  ;;  %v5408_v50 = vld [vmem:[#allocation34_spill] sm:$0xff] }
 0x152   :  { %v524_v16 = vmul.f32 %v5302_v25, %v5394_v4  ;;  %1697 = vperm.xlu1 %2414, %v5395_v21   ;;  %v4230_v30 = vadd.f32 %v4054_v3, %v5399_v17  ;;  %v5400_v0 = vand.u32 2147483647, %v4107_v62  ;;  %v921_v47 = vand.u32 2147483647, %v905_v14 }
 0x153   :  { %v523_v40 = vmul.f32 %v5302_v25, %v5397_v54  ;;  %1692 = vperm.xlu0 %2413, %v5398_v48   ;;  %v907_v46 = vadd.f32 %v5351_v41, %v881_v38  ;;  %v4238_v22 = vadd.f32 %v4057_v2, %v5401_v39  ;;  %v5402_v25 = vand.u32 2147483647, %v4110_v34  ;;  %v1048_v3 = vpop.permute.xlu1 %1047  ;;  %v1043_v13 = vpop.permute.xlu0 %1042  ;;  %v5405_v2 = vld [vmem:[#allocation27_spill] sm:$0xff] }
 0x154   :  { %v728_v36 = vmul.f32 %v5350_v55, %v5400_v0  ;;  %v920_v57 = vand.u32 2147483647, %v904_v53  ;;  %v906_v33 = vadd.f32 %v5351_v41, %v880_v61  ;;  %v4245_v18 = vadd.f32 %v524_v16, %v3871_v23  ;;  %v5406_v53 = vld [vmem:[#allocation119_spill] sm:$0xff]  ;;  %v5407_v61 = vld [vmem:[#allocation54_spill] sm:$0xff]  ;;  %v5410_v0 = vld [vmem:[#allocation104_spill] sm:$0xff] }
 0x155   :  { %v727_v29 = vmul.f32 %v5350_v55, %v5402_v25  ;;  %v712_v62 = vand.u32 2147483647, %v696_v19  ;;  %v673_v14 = vadd.f32 %v3835_v26, %v5403_v56  ;;  %v1089_v38 = vadd.f32 %v1048_v3, %v5404_v43  ;;  %v5409_v48 = vld [vmem:[#allocation63_spill] sm:$0xff]  ;;  %v5412_v25 = vld [vmem:[#allocation48_spill] sm:$0xff] }
 0x156   :  { %1707 = vperm.xlu1 %2414, %v5405_v2   ;;  %v4252_v34 = vadd.f32 %v523_v40, %v3874_v11  ;;  %v730_v49 = vmul.f32 %v5350_v55, %v713_v59  ;;  %v672_v10 = vadd.f32 %v3837_v31, %v5406_v53  ;;  %v1088_v23 = vadd.f32 %v1043_v13, %v5407_v61  ;;  %v5414_v61 = vld [vmem:[#allocation46_spill] sm:$0xff] }
 0x157   :  { %1702 = vperm.xlu0 %2413, %v5408_v50   ;;  %v744_v42 = vadd.f32 %v728_v36, %v4016_v12  ;;  %v938_v26 = vmul.f32 %v5364_v27, %v921_v47  ;;  %v923_v4 = vand.u32 2147483647, %v907_v46  ;;  %v1115_v16 = vadd.f32 %v5370_v60, %v1089_v38  ;;  %v1058_v54 = vpop.permute.xlu1 %1057  ;;  %v1053_v17 = vpop.permute.xlu0 %1052  ;;  %v5411_v46 = vld [vmem:[#allocation35_spill] sm:$0xff] }
 0x158   :  { %v743_v19 = vadd.f32 %v727_v29, %v4019_v15  ;;  %v937_v11 = vmul.f32 %v5364_v27, %v920_v57  ;;  %v922_v21 = vand.u32 2147483647, %v906_v33  ;;  %v1114_v5 = vadd.f32 %v5370_v60, %v1088_v23  ;;  %v5415_v23 = vld [vmem:[#allocation123_spill] sm:$0xff] }
 0x159   :  { %v729_v31 = vmul.f32 %v5350_v55, %v712_v62  ;;  %v699_v40 = vadd.f32 %v5337_v37, %v673_v14  ;;  %v1131_v59 = vand.u32 2147483647, %v1115_v16  ;;  %v1091_v12 = vadd.f32 %v1058_v54, %v5409_v48 }
 0x15a   :  { %1887 = vperm.xlu1 %2414, %v5410_v0   ;;  %v746_v36 = vadd.f32 %v730_v49, %v536_v51  ;;  %v698_v47 = vadd.f32 %v5337_v37, %v672_v10  ;;  %v1130_v15 = vand.u32 2147483647, %v1114_v5  ;;  %v1090_v39 = vadd.f32 %v1053_v17, %v5411_v46  ;;  %v5413_v49 = vld [vmem:[#allocation45_spill] sm:$0xff] }
 0x15b   :  { %1882 = vperm.xlu0 %2413, %v5412_v25   ;;  %v954_v29 = vadd.f32 %v938_v26, %v744_v42  ;;  %v940_v57 = vmul.f32 %v5364_v27, %v923_v4  ;;  %v1148_v33 = vmul.f32 %v5376_v9, %v1131_v59  ;;  %v1117_v3 = vadd.f32 %v5370_v60, %v1091_v12  ;;  %v1218_v43 = vpop.permute.xlu1 %1217  ;;  %v1213_v10 = vpop.permute.xlu0 %1212  ;;  %v5416_v4 = vld [vmem:[#allocation65_spill] sm:$0xff]  ;;  %v5421_v25 = vld [vmem:[#allocation72_spill] sm:$0xff] }
 0x15c   :  { %v953_v62 = vadd.f32 %v937_v11, %v743_v19  ;;  %v939_v56 = vmul.f32 %v5364_v27, %v922_v21  ;;  %v1147_v14 = vmul.f32 %v5376_v9, %v1130_v15  ;;  %v1116_v51 = vadd.f32 %v5370_v60, %v1090_v39  ;;  %v5417_v19 = vld [vmem:[#allocation67_spill] sm:$0xff]  ;;  %v5418_v11 = vld [vmem:[#allocation124_spill] sm:$0xff] }
 0x15d   :  { %v745_v38 = vadd.f32 %v729_v31, %v535_v1  ;;  %v4278_v13 = vadd.f32 %v1148_v33, %v954_v29  ;;  %v1133_v2 = vand.u32 2147483647, %v1117_v3  ;;  %v1291_v53 = vadd.f32 %v1218_v43, %v5413_v49  ;;  %v5419_v1 = vld [vmem:[#allocation86_spill] sm:$0xff]  ;;  %v5420_v31 = vld [vmem:[#allocation71_spill] sm:$0xff]  ;;  %v5422_v3 = vld [vmem:[#allocation112_spill] sm:$0xff] }
 0x15e   :  { %1897 = vperm.xlu1 %2414, %v5414_v61   ;;  %v675_v50 = vadd.f32 %v3877_v6, %v5415_v23  ;;  %v4284_v42 = vadd.f32 %v1147_v14, %v953_v62  ;;  %v1132_v26 = vand.u32 2147483647, %v1116_v51  ;;  %v1290_v16 = vadd.f32 %v1213_v10, %v5416_v4  ;;  %v5425_v51 = vld [vmem:[#allocation55_spill] sm:$0xff] }
 0x15f   :  { %1892 = vperm.xlu0 %2413, %v5417_v19   ;;  %v674_v21 = vadd.f32 %v5419_v1, %v5418_v11  ;;  %v956_v5 = vadd.f32 %v940_v57, %v746_v36  ;;  %v1150_v54 = vmul.f32 %v5376_v9, %v1133_v2  ;;  %v1317_v59 = vadd.f32 %v5420_v31, %v1291_v53  ;;  %v1228_v0 = vpop.permute.xlu1 %1227  ;;  %v1223_v33 = vpop.permute.xlu0 %1222  ;;  %v5423_v36 = vld [vmem:[#allocation38_spill] sm:$0xff]  ;;  %v5429_v1 = vld [vmem:[#allocation77_spill] sm:$0xff] }
 0x160   :  { %v715_v48 = vand.u32 2147483647, %v699_v40  ;;  %v955_v12 = vadd.f32 %v939_v56, %v745_v38  ;;  %v1149_v17 = vmul.f32 %v5376_v9, %v1132_v26  ;;  %v1316_v6 = vadd.f32 %v5420_v31, %v1290_v16  ;;  %v5424_v56 = vld [vmem:[#allocation78_spill] sm:$0xff]  ;;  %v5426_v38 = vld [vmem:[#allocation113_spill] sm:$0xff]  ;;  %v5428_v16 = vld [vmem:[#allocation68_spill] sm:$0xff] }
 0x161   :  { %v714_v15 = vand.u32 2147483647, %v698_v47  ;;  %v4294_v46 = vadd.f32 %v1150_v54, %v956_v5  ;;  %v1333_v39 = vand.u32 2147483647, %v1317_v59  ;;  %v1293_v29 = vadd.f32 %v1228_v0, %v5421_v25  ;;  %v5430_v54 = vld [vmem:[#allocation57_spill] sm:$0xff] }
 0x162   :  { %1907 = vperm.xlu1 %2414, %v5422_v3   ;;  %v883_v57 = vadd.f32 %v4182_v8, %v5423_v36  ;;  %v4300_v62 = vadd.f32 %v1149_v17, %v955_v12  ;;  %v1332_v40 = vand.u32 2147483647, %v1316_v6  ;;  %v1292_v14 = vadd.f32 %v1223_v33, %v5424_v56  ;;  %v5427_v8 = vld [vmem:[#allocation47_spill] sm:$0xff] }
 0x163   :  { %1902 = vperm.xlu0 %2413, %v5425_v51   ;;  %v4305_v47 = vadd.f32 %v5337_v37, %v675_v50  ;;  %v4308_v43 = vadd.f32 %v5337_v37, %v674_v21  ;;  %v1350_v2 = vmul.f32 %v5426_v38, %v1333_v39  ;;  %v1319_v49 = vadd.f32 %v5420_v31, %v1293_v29  ;;  %v1238_v26 = vpop.permute.xlu1 %1237  ;;  %v1233_v11 = vpop.permute.xlu0 %1232  ;;  %v5433_v39 = vld [vmem:[#allocation32_spill] sm:$0xff] }
 0x164   :  { %v732_v53 = vmul.f32 %v5350_v55, %v715_v48  ;;  %v882_v10 = vadd.f32 %v4190_v52, %v5427_v8  ;;  %v1349_v61 = vmul.f32 %v5426_v38, %v1332_v40  ;;  %v1318_v23 = vadd.f32 %v5420_v31, %v1292_v14  ;;  %v5431_v48 = vld [vmem:[#allocation75_spill] sm:$0xff]  ;;  %v5434_v40 = vld [vmem:[#allocation76_spill] sm:$0xff] }
 0x165   :  { %v731_v50 = vmul.f32 %v5350_v55, %v714_v15  ;;  %v4319_v4 = vadd.f32 %v1350_v2, %v4148_v44  ;;  %v1335_v37 = vand.u32 2147483647, %v1319_v49  ;;  %v1295_v19 = vadd.f32 %v1238_v26, %v5428_v16  ;;  %v5432_v44 = vld [vmem:[#allocation20_spill] sm:$0xff] }
 0x166   :  { %1917 = vperm.xlu1 %2414, %v5429_v1   ;;  %v909_v21 = vadd.f32 %v5351_v41, %v883_v57  ;;  %v4325_v52 = vadd.f32 %v1349_v61, %v4150_v58  ;;  %v1334_v5 = vand.u32 2147483647, %v1318_v23  ;;  %v1294_v59 = vadd.f32 %v1233_v11, %v5430_v54  ;;  %v4337_v15 = vld [vmem:[%s4956_s7] sm:$0xff]  ;;  %v5436_v1 = vld [vmem:[#allocation70_spill] sm:$0xff]  ;;  %s2262_s7 = sld [smem:[#allocation9 + $0x205]] }
 0x167   :  { %1912 = vperm.xlu0 %2413, %v5431_v48   ;;  %v717_v12 = vand.u32 2147483647, %v4305_v47  ;;  %v885_v17 = vadd.f32 %v4207_v45, %v5432_v44  ;;  %v1352_v6 = vmul.f32 %v5426_v38, %v1335_v37  ;;  %v1321_v0 = vadd.f32 %v5420_v31, %v1295_v19  ;;  %v1248_v3 = vpop.permute.xlu1 %1247  ;;  %v1243_v14 = vpop.permute.xlu0 %1242  ;;  %v5437_v48 = vld [vmem:[#allocation58_spill] sm:$0xff] }
 0x168   :  { %v908_v58 = vadd.f32 %v5351_v41, %v882_v10  ;;  %v884_v25 = vadd.f32 %v4217_v63, %v5433_v39  ;;  %v1351_v29 = vmul.f32 %v5426_v38, %v1334_v5  ;;  %v1320_v33 = vadd.f32 %v5420_v31, %v1294_v59  ;;  %v5435_v63 = vld [vmem:[#allocation87_spill] sm:$0xff] }
 0x169   :  { %v716_v45 = vand.u32 2147483647, %v4308_v43  ;;  %v4346_v36 = vadd.f32 %v1352_v6, %v4166_v7  ;;  %v1337_v57 = vand.u32 2147483647, %v1321_v0  ;;  %v1297_v56 = vadd.f32 %v1248_v3, %v5434_v40 }
 0x16a   :  { %v925_v51 = vand.u32 2147483647, %v909_v21  ;;  %v4350_v47 = vadd.f32 %v1351_v29, %v4168_v35  ;;  %v1336_v2 = vand.u32 2147483647, %v1320_v33  ;;  %v1296_v49 = vadd.f32 %v1243_v14, %v5435_v63  ;;  %v5438_v29 = vld [vmem:[#allocation80_spill] sm:$0xff]  ;;  %v5439_v14 = vld [vmem:[#allocation94_spill] sm:$0xff] }
 0x16b   :  { %2198 = vperm.xlu0 %2413, %v4337_v15   ;;  %v911_v8 = vadd.f32 %v5351_v41, %v885_v17  ;;  %v1354_v43 = vmul.f32 %v5426_v38, %v1337_v57  ;;  %v1323_v7 = vadd.f32 %v5420_v31, %v1297_v56  ;;  %v924_v10 = vand.u32 2147483647, %v908_v58  ;;  %v1068_v35 = vpop.permute.xlu1 %1067  ;;  %v1063_v5 = vpop.permute.xlu0 %1062 }
 0x16c   :  { %v910_v61 = vadd.f32 %v5351_v41, %v884_v25  ;;  %v1353_v23 = vmul.f32 %v5426_v38, %v1336_v2  ;;  %v1322_v26 = vadd.f32 %v5420_v31, %v1296_v49  ;;  %v2537_v37 = vmov -3e+38  }
 0x16d   :  { %71 = vst [vmem:[#allocation2] sm:$0x1] %v2537_v37  ;;  %v748_v16 = vadd.f32 %v732_v53, %v4230_v30  ;;  %v4362_v19 = vadd.f32 %v1354_v43, %v4188_v20  ;;  %v1339_v11 = vand.u32 2147483647, %v1323_v7  ;;  %v1093_v21 = vadd.f32 %v1068_v35, %v5436_v1 }
 0x16e   :  { %v747_v54 = vadd.f32 %v731_v50, %v4238_v22  ;;  %v4367_v41 = vadd.f32 %v1353_v23, %v4196_v32  ;;  %v1338_v59 = vand.u32 2147483647, %v1322_v26  ;;  %v1092_v44 = vadd.f32 %v1063_v5, %v5437_v48  ;;  %v5442_v5 = vld [vmem:[#allocation120_spill] sm:$0xff] }
 0x16f   :  { %v942_v17 = vmul.f32 %v5364_v27, %v925_v51  ;;  %v927_v6 = vand.u32 2147483647, %v911_v8  ;;  %v1356_v30 = vmul.f32 %v5426_v38, %v1339_v11  ;;  %v1119_v20 = vadd.f32 %v5370_v60, %v1093_v21  ;;  %v1078_v50 = vpop.permute.xlu1 %1077  ;;  %v1073_v3 = vpop.permute.xlu0 %1072 }
 0x170   :  { %v941_v53 = vmul.f32 %v5364_v27, %v924_v10  ;;  %v926_v0 = vand.u32 2147483647, %v910_v61  ;;  %v1355_v58 = vmul.f32 %v5426_v38, %v1338_v59  ;;  %v1118_v22 = vadd.f32 %v5370_v60, %v1092_v44  ;;  %v5440_v61 = vld [vmem:[#allocation81_spill] sm:$0xff] }
 0x171   :  { %v734_v32 = vmul.f32 %v5350_v55, %v717_v12  ;;  %v4378_v39 = vadd.f32 %v1356_v30, %v4215_v28  ;;  %v1135_v25 = vand.u32 2147483647, %v1119_v20  ;;  %v1095_v33 = vadd.f32 %v1078_v50, %v5438_v29  ;;  %v5444_v30 = vld [vmem:[#allocation116_spill] sm:$0xff] }
 0x172   :  { %v733_v57 = vmul.f32 %v5350_v55, %v716_v45  ;;  %v4383_v40 = vadd.f32 %v1355_v58, %v4225_v24  ;;  %v1134_v56 = vand.u32 2147483647, %v1118_v22  ;;  %v1094_v51 = vadd.f32 %v1073_v3, %v5439_v14  ;;  %v5446_v58 = vld [vmem:[#allocation30_spill] sm:$0xff] }
 0x173   :  { %v958_v2 = vadd.f32 %v942_v17, %v748_v16  ;;  %v944_v63 = vmul.f32 %v5364_v27, %v927_v6  ;;  %v1152_v12 = vmul.f32 %v5376_v9, %v1135_v25  ;;  %v1121_v28 = vadd.f32 %v5370_v60, %v1095_v33  ;;  %v1258_v24 = vpop.permute.xlu1 %1257  ;;  %v1253_v26 = vpop.permute.xlu0 %1252  ;;  %v5447_v25 = vld [vmem:[#allocation117_spill] sm:$0xff] }
 0x174   :  { %v957_v49 = vadd.f32 %v941_v53, %v747_v54  ;;  %v943_v8 = vmul.f32 %v5364_v27, %v926_v0  ;;  %v1151_v43 = vmul.f32 %v5376_v9, %v1134_v56  ;;  %v1120_v55 = vadd.f32 %v5370_v60, %v1094_v51  ;;  %v5441_v27 = vld [vmem:[#allocation95_spill] sm:$0xff]  ;;  %v5445_v0 = vld [vmem:[#allocation60_spill] sm:$0xff]  ;;  %v5449_v56 = vld [vmem:[#allocation29_spill] sm:$0xff] }
 0x175   :  { %v750_v45 = vadd.f32 %v734_v32, %v4245_v18  ;;  %v4393_v7 = vadd.f32 %v1152_v12, %v958_v2  ;;  %v1137_v10 = vand.u32 2147483647, %v1121_v28  ;;  %v1299_v23 = vadd.f32 %v1258_v24, %v5440_v61  ;;  %v5451_v61 = vld [vmem:[#allocation22_spill] sm:$0xff] }
 0x176   :  { %v749_v35 = vadd.f32 %v733_v57, %v4252_v34  ;;  %v4397_v37 = vadd.f32 %v1151_v43, %v957_v49  ;;  %v1136_v16 = vand.u32 2147483647, %v1120_v55  ;;  %v1298_v11 = vadd.f32 %v1253_v26, %v5441_v27  ;;  %v5450_v43 = vld [vmem:[#allocation28_spill] sm:$0xff] }
 0x177   :  { %v960_v1 = vadd.f32 %v944_v63, %v750_v45  ;;  %v1154_v21 = vmul.f32 %v5376_v9, %v1137_v10  ;;  %v1325_v60 = vadd.f32 %v5420_v31, %v1299_v23  ;;  %v5443_v18 = vstv %s3947_s25  ;;  %v1268_v17 = vpop.permute.xlu1 %1267  ;;  %v1263_v53 = vpop.permute.xlu0 %1262 }
 0x178   :  { %v1519_v54 = vadd.f32 %v5443_v18, %v5442_v5  ;;  %v959_v59 = vadd.f32 %v943_v8, %v749_v35  ;;  %v1153_v48 = vmul.f32 %v5376_v9, %v1136_v16  ;;  %v1324_v44 = vadd.f32 %v5420_v31, %v1298_v11  ;;  %v5448_v9 = vld [vmem:[#allocation24_spill] sm:$0xff]  ;;  %v5453_v5 = vld [vmem:[#allocation31_spill] sm:$0xff] }
 0x179   :  { %v4407_v34 = vadd.f32 %v1154_v21, %v960_v1  ;;  %v1341_v6 = vand.u32 2147483647, %v1325_v60  ;;  %v1301_v20 = vadd.f32 %v1268_v17, %v5444_v30  ;;  %v1388_v22 = vmul.f32 %v5446_v58, %v5445_v0 }
 0x17a   :  { %v4412_v50 = vadd.f32 %v1153_v48, %v959_v59  ;;  %v1340_v32 = vand.u32 2147483647, %v1324_v44  ;;  %v1300_v29 = vadd.f32 %v1263_v53, %v5447_v25  ;;  %v1387_v33 = vmul.f32 %v5448_v9, %v5445_v0  ;;  %v5454_v44 = vld [vmem:[#allocation33_spill] sm:$0xff] }
 0x17b   :  { %v1358_v3 = vmul.f32 %v5426_v38, %v1341_v6  ;;  %v1327_v57 = vadd.f32 %v5420_v31, %v1301_v20  ;;  %v4420_v14 = vrot.slane %v1519_v54, %v5449_v56  ;;  %v1428_v63 = vpop.permute.xlu1 %1427  ;;  %v1423_v8 = vpop.permute.xlu0 %1422  ;;  %v1390_v55 = vmul.f32 %v5450_v43, %v5445_v0 }
 0x17c   :  { %v1357_v51 = vmul.f32 %v5426_v38, %v1340_v32  ;;  %v1326_v2 = vadd.f32 %v5420_v31, %v1300_v29  ;;  %v1501_v49 = vadd.f32 %v1428_v63, %v1388_v22  ;;  %v1500_v10 = vadd.f32 %v1423_v8, %v1387_v33  ;;  %v5455_v22 = vld [vmem:[#allocation36_spill] sm:$0xff] }
 0x17d   :  { %v4425_v12 = vadd.f32 %v1358_v3, %v4278_v13  ;;  %v1343_v28 = vand.u32 2147483647, %v1327_v57  ;;  %v1389_v23 = vmul.f32 %v5451_v61, %v5445_v0  ;;  %v4437_v16 = vstv %s2262_s7  ;;  %v5456_v3 = vld [vmem:[#allocation39_spill] sm:$0xff] }
 0x17e   :  { %v4430_v24 = vadd.f32 %v1357_v51, %v4284_v42  ;;  %v1342_v45 = vand.u32 2147483647, %v1326_v2  ;;  %v1527_v35 = vadd.f32 %v4420_v14, %v1501_v49  ;;  %5452 = vst [vmem:[#allocation82_spill] sm:$0xff] %v4437_v16  ;;  %v1526_v27 = vadd.f32 %v4420_v14, %v1500_v10 }
 0x17f   :  { %v1360_v26 = vmul.f32 %v5426_v38, %v1343_v28  ;;  %v1438_v11 = vpop.permute.xlu1 %1437  ;;  %v1433_v60 = vpop.permute.xlu0 %1432  ;;  %v1392_v18 = vmul.f32 %v5453_v5, %v5445_v0  ;;  %v1391_v17 = vmul.f32 %v5454_v44, %v5445_v0  ;;  %v1394_v32 = vmul.f32 %v5455_v22, %v5445_v0 }
 0x180   :  { %v1359_v13 = vmul.f32 %v5426_v38, %v1342_v45  ;;  %v1543_v42 = vand.u32 2147483647, %v1527_v35  ;;  %v1503_v21 = vadd.f32 %v1438_v11, %v1390_v55  ;;  %v1542_v59 = vand.u32 2147483647, %v1526_v27  ;;  %v5457_v35 = vld [vmem:[#allocation103_spill] sm:$0xff] }
 0x181   :  { %v4441_v1 = vadd.f32 %v1360_v26, %v4294_v46  ;;  %v1502_v48 = vadd.f32 %v1433_v60, %v1389_v23  ;;  %v1393_v57 = vmul.f32 %v5456_v3, %v5445_v0  ;;  %v5023_v8 = vmov 0.0   ;;  %v5459_v60 = vld [vmem:[#allocation56_spill] sm:$0xff] }
 0x182   :  { %v4446_v54 = vadd.f32 %v1359_v13, %v4300_v62  ;;  %v1560_v6 = vmul.f32 %v4437_v16, %v1543_v42  ;;  %v1529_v30 = vadd.f32 %v4420_v14, %v1503_v21  ;;  %v1559_v46 = vmul.f32 %v4437_v16, %v1542_v59  ;;  %2368 = vmatprep.subr.mxu0 %v5023_v8  ;;  %v5458_v13 = vld [vmem:[#allocation53_spill] sm:$0xff] }
 0x183   :  { %v1528_v20 = vadd.f32 %v4420_v14, %v1502_v48  ;;  %v1448_v53 = vpop.permute.xlu1 %1447  ;;  %v1443_v33 = vpop.permute.xlu0 %1442  ;;  %72 = vst [vmem:[#allocation3] sm:$0x1] %v5023_v8  ;;  %73 = vst [vmem:[#allocation4] sm:$0x1] %v5023_v8  ;;  %v1190_v27 = vmul.f32 %v5458_v13, %v5457_v35 }
 0x184   :  { %v4457_v62 = vadd.f32 %v1560_v6, %v4319_v4  ;;  %v1545_v25 = vand.u32 2147483647, %v1529_v30  ;;  %v1505_v29 = vadd.f32 %v1448_v53, %v1392_v18  ;;  %v4462_v51 = vadd.f32 %v1559_v46, %v4325_v52  ;;  %v5460_v53 = vld [vmem:[#allocation59_spill] sm:$0xff] }
 0x185   :  { %v1544_v2 = vand.u32 2147483647, %v1528_v20  ;;  %v1504_v63 = vadd.f32 %v1443_v33, %v1391_v17  ;;  %v1189_v18 = vmul.f32 %v5459_v60, %v5457_v35 }
 0x186   :  { %v1562_v28 = vmul.f32 %v4437_v16, %v1545_v25  ;;  %v1531_v49 = vadd.f32 %v4420_v14, %v1505_v29 }
 0x187   :  { %v1561_v4 = vmul.f32 %v4437_v16, %v1544_v2  ;;  %v1530_v55 = vadd.f32 %v4420_v14, %v1504_v63  ;;  %v1458_v45 = vpop.permute.xlu1 %1457  ;;  %v1453_v26 = vpop.permute.xlu0 %1452 }
 0x188   :  { %v4472_v52 = vadd.f32 %v1562_v28, %v4346_v36  ;;  %v1547_v10 = vand.u32 2147483647, %v1531_v49  ;;  %v1507_v23 = vadd.f32 %v1458_v45, %v1394_v32  ;;  %v1506_v21 = vadd.f32 %v1453_v26, %v1393_v57  ;;  %v5461_v57 = vld [vmem:[#allocation62_spill] sm:$0xff] }
 0x189   :  { %v4477_v11 = vadd.f32 %v1561_v4, %v4350_v47  ;;  %v1546_v42 = vand.u32 2147483647, %v1530_v55  ;;  %v1192_v32 = vmul.f32 %v5460_v53, %v5457_v35  ;;  %v1191_v2 = vmul.f32 %v5461_v57, %v5457_v35 }
 0x18a   :  { %v1564_v59 = vmul.f32 %v4437_v16, %v1547_v10  ;;  %v1533_v48 = vadd.f32 %v4420_v14, %v1507_v23  ;;  %v1532_v17 = vadd.f32 %v4420_v14, %v1506_v21  ;;  %v5462_v23 = vld [vmem:[#allocation40_spill] sm:$0xff]  ;;  %v4597_v8 = vmul.f32 %v5461_v57, %v5445_v0 }
 0x18b   :  { %v1563_v36 = vmul.f32 %v4437_v16, %v1546_v42  ;;  %v1278_v6 = vpop.permute.xlu1 %1277  ;;  %v1273_v20 = vpop.permute.xlu0 %1272  ;;  %v1396_v26 = vmul.f32 %v5462_v23, %v5445_v0  ;;  %v5464_v21 = vld [vmem:[#allocation44_spill] sm:$0xff] }
 0x18c   :  { %v4486_v30 = vadd.f32 %v1564_v59, %v4362_v19  ;;  %v1549_v46 = vand.u32 2147483647, %v1533_v48  ;;  %v1303_v47 = vadd.f32 %v1278_v6, %v1190_v27  ;;  %v1548_v29 = vand.u32 2147483647, %v1532_v17  ;;  %5475 = vst [vmem:[#allocation85_spill] sm:$0xff] %v4597_v8 }
 0x18d   :  { %v4491_v25 = vadd.f32 %v1563_v36, %v4367_v41  ;;  %v1302_v33 = vadd.f32 %v1273_v20, %v1189_v18  ;;  %v1395_v18 = vmul.f32 %v5464_v21, %v5445_v0  ;;  %v5466_v20 = vld [vmem:[#allocation50_spill] sm:$0xff] }
 0x18e   :  { %v1566_v63 = vmul.f32 %v4437_v16, %v1549_v46  ;;  %v1329_v28 = vadd.f32 %v5420_v31, %v1303_v47  ;;  %v1565_v19 = vmul.f32 %v4437_v16, %v1548_v29 }
 0x18f   :  { %v1328_v49 = vadd.f32 %v5420_v31, %v1302_v33  ;;  %v1288_v4 = vpop.permute.xlu1 %1287  ;;  %v1283_v10 = vpop.permute.xlu0 %1282 }
 0x190   :  { %v4500_v55 = vadd.f32 %v1566_v63, %v4378_v39  ;;  %v1345_v45 = vand.u32 2147483647, %v1329_v28  ;;  %v1305_v41 = vadd.f32 %v1288_v4, %v1192_v32  ;;  %v4505_v35 = vadd.f32 %v1565_v19, %v4383_v40  ;;  %v5468_v63 = vld [vmem:[#allocation52_spill] sm:$0xff] }
 0x191   :  { %v1344_v27 = vand.u32 2147483647, %v1328_v49  ;;  %v1304_v42 = vadd.f32 %v1283_v10, %v1191_v2  ;;  %v1398_v32 = vmul.f32 %v5466_v20, %v5445_v0  ;;  %v1397_v28 = vmul.f32 %v5468_v63, %v5445_v0 }
 0x192   :  { %5463 = vst [vmem:[#allocation108_spill] sm:$0xff] %v4505_v35  ;;  %v1362_v59 = vmul.f32 %v5426_v38, %v1345_v45  ;;  %v1331_v48 = vadd.f32 %v5420_v31, %v1305_v41 }
 0x193   :  { %v1361_v39 = vmul.f32 %v5426_v38, %v1344_v27  ;;  %v1330_v36 = vadd.f32 %v5420_v31, %v1304_v42 }
 0x194   :  { %v1468_v17 = vpop.permute.xlu1 %1467  ;;  %v4514_v6 = vadd.f32 %v1362_v59, %v4393_v7  ;;  %v1347_v46 = vand.u32 2147483647, %v1331_v48  ;;  %v1463_v47 = vpop.permute.xlu0 %1462 }
 0x195   :  { %v1509_v40 = vadd.f32 %v1468_v17, %v1396_v26  ;;  %v4519_v29 = vadd.f32 %v1361_v39, %v4397_v37  ;;  %v1346_v33 = vand.u32 2147483647, %v1330_v36  ;;  %v1508_v2 = vadd.f32 %v1463_v47, %v1395_v18 }
 0x196   :  { %5465 = vst [vmem:[#allocation83_spill] sm:$0xff] %v4514_v6  ;;  %v1364_v31 = vmul.f32 %v5426_v38, %v1347_v46 }
 0x197   :  { %5467 = vst [vmem:[#allocation109_spill] sm:$0xff] %v4519_v29  ;;  %v1535_v19 = vadd.f32 %v4420_v14, %v1509_v40  ;;  %v1363_v7 = vmul.f32 %v5426_v38, %v1346_v33  ;;  %v1534_v49 = vadd.f32 %v4420_v14, %v1508_v2 }
 0x198   :  { %v1478_v4 = vpop.permute.xlu1 %1477  ;;  %v4528_v45 = vadd.f32 %v1364_v31, %v4407_v34 }
 0x199   :  { %v1551_v41 = vand.u32 2147483647, %v1535_v19  ;;  %v1511_v37 = vadd.f32 %v1478_v4, %v1398_v32  ;;  %v1473_v10 = vpop.permute.xlu0 %1472  ;;  %v4531_v26 = vadd.f32 %v1363_v7, %v4412_v50  ;;  %v1550_v27 = vand.u32 2147483647, %v1534_v49  ;;  %v2460_v19 = vld [vmem:[#allocation5] sm:$0x1] }
 0x19a   :  { %5469 = vst [vmem:[#allocation73_spill] sm:$0xff] %v4528_v45  ;;  %v1510_v42 = vadd.f32 %v1473_v10, %v1397_v28  ;;  %v1726_v28 = vstv %s2265_s28  ;;  %v1728_v49 = vstv %s2266_s29  ;;  %v1936_v10 = vstv %s2270_s9 }
 0x19b   :  { %5470 = vst [vmem:[#allocation125_spill] sm:$0xff] %v4531_v26  ;;  %v1568_v18 = vmul.f32 %v4437_v16, %v1551_v41  ;;  %v1537_v59 = vadd.f32 %v4420_v14, %v1511_v37  ;;  %v1567_v38 = vmul.f32 %v4437_v16, %v1550_v27  ;;  %v1727_v7 = vmul.f32 %v2460_v19, %v1726_v28 }
 0x19c   :  { %v1536_v48 = vadd.f32 %v4420_v14, %v1510_v42  ;;  %v1638_v39 = vpop.permute.xlu1 %1637 }
 0x19d   :  { %v4538_v34 = vadd.f32 %v1568_v18, %v4425_v12  ;;  %v1553_v36 = vand.u32 2147483647, %v1537_v59  ;;  %v1633_v17 = vpop.permute.xlu0 %1632  ;;  %v4541_v50 = vadd.f32 %v1567_v38, %v4430_v24  ;;  %v1729_v37 = vadd.f32 %v1728_v49, %v1727_v7 }
 0x19e   :  { %v1552_v46 = vand.u32 2147483647, %v1536_v48  ;;  %v1937_v18 = vmul.f32 %v2460_v19, %v1936_v10  ;;  %v1400_v7 = vmul.f32 %v5458_v13, %v5445_v0  ;;  %v4587_v49 = vmul.f32 %v5459_v60, %v5445_v0 }
 0x19f   :  { %5471 = vst [vmem:[#allocation128_spill] sm:$0xff] %v4538_v34  ;;  %5472 = vst [vmem:[#allocation84_spill] sm:$0xff] %v4541_v50  ;;  %v1570_v40 = vmul.f32 %v4437_v16, %v1553_v36  ;;  %v4564_v59 = vrot.slane %v1729_v37, %v5449_v56  ;;  %v1938_v36 = vstv %s4551_s10  ;;  %v4591_v37 = vmul.f32 %v5460_v53, %v5445_v0 }
 0x1a0   :  { %v1569_v47 = vmul.f32 %v4437_v16, %v1552_v46  ;;  %v1648_v32 = vpop.permute.xlu1 %1647 }
 0x1a1   :  { %v4546_v33 = vadd.f32 %v1570_v40, %v4441_v1  ;;  %v1643_v2 = vpop.permute.xlu0 %1642  ;;  %v4553_v1 = vstv %s2263_s30 }
 0x1a2   :  { %v4549_v12 = vadd.f32 %v1569_v47, %v4446_v54  ;;  %v1598_v54 = vmul.f32 %v5446_v58, %v4553_v1  ;;  %v1597_v38 = vmul.f32 %v5448_v9, %v4553_v1  ;;  %v1600_v48 = vmul.f32 %v5450_v43, %v4553_v1 }
 0x1a3   :  { %5473 = vst [vmem:[#allocation121_spill] sm:$0xff] %v4546_v33  ;;  %v1599_v46 = vmul.f32 %v5451_v61, %v4553_v1  ;;  %v1602_v40 = vmul.f32 %v5453_v5, %v4553_v1  ;;  %v1601_v47 = vmul.f32 %v5454_v44, %v4553_v1  ;;  %v1604_v28 = vmul.f32 %v5455_v22, %v4553_v1 }
 0x1a4   :  { %5474 = vst [vmem:[#allocation130_spill] sm:$0xff] %v4549_v12  ;;  %v1603_v19 = vmul.f32 %v5456_v3, %v4553_v1  ;;  %v4603_v45 = vmul.f32 %v5462_v23, %v4553_v1  ;;  %v4605_v12 = vstv %s2268_s11  ;;  %v1939_v33 = vadd.f32 %v1938_v36, %v1937_v18 }
 0x1a5   :  { %v1658_v31 = vpop.permute.xlu1 %1657  ;;  %v1653_v24 = vpop.permute.xlu0 %1652  ;;  %v1711_v50 = vadd.f32 %v1638_v39, %v1598_v54  ;;  %v4609_v34 = vmul.f32 %v5464_v21, %v4553_v1  ;;  %v4613_v29 = vmul.f32 %v5466_v20, %v4553_v1  ;;  %v4617_v0 = vmul.f32 %v5468_v63, %v4553_v1 }
 0x1a6   :  { %5477 = vst [vmem:[#allocation88_spill] sm:$0xff] %v4603_v45  ;;  %v1710_v6 = vadd.f32 %v1633_v17, %v1597_v38  ;;  %v1713_v16 = vadd.f32 %v1648_v32, %v1600_v48  ;;  %v1712_v45 = vadd.f32 %v1643_v2, %v1599_v46  ;;  %v1714_v8 = vadd.f32 %v1653_v24, %v1601_v47 }
 0x1a7   :  { %5478 = vst [vmem:[#allocation136_spill] sm:$0xff] %v4613_v29  ;;  %v1808_v39 = vmul.f32 %v5446_v58, %v4605_v12  ;;  %v5479_v54 = vmov 0.0   ;;  %v4625_v18 = vstv %s4557_s12  ;;  %v4630_v17 = vrot.slane %v1939_v33, %v5449_v56 }
 0x1a8   :  { %2400 = vmatprep.mubr.msk.f32.mxu0 %vm2539_vm0, %v5479_v54  ;;  %v1807_v32 = vmul.f32 %v5448_v9, %v4605_v12  ;;  %v2540_v2 = vmov 1   ;;  %v1737_v58 = vadd.f32 %v4564_v59, %v1711_v50  ;;  %v1810_v24 = vmul.f32 %v5450_v43, %v4605_v12 }
 0x1a9   :  { %v1668_v4 = vpop.permute.xlu1 %1667  ;;  %v1663_v41 = vpop.permute.xlu0 %1662  ;;  %2415 = vset.pattern.permute.xlu1 %v2540_v2  ;;  %2416 = vset.pattern.permute.xlu0 %v2540_v2  ;;  %v1736_v33 = vadd.f32 %v4564_v59, %v1710_v6  ;;  %v1739_v38 = vadd.f32 %v4564_v59, %v1713_v16  ;;  %v1738_v9 = vadd.f32 %v4564_v59, %v1712_v45  ;;  %v4644_v48 = vstv %s4579_s13 }
 0x1aa   :  { %v1717_v36 = vadd.f32 %v1668_v4, %v1604_v28  ;;  %v1809_v4 = vmul.f32 %v5451_v61, %v4605_v12  ;;  %2209 = vperm.xlu1 %2415, %v4337_v15   ;;  %v1740_v50 = vadd.f32 %v4564_v59, %v1714_v8  ;;  %v1812_v43 = vmul.f32 %v5453_v5, %v4605_v12 }
 0x1ab   :  { %v4654_v15 = vmul.f32 %v5454_v44, %v4605_v12  ;;  %v4661_v6 = vmul.f32 %v5455_v22, %v4605_v12  ;;  %v4665_v8 = vmul.f32 %v5456_v3, %v4605_v12  ;;  %v4669_v45 = vmul.f32 %v5458_v13, %v4553_v1 }
 0x1ac   :  { %v1743_v61 = vadd.f32 %v4564_v59, %v1717_v36  ;;  %v1753_v5 = vand.u32 2147483647, %v1737_v58  ;;  %v1752_v22 = vand.u32 2147483647, %v1736_v33  ;;  %v1755_v47 = vand.u32 2147483647, %v1739_v38 }
 0x1ad   :  { %v4555_v27 = vpop.permute.xlu1 %1487  ;;  %v1754_v28 = vand.u32 2147483647, %v1738_v9  ;;  %v4682_v3 = vmul.f32 %v5461_v57, %v4553_v1  ;;  %v1756_v36 = vand.u32 2147483647, %v1740_v50  ;;  %v4691_v33 = vmul.f32 %v5464_v21, %v4605_v12 }
 0x1ae   :  { %v4561_v42 = vpop.permute.xlu0 %1482  ;;  %v1513_v2 = vadd.f32 %v4555_v27, %v1400_v7  ;;  %v1759_v54 = vand.u32 2147483647, %v1743_v61  ;;  %v1770_v38 = vmul.f32 %v4625_v18, %v1753_v5  ;;  %v4700_v7 = vmul.f32 %v5468_v63, %v4605_v12 }
 0x1af   :  { %v1512_v21 = vadd.f32 %v4561_v42, %v4587_v49  ;;  %v1773_v50 = vmul.f32 %v4625_v18, %v1756_v36  ;;  %v4712_v63 = vmul.f32 %v5458_v13, %v4605_v12  ;;  %v4718_v42 = vmul.f32 %v5459_v60, %v4605_v12 }
 0x1b0   :  { %v1539_v61 = vadd.f32 %v4420_v14, %v1513_v2  ;;  %v1786_v49 = vadd.f32 %v1770_v38, %v4457_v62 }
 0x1b1   :  { %v4593_v10 = vpop.permute.xlu1 %1497 }
 0x1b2   :  { %v4599_v26 = vpop.permute.xlu0 %1492  ;;  %v1555_v62 = vand.u32 2147483647, %v1539_v61  ;;  %v1515_v2 = vadd.f32 %v4593_v10, %v4591_v37  ;;  %v5483_v37 = vld [vmem:[#allocation88_spill] sm:$0xff] }
 0x1b3   :  { %5476 = vst [vmem:[#allocation122_spill] sm:$0xff] %v4599_v26  ;;  %v1715_v26 = vadd.f32 %v1658_v31, %v1602_v40  ;;  %v1716_v31 = vadd.f32 %v1663_v41, %v1603_v19  ;;  %v4678_v40 = vmul.f32 %v5460_v53, %v4553_v1 }
 0x1b5   :  { %v4619_v35 = vpop.permute.xlu1 %1677  ;;  %v1741_v46 = vadd.f32 %v4564_v59, %v1715_v26  ;;  %v1742_v44 = vadd.f32 %v4564_v59, %v1716_v31  ;;  %v4674_v26 = vmul.f32 %v5459_v60, %v4553_v1  ;;  %v4687_v31 = vmul.f32 %v5462_v23, %v4605_v12 }
 0x1b6   :  { %v4627_v29 = vpop.permute.xlu0 %1672  ;;  %v4695_v1 = vmul.f32 %v5466_v20, %v4605_v12  ;;  %v1769_v23 = vmul.f32 %v4625_v18, %v1752_v22  ;;  %v1719_v10 = vadd.f32 %v4619_v35, %v5483_v37 }
 0x1b7   :  { %v1757_v19 = vand.u32 2147483647, %v1741_v46  ;;  %v1758_v9 = vand.u32 2147483647, %v1742_v44  ;;  %v1771_v46 = vmul.f32 %v4625_v18, %v1754_v28 }
 0x1b8   :  { %v1785_v13 = vadd.f32 %v1769_v23, %v4462_v51 }
 0x1b9   :  { %v4648_v41 = vpop.permute.xlu1 %1687  ;;  %v1774_v20 = vmul.f32 %v4625_v18, %v1757_v19 }
 0x1ba   :  { %v4657_v16 = vpop.permute.xlu0 %1682 }
 0x1bb   :  { %v1790_v60 = vadd.f32 %v1774_v20, %v4486_v30 }
 0x1bd   :  { %v1848_v58 = vpop.permute.xlu1 %1847 }
 0x1be   :  { %v1921_v56 = vadd.f32 %v1848_v58, %v1808_v39  ;;  %v1843_v53 = vpop.permute.xlu0 %1842  ;;  %v1772_v39 = vmul.f32 %v4625_v18, %v1755_v47  ;;  %v1775_v47 = vmul.f32 %v4625_v18, %v1758_v9 }
 0x1bf   :  { %v1920_v27 = vadd.f32 %v1843_v53, %v1807_v32  ;;  %v1776_v32 = vmul.f32 %v4625_v18, %v1759_v54  ;;  %v1538_v54 = vadd.f32 %v4420_v14, %v1512_v21  ;;  %v5482_v21 = vld [vmem:[#allocation122_spill] sm:$0xff] }
 0x1c0   :  { %v1947_v5 = vadd.f32 %v4630_v17, %v1921_v56  ;;  %v4725_v36 = vadd.f32 %v1772_v39, %v4472_v52  ;;  %v4728_v56 = vadd.f32 %v1771_v46, %v4477_v11  ;;  %v5480_v11 = vld [vmem:[#allocation108_spill] sm:$0xff]  ;;  %v5481_v46 = vld [vmem:[#allocation85_spill] sm:$0xff] }
 0x1c1   :  { %v1858_v53 = vpop.permute.xlu1 %1857  ;;  %v1946_v28 = vadd.f32 %v4630_v17, %v1920_v27  ;;  %v1791_v27 = vadd.f32 %v1775_v47, %v5480_v11  ;;  %v1514_v20 = vadd.f32 %v5482_v21, %v5481_v46 }
 0x1c2   :  { %v1923_v44 = vadd.f32 %v1858_v53, %v1810_v24  ;;  %v1853_v22 = vpop.permute.xlu0 %1852  ;;  %v1789_v24 = vadd.f32 %v1773_v50, %v4491_v25  ;;  %v1963_v51 = vand.u32 2147483647, %v1947_v5  ;;  %v1554_v25 = vand.u32 2147483647, %v1538_v54  ;;  %v5484_v50 = vld [vmem:[#allocation82_spill] sm:$0xff] }
 0x1c3   :  { %v1922_v19 = vadd.f32 %v1853_v22, %v1809_v4  ;;  %v1792_v4 = vadd.f32 %v1776_v32, %v4500_v55  ;;  %v1962_v23 = vand.u32 2147483647, %v1946_v28  ;;  %v1572_v61 = vmul.f32 %v5484_v50, %v1555_v62 }
 0x1c4   :  { %v1949_v52 = vadd.f32 %v4630_v17, %v1923_v44  ;;  %v1718_v53 = vadd.f32 %v4627_v29, %v4609_v34  ;;  %v1980_v5 = vmul.f32 %v4644_v48, %v1963_v51 }
 0x1c5   :  { %v1868_v58 = vpop.permute.xlu1 %1867  ;;  %v1948_v39 = vadd.f32 %v4630_v17, %v1922_v19  ;;  %v1979_v28 = vmul.f32 %v4644_v48, %v1962_v23 }
 0x1c6   :  { %v1925_v38 = vadd.f32 %v1868_v58, %v1812_v43  ;;  %v1863_v9 = vpop.permute.xlu0 %1862  ;;  %v4747_v43 = vadd.f32 %v4420_v14, %v1515_v2  ;;  %v1965_v44 = vand.u32 2147483647, %v1949_v52  ;;  %v1745_v2 = vadd.f32 %v4564_v59, %v1719_v10  ;;  %v5485_v58 = vld [vmem:[#allocation136_spill] sm:$0xff] }
 0x1c7   :  { %v1924_v30 = vadd.f32 %v1863_v9, %v4654_v15  ;;  %v1964_v19 = vand.u32 2147483647, %v1948_v39  ;;  %v1721_v29 = vadd.f32 %v4648_v41, %v5485_v58  ;;  %v1744_v52 = vadd.f32 %v4564_v59, %v1718_v53 }
 0x1c8   :  { %v1951_v55 = vadd.f32 %v4630_v17, %v1925_v38  ;;  %v1982_v23 = vmul.f32 %v4644_v48, %v1965_v44  ;;  %v4771_v46 = vadd.f32 %v1979_v28, %v1785_v13  ;;  %v1557_v28 = vand.u32 2147483647, %v4747_v43 }
 0x1c9   :  { %v1950_v32 = vadd.f32 %v4630_v17, %v1924_v30  ;;  %v1878_v15 = vpop.permute.xlu1 %1877  ;;  %v1981_v21 = vmul.f32 %v4644_v48, %v1964_v19  ;;  %v1747_v10 = vadd.f32 %v4564_v59, %v1721_v29 }
 0x1ca   :  { %v1967_v22 = vand.u32 2147483647, %v1951_v55  ;;  %v1927_v47 = vadd.f32 %v1878_v15, %v4661_v6  ;;  %v1873_v35 = vpop.permute.xlu0 %1872  ;;  %v1720_v6 = vadd.f32 %v4657_v16, %v4617_v0  ;;  %v1571_v16 = vmul.f32 %v5484_v50, %v1554_v25 }
 0x1cb   :  { %v1966_v54 = vand.u32 2147483647, %v1950_v32  ;;  %v1926_v62 = vadd.f32 %v1873_v35, %v4665_v8  ;;  %v4766_v8 = vadd.f32 %v1980_v5, %v1786_v49  ;;  %v1761_v15 = vand.u32 2147483647, %v1745_v2 }
 0x1cc   :  { %v1984_v34 = vmul.f32 %v4644_v48, %v1967_v22  ;;  %v1953_v51 = vadd.f32 %v4630_v17, %v1927_v47  ;;  %v1746_v53 = vadd.f32 %v4564_v59, %v1720_v6  ;;  %v4787_v25 = vadd.f32 %v1982_v23, %v4725_v36 }
 0x1cd   :  { %v1983_v38 = vmul.f32 %v4644_v48, %v1966_v54  ;;  %v1952_v9 = vadd.f32 %v4630_v17, %v1926_v62  ;;  %v1698_v11 = vpop.permute.xlu1 %1697  ;;  %v1760_v47 = vand.u32 2147483647, %v1744_v52  ;;  %v1763_v19 = vand.u32 2147483647, %v1747_v10  ;;  %v5488_v52 = vld [vmem:[#allocation109_spill] sm:$0xff] }
 0x1ce   :  { %v4769_v39 = vadd.f32 %v1984_v34, %v1790_v60  ;;  %v1969_v41 = vand.u32 2147483647, %v1953_v51  ;;  %v1693_v30 = vpop.permute.xlu0 %1692  ;;  %v1540_v60 = vadd.f32 %v4420_v14, %v1514_v20  ;;  %v1723_v44 = vadd.f32 %v1698_v11, %v4669_v45 }
 0x1cf   :  { %v4774_v37 = vadd.f32 %v1983_v38, %v1789_v24  ;;  %v1968_v0 = vand.u32 2147483647, %v1952_v9  ;;  %v4793_v14 = vadd.f32 %v1981_v21, %v4728_v56  ;;  %v1722_v35 = vadd.f32 %v1693_v30, %v4674_v26  ;;  %v5487_v26 = vld [vmem:[#allocation83_spill] sm:$0xff] }
 0x1d0   :  { %v2012_v49 = vmax.f32 %v4766_v8, %v4769_v39  ;;  %v1986_v55 = vmul.f32 %v4644_v48, %v1969_v41  ;;  %v1556_v45 = vand.u32 2147483647, %v1540_v60  ;;  %v1762_v62 = vand.u32 2147483647, %v1746_v53 }
 0x1d1   :  { %v2011_v13 = vmax.f32 %v4771_v46, %v4774_v37  ;;  %v1985_v24 = vmul.f32 %v4644_v48, %v1968_v0  ;;  %v1708_v32 = vpop.permute.xlu1 %1707  ;;  %v1588_v43 = vadd.f32 %v1572_v61, %v5487_v26  ;;  %v1778_v58 = vmul.f32 %v4625_v18, %v1761_v15 }
 0x1d2   :  { %v4789_v5 = vadd.f32 %v1986_v55, %v1792_v4  ;;  %v1703_v22 = vpop.permute.xlu0 %1702  ;;  %v5486_v4 = vld [vmem:[#allocation59_spill] sm:$0xff]  ;;  %v1749_v29 = vadd.f32 %v4564_v59, %v1723_v44  ;;  %v1587_v6 = vadd.f32 %v1571_v16, %v5488_v52  ;;  %v1777_v38 = vmul.f32 %v4625_v18, %v1760_v47  ;;  %v5489_v16 = vld [vmem:[#allocation128_spill] sm:$0xff]  ;;  %v5491_v44 = vld [vmem:[#allocation121_spill] sm:$0xff] }
 0x1d3   :  { %v4795_v20 = vadd.f32 %v1985_v24, %v1791_v27  ;;  %v4803_v54 = vmul.f32 %v5486_v4, %v4605_v12  ;;  %v4809_v27 = vmul.f32 %v5461_v57, %v4605_v12  ;;  %v1748_v9 = vadd.f32 %v4564_v59, %v1722_v35  ;;  %v5490_v24 = vld [vmem:[#allocation84_spill] sm:$0xff] }
 0x1d4   :  { %v2014_v36 = vmax.f32 %v4787_v25, %v4789_v5  ;;  %v1574_v57 = vmul.f32 %v5484_v50, %v1557_v28  ;;  %v1780_v12 = vmul.f32 %v4625_v18, %v1763_v19  ;;  %v1725_v61 = vadd.f32 %v1708_v32, %v4678_v40  ;;  %v5492_v28 = vld [vmem:[#allocation130_spill] sm:$0xff] }
 0x1d5   :  { %v2013_v56 = vmax.f32 %v4793_v14, %v4795_v20  ;;  %v1888_v2 = vpop.permute.xlu1 %1887  ;;  %v1573_v41 = vmul.f32 %v5484_v50, %v1556_v45  ;;  %v1724_v30 = vadd.f32 %v1703_v22, %v4682_v3  ;;  %v1794_v10 = vadd.f32 %v1778_v58, %v5489_v16 }
 0x1d6   :  { %v1929_v34 = vadd.f32 %v1888_v2, %v4687_v31  ;;  %v1883_v51 = vpop.permute.xlu0 %1882  ;;  %v1779_v31 = vmul.f32 %v4625_v18, %v1762_v62  ;;  %v1793_v40 = vadd.f32 %v1777_v38, %v5490_v24  ;;  %v1764_v32 = vand.u32 2147483647, %v1748_v9 }
 0x1d7   :  { %v1928_v11 = vadd.f32 %v1883_v51, %v4691_v33  ;;  %v1765_v33 = vand.u32 2147483647, %v1749_v29  ;;  %v1796_v47 = vadd.f32 %v1780_v12, %v5491_v44  ;;  %v1751_v3 = vadd.f32 %v4564_v59, %v1725_v61 }
 0x1d8   :  { %v1955_v23 = vadd.f32 %v4630_v17, %v1929_v34  ;;  %v1795_v19 = vadd.f32 %v1779_v31, %v5492_v28  ;;  %v1750_v4 = vadd.f32 %v4564_v59, %v1724_v30  ;;  %v1781_v34 = vmul.f32 %v4625_v18, %v1764_v32  ;;  %v5493_v32 = vld [vmem:[#allocation73_spill] sm:$0xff] }
 0x1d9   :  { %v1954_v21 = vadd.f32 %v4630_v17, %v1928_v11  ;;  %v1898_v0 = vpop.permute.xlu1 %1897  ;;  %v1782_v2 = vmul.f32 %v4625_v18, %v1765_v33  ;;  %v1767_v38 = vand.u32 2147483647, %v1751_v3 }
 0x1da   :  { %v1971_v55 = vand.u32 2147483647, %v1955_v23  ;;  %v1931_v60 = vadd.f32 %v1898_v0, %v4695_v1  ;;  %v1893_v53 = vpop.permute.xlu0 %1892  ;;  %v1766_v61 = vand.u32 2147483647, %v1750_v4 }
 0x1db   :  { %v1970_v15 = vand.u32 2147483647, %v1954_v21  ;;  %v1930_v50 = vadd.f32 %v1893_v53, %v4700_v7  ;;  %v1798_v30 = vadd.f32 %v1782_v2, %v1588_v43 }
 0x1dc   :  { %v1988_v22 = vmul.f32 %v4644_v48, %v1971_v55  ;;  %v1957_v35 = vadd.f32 %v4630_v17, %v1931_v60 }
 0x1dd   :  { %v1987_v1 = vmul.f32 %v4644_v48, %v1970_v15  ;;  %v1956_v45 = vadd.f32 %v4630_v17, %v1930_v50  ;;  %v1908_v62 = vpop.permute.xlu1 %1907  ;;  %v1590_v15 = vadd.f32 %v1574_v57, %v5493_v32 }
 0x1de   :  { %v4840_v7 = vadd.f32 %v1988_v22, %v1794_v10  ;;  %v1973_v26 = vand.u32 2147483647, %v1957_v35  ;;  %v1933_v58 = vadd.f32 %v1908_v62, %v4712_v63  ;;  %v1903_v29 = vpop.permute.xlu0 %1902  ;;  %v1797_v10 = vadd.f32 %v1781_v34, %v1587_v6 }
 0x1df   :  { %v4844_v51 = vadd.f32 %v1987_v1, %v1793_v40  ;;  %v1972_v52 = vand.u32 2147483647, %v1956_v45  ;;  %v1932_v59 = vadd.f32 %v1903_v29, %v4718_v42 }
 0x1e0   :  { %v2016_v9 = vmax.f32 %v2012_v49, %v4840_v7  ;;  %v1990_v11 = vmul.f32 %v4644_v48, %v1973_v26  ;;  %v1959_v12 = vadd.f32 %v4630_v17, %v1933_v58 }
 0x1e1   :  { %v2015_v63 = vmax.f32 %v2011_v13, %v4844_v51  ;;  %v1989_v23 = vmul.f32 %v4644_v48, %v1972_v52  ;;  %v1958_v42 = vadd.f32 %v4630_v17, %v1932_v59  ;;  %v1918_v31 = vpop.permute.xlu1 %1917  ;;  %v1784_v13 = vmul.f32 %v4625_v18, %v1767_v38  ;;  %v4883_v59 = vld [vmem:[#allocation2] sm:$0x1] }
 0x1e2   :  { %v4859_v21 = vadd.f32 %v1990_v11, %v1796_v47  ;;  %v1975_v0 = vand.u32 2147483647, %v1959_v12  ;;  %v1935_v49 = vadd.f32 %v1918_v31, %v4803_v54  ;;  %v1913_v16 = vpop.permute.xlu0 %1912  ;;  %v1783_v54 = vmul.f32 %v4625_v18, %v1766_v61  ;;  %v5495_v11 = vld [vmem:[#allocation29_spill] sm:$0xff] }
 0x1e3   :  { %v4862_v33 = vadd.f32 %v1989_v23, %v1795_v19  ;;  %v1974_v55 = vand.u32 2147483647, %v1958_v42  ;;  %v1934_v60 = vadd.f32 %v1913_v16, %v4809_v27  ;;  %v1800_v35 = vadd.f32 %v1784_v13, %v1590_v15 }
 0x1e4   :  { %v2018_v53 = vmax.f32 %v2014_v36, %v4859_v21  ;;  %v1992_v43 = vmul.f32 %v4644_v48, %v1975_v0  ;;  %v1961_v24 = vadd.f32 %v4630_v17, %v1935_v49  ;;  %v5494_v36 = vld [vmem:[#allocation125_spill] sm:$0xff] }
 0x1e5   :  { %v2017_v6 = vmax.f32 %v2013_v56, %v4862_v33  ;;  %v1991_v27 = vmul.f32 %v4644_v48, %v1974_v55  ;;  %v1960_v40 = vadd.f32 %v4630_v17, %v1934_v60  ;;  %v1589_v47 = vadd.f32 %v1573_v41, %v5494_v36 }
 0x1e6   :  { %v2008_v50 = vadd.f32 %v1992_v43, %v1798_v30  ;;  %v1977_v44 = vand.u32 2147483647, %v1961_v24 }
 0x1e7   :  { %v2007_v3 = vadd.f32 %v1991_v27, %v1797_v10  ;;  %v1976_v22 = vand.u32 2147483647, %v1960_v40  ;;  %v1799_v19 = vadd.f32 %v1783_v54, %v1589_v47 }
 0x1e8   :  { %v2020_v28 = vmax.f32 %v2016_v9, %v2008_v50  ;;  %v1994_v18 = vmul.f32 %v4644_v48, %v1977_v44 }
 0x1e9   :  { %v2019_v4 = vmax.f32 %v2015_v63, %v2007_v3  ;;  %v1993_v56 = vmul.f32 %v4644_v48, %v1976_v22 }
 0x1ea   :  { %v2010_v1 = vadd.f32 %v1994_v18, %v1800_v35 }
 0x1eb   :  { %v2023_v45 = vmax.f32 %v2019_v4, %v2020_v28  ;;  %v2009_v62 = vadd.f32 %v1993_v56, %v1799_v19 }
 0x1ec   :  { %v2022_v17 = vmax.f32 %v2018_v53, %v2010_v1 }
 0x1ed   :  { %v2021_v2 = vmax.f32 %v2017_v6, %v2009_v62  ;;  %v5496_v6 = vmov 0.0  }
 0x1ef   :  { %v2024_v57 = vmax.f32 %v2021_v2, %v2022_v17 }
 0x1f1   :  { %v2025_v26 = vmax.f32 %v2023_v45, %v2024_v57  ;;  %v2541_v57 = vmov 1966171168  }
 0x1f3   :  { %v2026_v58 = vrot.slane %v2025_v26, 4 }
 0x1f5   :  { %v2027_v29 = vmax.f32 %v2025_v26, %v2026_v58  ;;  %v2170_v26 = vunpack.c.l.s4 %v2541_v57 }
 0x1f7   :  { %v2028_v41 = vrot.slane %v2027_v29, 2  ;;  %v2171_v58 = vunpack.c.0.s8 %v2170_v26 }
 0x1f9   :  { %v2029_v34 = vmax.f32 %v2027_v29, %v2028_v41  ;;  %v2162_v41 = vld [vmem:[#allocation3] sm:$0x1] }
 0x1fb   :  { %v2030_v52 = vrot.slane %v2029_v34, 1 }
 0x1fd   :  { %v2031_v38 = vmax.f32 %v2029_v34, %v2030_v52  ;;  %v5497_v34 = vld [vmem:[#allocation21_spill] sm:$0xff] }
 0x1fe   :  { %v2174_v52 = vsub.s32 %v2171_v58, %v5497_v34 }
 0x1ff   :  { %v4886_v9 = vmax.f32 %v4883_v59, %v2031_v38 }
 0x201   :  { %v4890_v48 = vrot.slane %v4886_v9, %v5495_v11  ;;  %2187 = vst [vmem:[#allocation2] sm:$0x1] %v4886_v9  ;;  %v2034_v12 = vsub.f32 %v4883_v59, %v4886_v9 }
 0x203   :  { %v2057_v61 = vsub.f32 %v2009_v62, %v4890_v48  ;;  %v2058_v63 = vsub.f32 %v2010_v1, %v4890_v48  ;;  %v2056_v23 = vsub.f32 %v2008_v50, %v4890_v48  ;;  %v2055_v42 = vsub.f32 %v2007_v3, %v4890_v48  ;;  %v2091_v62 = vld [vmem:[%s4951_s2] sm:$0xff]  ;;  %s2542_s2 = smov [#allocation12]  }
 0x204   :  { %v2054_v31 = vsub.f32 %v4859_v21, %v4890_v48  ;;  %v2053_v30 = vsub.f32 %v4862_v33, %v4890_v48  ;;  %v2052_v0 = vsub.f32 %v4840_v7, %v4890_v48  ;;  %v2051_v49 = vsub.f32 %v4844_v51, %v4890_v48  ;;  %s2220_s15 = sshll.u32 %s2542_s2, 4  ;;  %s2221_s15 = int_to_ptr.vmem [resolvable:$true] %s2220_s15 }
 0x205   :  { %v2089_v16 = vmul.f32 1.442695, %v2058_v63  ;;  %v2050_v10 = vsub.f32 %v4789_v5, %v4890_v48  ;;  %v2087_v55 = vmul.f32 1.442695, %v2057_v61  ;;  %v2049_v60 = vsub.f32 %v4795_v20, %v4890_v48  ;;  %s2505_s16 = scalar_lea.vmem %s2221_s15, 128  ;;  %p2510_p2 = scmp.lt.s32.totalorder %s2221_s15, %s2221_s15 }
 0x206   :  { %v2085_v13 = vmul.f32 1.442695, %v2056_v23  ;;  %v2048_v21 = vsub.f32 %v4769_v39, %v4890_v48  ;;  %v2047_v33 = vsub.f32 %v4774_v37, %v4890_v48  ;;  %v2046_v7 = vsub.f32 %v4787_v25, %v4890_v48  ;;  %v2166_v23 = vld [vmem:[#allocation4] sm:$0x1]  ;;  %p2506_p1 = scmp.ne.s32.totalorder %s2221_s15, %s2505_s16  ;;  %p2511_p3 = scmp.lt.s32.totalorder %s2505_s16, %s2505_s16 }
 0x207   :  { %2417 = vpow2.f32 %v2089_v16  ;;  %v2045_v51 = vsub.f32 %v4793_v14, %v4890_v48  ;;  %v2044_v5 = vsub.f32 %v4766_v8, %v4890_v48  ;;  %v2083_v53 = vmul.f32 1.442695, %v2055_v42 }
 0x208   :  { %2419 = vpow2.f32 %v2087_v55  ;;  %v2043_v20 = vsub.f32 %v4771_v46, %v4890_v48  ;;  %v2081_v43 = vmul.f32 1.442695, %v2054_v31  ;;  %v2079_v39 = vmul.f32 1.442695, %v2053_v30  ;;  %v2199_v55 = vpop.permute.xlu0 %2198  ;;  %p2512_p4 = por %p2511_p3, %p2510_p2 }
 0x209   :  { %2421 = vpow2.f32 %v2085_v13  ;;  %v2077_v37 = vmul.f32 1.442695, %v2052_v0  ;;  %v2075_v24 = vmul.f32 1.442695, %v2051_v49  ;;  %v2073_v25 = vmul.f32 1.442695, %v2050_v10 }
 0x20a   :  { %2423 = vpow2.f32 %v2083_v53  ;;  %v2071_v14 = vmul.f32 1.442695, %v2049_v60  ;;  %v2069_v46 = vmul.f32 1.442695, %v2048_v21  ;;  %v2067_v40 = vmul.f32 1.442695, %v2047_v33  ;;  %p2513_p5 = pnand %p2512_p4, %p2506_p1 }
 0x20b   :  { %2425 = vpow2.f32 %v2081_v43  ;;  %v2065_v15 = vmul.f32 1.442695, %v2046_v7  ;;  %v2063_v44 = vmul.f32 1.442695, %v2045_v51  ;;  %v2061_v47 = vmul.f32 1.442695, %v2044_v5 }
 0x20c   :  { %2427 = vpow2.f32 %v2079_v39  ;;  %v2059_v22 = vmul.f32 1.442695, %v2043_v20  ;;  %v2035_v2 = vmul.f32 1.442695, %v2034_v12 }
 0x20d   :  { %2429 = vpow2.f32 %v2077_v37 }
 0x20e   :  { %2431 = vpow2.f32 %v2075_v24 }
 0x20f   :  { %2433 = vpow2.f32 %v2073_v25 }
 0x210   :  { %2435 = vpow2.f32 %v2071_v14 }
 0x211   :  { %2437 = vpow2.f32 %v2069_v46 }
 0x212   :  { %2439 = vpow2.f32 %v2067_v40 }
 0x213   :  { %2441 = vpow2.f32 %v2065_v15 }
 0x214   :  { %v2418_v54 = vpop.eup %2417  ;;  %2443 = vpow2.f32 %v2063_v44 }
 0x215   :  { %2369 = vmatpush3.msra.mxu0 %v2418_v54  ;;  %v2420_v8 = vpop.eup %2419  ;;  %2445 = vpow2.f32 %v2061_v47 }
 0x216   :  { %2370 = vmatprep.subr.mxu0 %v5496_v6  ;;  %v2422_v27 = vpop.eup %2421  ;;  %2447 = vpow2.f32 %v2059_v22 }
 0x217   :  { %2371 = vmatpush3.msra.mxu0 %v2420_v8  ;;  %v2424_v32 = vpop.eup %2423  ;;  %2449 = vpow2.f32 %v2035_v2 }
 0x218   :  { %2372 = vmatprep.subr.mxu0 %v5496_v6  ;;  %v2426_v50 = vpop.eup %2425 }
 0x219   :  { %2373 = vmatpush3.msra.mxu0 %v2422_v27  ;;  %v2428_v36 = vpop.eup %2427 }
 0x21a   :  { %2374 = vmatprep.subr.mxu0 %v5496_v6  ;;  %v2430_v3 = vpop.eup %2429 }
 0x21b   :  { %2375 = vmatpush3.msra.mxu0 %v2424_v32  ;;  %v2432_v35 = vpop.eup %2431 }
 0x21c   :  { %2376 = vmatprep.subr.mxu0 %v5496_v6  ;;  %v2434_v28 = vpop.eup %2433 }
 0x21d   :  { %2377 = vmatpush3.msra.mxu0 %v2426_v50  ;;  %v2436_v18 = vpop.eup %2435 }
 0x21e   :  { %2378 = vmatprep.subr.mxu0 %v5496_v6  ;;  %v2438_v19 = vpop.eup %2437 }
 0x21f   :  { %2379 = vmatpush3.msra.mxu0 %v2428_v36  ;;  %v2440_v4 = vpop.eup %2439 }
 0x220   :  { %2380 = vmatprep.subr.mxu0 %v5496_v6  ;;  %v2442_v56 = vpop.eup %2441 }
 0x221   :  { %2381 = vmatpush3.msra.mxu0 %v2430_v3  ;;  %v2444_v1 = vpop.eup %2443 }
 0x222   :  { %2382 = vmatprep.subr.mxu0 %v5496_v6  ;;  %v2446_v45 = vpop.eup %2445 }
 0x223   :  { %2383 = vmatpush3.msra.mxu0 %v2432_v35  ;;  %v2448_v17 = vpop.eup %2447 }
 0x224   :  { %2384 = vmatprep.subr.mxu0 %v5496_v6  ;;  %v2450_v29 = vpop.eup %2449 }
 0x225   :  { %2385 = vmatpush3.msra.mxu0 %v2434_v28  ;;  %v2163_v38 = vmul.f32 %v2450_v29, %v2162_v41  ;;  %v2167_v30 = vmul.f32 %v2450_v29, %v2166_v23  ;;  %v2210_v60 = vpop.permute.xlu1 %2209 }
 0x226   :  { %2386 = vmatprep.subr.mxu0 %v5496_v6 }
 0x227   :  { %2387 = vmatpush3.msra.mxu0 %v2436_v18 }
 0x228   :  { %2388 = vmatprep.subr.mxu0 %v5496_v6 }
 0x229   :  { %2389 = vmatpush3.msra.mxu0 %v2438_v19 }
 0x22a   :  { %2390 = vmatprep.subr.mxu0 %v5496_v6 }
 0x22b   :  { %2391 = vmatpush3.msra.mxu0 %v2440_v4 }
 0x22c   :  { %2392 = vmatprep.subr.mxu0 %v5496_v6 }
 0x22d   :  { %2393 = vmatpush3.msra.mxu0 %v2442_v56 }
 0x22e   :  { %2394 = vmatprep.subr.mxu0 %v5496_v6 }
 0x22f   :  { %2395 = vmatpush3.msra.mxu0 %v2444_v1 }
 0x230   :  { %2396 = vmatprep.subr.mxu0 %v5496_v6 }
 0x231   :  { %2397 = vmatpush3.msra.mxu0 %v2446_v45 }
 0x232   :  { %2398 = vmatprep.subr.mxu0 %v5496_v6 }
 0x233   :  { %2399 = vmatpush3.msra.mxu0 %v2448_v17 }
 0x234   :  { %2401 = vmatmul.mubr.f32.vlgmr.msra.gmra.mxu0 %v2091_v62 }
 0x2f4   :  { %v2158_v48 = vpop.f32.mrf.mxu0 }
 0x2f5   :  { %v2164_v61 = vadd.f32 %v2163_v38, %v2158_v48  ;;  %v2175_v63 = vrot.slane %v2158_v48, %v2174_v52 }
 0x2f6   :  { %v2402_v42 = vpop.f32.mrf.mxu0 }
 0x2f7   :  { %2165 = vst [vmem:[#allocation3] sm:$0x1] %v2164_v61  ;;  %v2176_v31 = vcombine.high %v2175_v63, %v2175_v63 }
 0x2f9   :  { %v2183_v0 = vrot.slane %v2176_v31, %v2174_v52 }
 0x2fb   :  { %v2185_v59 = vadd.f32 %v2183_v0, %v2167_v30 }
 0x2fd   :  { %2186 = vst [vmem:[#allocation4] sm:$0x1] %v2185_v59 }
 0x2fe   :  { %v2192_v9 = vld [vmem:[#allocation3] sm:$0x1] }
 0x2ff   :  { %2451 = vrcp.f32 %v2192_v9 }
 0x304   :  { %v2191_v49 = vld [vmem:[#allocation4] sm:$0x1] }
 0x30c   :  { %v2452_v12 = vpop.eup %2451 }
 0x30d   :  { %v2194_v16 = vmul.f32 %v2452_v12, %v2191_v49 }
 0x30f   :  { %v2205_v10 = vrot.slane %v2194_v16, %v5495_v11 }
 0x311   :  { %v2207_v13 = vmul.f32 %v2205_v10, %v2199_v55 }
 0x313   :  { %v2212_v21 = vadd.f32 %v2210_v60, %v2207_v13 }
 0x315   :  { %2213 = vst [vmem:[#allocation12] sm:$0xff] %v2212_v21 }
 0x316   :  { %2516 = shalt.err (!%p2513_p5)
}
 0x317   :  { %2223 = dma.vmem_to_hbm [thread:$0]  %s2221_s15, 128, %s4957_s8, [#allocation7]  }
 0x318   :  { %2531 = dma.done.wait [#allocation7], 128  }
 0x319   :  { %2532 = vsyncadd [#allocation7], 4294967168 }
 0x31a   :  { %2227 = vsyncpa [#allocation6], 1 }
 0x31b   :  { %2228 = vsyncpa [#allocation7], 1 }
 0x31c   :  { %2229 = vsyncpa [#allocation8], 1 }
 0x31d   :  { %2230 = vsyncpa [#allocation11], 1 }

</bundles_post_ra>
